<compile_context>
chip_gen: v6e
topology: v6e:2x2x1
jax: 0.10.0
libtpu: 0.0.40
codegen_flags: <defaults>
</compile_context>

<pallas_src>
import functools

import numpy as np
import jax
import jax.numpy as jnp
from jax import lax
from jax.experimental import pallas as pl
from jax.experimental.pallas import tpu as pltpu


def _relu(v):
    return jnp.maximum(v, jnp.zeros((), v.dtype))


def _resblock_kernel(*refs, downsample, fuse_sc, use_halo, tap_accumulate):
    """One (batch, row-tile) step of ResidualBlock_D (NHWC, channels on lanes)."""
    if use_halo:
        (xm_ref, xh_ref, w1_ref, b1_ref, w2_ref, b2_ref, out_ref,
         xs_ref, *rest) = refs
    else:
        (xm_ref, w1_ref, b1_ref, w2_ref, b2_ref, out_ref, *rest) = refs
        xh_ref = xs_ref = None
    h1p_ref = rest[0]
    pool_ref = rest[1] if downsample else None

    if use_halo:
        th = xm_ref.shape[0]
        # Stage the (TH+4)-row padded window in one bf16 scratch (no concat value).
        xs_ref[0:th, :, :] = xm_ref[...]
        xs_ref[th:th + 4, :, :] = xh_ref[...]
        xs = xs_ref
    else:
        th = xm_ref.shape[0] - 4
        xs = xm_ref
    wp4 = xs.shape[1]
    cin = xs.shape[2]
    w = wp4 - 4
    cout = w2_ref.shape[-1]
    offs = [(ky, kx) for ky in range(3) for kx in range(3)]

    # Raw (un-relu'd) x for the shortcut, interior (th, w) window (bf16).
    x_in = xs[2:th + 2, 2:w + 2, :]

    # ---- conv1: relu(x) -> 3x3 conv -> +b1 -> relu, on the (th+2) x w window ----
    if tap_accumulate:
        acc = None
        for t, (ky, kx) in enumerate(offs):
            tap = _relu(xs[ky:ky + th + 2, 1 + kx:1 + kx + w, :])
            d = jnp.dot(tap.reshape((th + 2) * w, cin), w1_ref[t],
                        preferred_element_type=jnp.float32)
            acc = d if acc is None else acc + d
        h1 = acc + b1_ref[...]
    else:
        a0 = _relu(xs[...])                       # relu(pad(x)) == pad(relu(x))
        taps1 = [a0[ky:ky + th + 2, 1 + kx:1 + kx + w, :] for ky, kx in offs]
        p1 = jnp.concatenate(taps1, axis=-1).reshape((th + 2) * w, 9 * cin)
        h1 = jnp.dot(p1, w1_ref[...],
                     preferred_element_type=jnp.float32) + b1_ref[...]
    h1 = jnp.maximum(h1, 0.0).astype(jnp.bfloat16).reshape(th + 2, w, cin)

    # ---- conv2's zero-padded input frame in tile-local scratch (bf16) ----
    zcol = jnp.zeros((th + 2, 1, cin), jnp.bfloat16)
    h1p_ref[:, 0:1, :] = zcol                     # left zero column (global col -1)
    h1p_ref[:, w + 1:w + 2, :] = zcol             # right zero column (global col W)
    h1p_ref[:, 1:w + 1, :] = h1

    hidx = pl.program_id(1)
    zrow = jnp.zeros((1, w, cin), jnp.bfloat16)

    @pl.when(hidx == 0)                           # image top boundary -> zero row
    def _():
        h1p_ref[0:1, 1:w + 1, :] = zrow

    @pl.when(hidx == pl.num_programs(1) - 1)      # image bottom boundary -> zero row
    def _():
        h1p_ref[th + 1:th + 2, 1:w + 1, :] = zrow

    # ---- conv2 (+ fused 1x1 shortcut); avg-pool's 0.25 already folded into w2/b2 ----
    if tap_accumulate:
        acc = None
        for t, (ky, kx) in enumerate(offs):
            tap = h1p_ref[ky:ky + th, kx:kx + w, :]
            d = jnp.dot(tap.reshape(th * w, cin), w2_ref[t],
                        preferred_element_type=jnp.float32)
            acc = d if acc is None else acc + d
        if fuse_sc:
            acc = acc + jnp.dot(x_in.reshape(th * w, cin), w2_ref[9],
                                preferred_element_type=jnp.float32)
        s = acc + b2_ref[...]
    else:
        h1f = h1p_ref[...]
        taps2 = [h1f[ky:ky + th, kx:kx + w, :] for ky, kx in offs]
        if fuse_sc:
            taps2.append(x_in)                    # 1x1 shortcut as a 10th tap
        nt = len(taps2)
        p2 = jnp.concatenate(taps2, axis=-1).reshape(th * w, nt * cin)
        s = jnp.dot(p2, w2_ref[...],
                    preferred_element_type=jnp.float32) + b2_ref[...]
    s = s.reshape(th, w, cout)
    if not fuse_sc:
        s = s + x_in.astype(jnp.float32)          # identity shortcut (f32 add)

    # ---- 2x2 average pooling (scale folded into weights) and writeback ----
    if downsample:
        pool_ref[...] = s
        ho, wo = th // 2, w // 2
        p00 = pool_ref[pl.ds(0, ho, 2), pl.ds(0, wo, 2), :]
        p01 = pool_ref[pl.ds(0, ho, 2), pl.ds(1, wo, 2), :]
        p10 = pool_ref[pl.ds(1, ho, 2), pl.ds(0, wo, 2), :]
        p11 = pool_ref[pl.ds(1, ho, 2), pl.ds(1, wo, 2), :]
        out_ref[...] = (p00 + p01 + p10 + p11).astype(out_ref.dtype)
    else:
        out_ref[...] = s.astype(out_ref.dtype)


def _vmem_budget():
    """Generation-aware (tile budget, vmem_limit_bytes)."""
    cap = 128 << 20
    try:
        cap = int(getattr(pltpu.get_tpu_info(), "vmem_capacity_bytes", cap))
    except Exception:
        pass
    if cap >= (100 << 20):              # v5e / v6e: 128 MiB VMEM
        return 40 << 20, 64 << 20
    return 14 << 20, 30 << 20           # v7x: 64 MiB physical / 32 MiB scoped default


def _tile_vmem_bytes(th, W, Cin, Cout, downsample, tap_accumulate, fuse_sc):
    """Per-grid-step VMEM working set: pipeline double-buffers, weights, scratch and
    the large value temporaries (im2col patches / accumulators)."""
    bf, f4 = 2, 4
    wp4 = W + 4
    tho = th // 2 if downsample else th
    wo = W // 2 if downsample else W
    n2 = 10 if fuse_sc else 9
    b = 0
    b += 2 * th * wp4 * Cin * bf                      # main input tile (x2 buffers)
    b += 2 * 4 * wp4 * Cin * bf                       # halo tile
    b += 2 * tho * wo * Cout * f4                     # output tile
    b += 2 * (9 * Cin * Cin + n2 * Cin * Cout) * bf   # weights (x2 pipeline buffers)
    b += 2 * (Cin + Cout) * f4                        # biases
    b += (th + 4) * wp4 * Cin * bf                    # xs scratch
    b += (th + 2) * (W + 2) * Cin * bf                # h1p scratch
    if downsample:
        b += th * W * Cout * f4                       # pool scratch
    if tap_accumulate:
        b += (th + 2) * W * Cin * (f4 + bf)           # conv1 acc + one tap
        b += th * W * (Cout * f4 + Cin * bf)          # conv2 acc + one tap / x_in
    else:
        b += (th + 4) * wp4 * Cin * bf                # a0
        b += (th + 2) * W * 9 * Cin * bf              # conv1 im2col patch
        b += (th + 2) * W * Cin * f4                  # h1 (f32, pre-cast)
        b += th * W * n2 * Cin * bf                   # conv2 im2col patch
        b += th * W * Cout * f4                       # s
        b += th * W * Cin * bf                        # x_in
    return b


def _pick_tile_h(B, H, W, Cin, Cout, downsample, tap_accumulate, fuse_sc,
                 budget_bytes):
    """Largest row tile (multiple of 4 dividing H) that fits the budget; prefers a
    grid size B*(H/TH) that splits evenly over v7x's 2 TensorCores."""
    cands = [th for th in range(4, H + 1, 4)
             if H % th == 0 and _tile_vmem_bytes(
                 th, W, Cin, Cout, downsample, tap_accumulate, fuse_sc) <= budget_bytes]
    if not cands:
        cands = [4]
    even = [th for th in cands if (B * (H // th)) % 2 == 0]
    return max(even) if even else max(cands)


def residual_block_d(x_nchw, params, *, downsample, tile_h=None, tap_accumulate=None):
    """PyTorch-equivalent forward of ResidualBlock_D. NCHW f32 in/out; matmuls use
    bf16 MXU operands with f32 accumulation."""
    B, Cin, H, W = x_nchw.shape
    Cout = params["w2"].shape[-1]
    learnable_sc = (Cin != Cout) or downsample
    if downsample and (H % 2 or W % 2):
        # TODO(synk): odd spatial dims under avg_pool2d (floor mode) are not handled.
        raise ValueError("downsample requires even H and W")
    if tap_accumulate is None:
        # Per-tap accumulation avoids the 9x im2col VMEM transient once K=Cin already
        # fills the MXU; the lane-concat path only wins for small Cin.
        tap_accumulate = Cin >= 128

    # --- input: NHWC, bf16 (halves HBM DMA + VMEM for input tiles), 2-padded ---
    x = jnp.transpose(x_nchw, (0, 2, 3, 1)).astype(jnp.bfloat16)
    xpad = jnp.pad(x, ((0, 0), (2, 2), (2, 2), (0, 0)))
    Wp4 = W + 4

    # --- weights: taps stacked along K (concat path) or on a leading tap axis
    #     (accumulate path); 1x1 shortcut fused as a 10th conv2 tap; pool 0.25 and
    #     bsc folded into w2/b2; bf16 for the MXU. ---
    pool_scale = 0.25 if downsample else 1.0
    w1 = params["w1"].astype(jnp.float32)                       # (3,3,Cin,Cin) HWIO
    w2 = params["w2"].astype(jnp.float32)                       # (3,3,Cin,Cout)
    b1 = params["b1"].astype(jnp.float32).reshape(1, Cin)
    b2f = params["b2"].astype(jnp.float32)
    if learnable_sc:
        b2f = b2f + params["bsc"].astype(jnp.float32)
    b2f = (b2f * pool_scale).reshape(1, Cout)
    if tap_accumulate:
        w1k = w1.reshape(9, Cin, Cin)
        w2k = w2.reshape(9, Cin, Cout)
        if learnable_sc:
            w2k = jnp.concatenate([w2k, params["wsc"].astype(jnp.float32)[None]], 0)
    else:
        w1k = w1.reshape(9 * Cin, Cin)
        w2k = w2.reshape(9 * Cin, Cout)
        if learnable_sc:
            w2k = jnp.concatenate([w2k, params["wsc"].astype(jnp.float32)], 0)
    w1k = w1k.astype(jnp.bfloat16)
    w2k = (w2k * pool_scale).astype(jnp.bfloat16)
    n2 = 10 if learnable_sc else 9

    # --- row tiling with a 4-row halo (needs H % 4 == 0) ---
    budget, vmem_limit = _vmem_budget()
    use_halo = (H % 4 == 0)
    if use_halo:
        TH = tile_h if tile_h is not None else _pick_tile_h(
            B, H, W, Cin, Cout, downsample, tap_accumulate, learnable_sc, budget)
        assert TH % 4 == 0 and H % TH == 0, "tile_h must be a multiple of 4 dividing H"
        n_h = H // TH
        main_rows = TH
        main_map = lambda b, h: (b, h, 0, 0)
        halo_map = lambda b, h: (b, (h + 1) * (TH // 4), 0, 0)
    else:
        TH, n_h, main_rows = H, 1, H + 4
        main_map = lambda b, h: (b, 0, 0, 0)

    Ho, Wo = (H // 2, W // 2) if downsample else (H, W)
    THo = TH // 2 if downsample else TH

    kernel = functools.partial(_resblock_kernel, downsample=downsample,
                               fuse_sc=learnable_sc, use_halo=use_halo,
                               tap_accumulate=tap_accumulate)

    const = lambda nd: (lambda b, h: (0,) * nd)
    in_specs = [pl.BlockSpec((None, main_rows, Wp4, Cin), main_map)]
    args = [xpad]
    if use_halo:
        in_specs.append(pl.BlockSpec((None, 4, Wp4, Cin), halo_map))
        args.append(xpad)
    in_specs += [pl.BlockSpec(w1k.shape, const(w1k.ndim)),
                 pl.BlockSpec(b1.shape, const(2)),
                 pl.BlockSpec(w2k.shape, const(w2k.ndim)),
                 pl.BlockSpec(b2f.shape, const(2))]
    args += [w1k, b1, w2k, b2f]

    scratch = []
    if use_halo:
        scratch.append(pltpu.VMEM((TH + 4, Wp4, Cin), jnp.bfloat16))   # staged input
    scratch.append(pltpu.VMEM((TH + 2, W + 2, Cin), jnp.bfloat16))     # h1 + zero ring
    if downsample:
        scratch.append(pltpu.VMEM((TH, W, Cout), jnp.float32))         # pre-pool tile

    flops = (2 * B * (H + 2 * n_h) * W * 9 * Cin * Cin
             + 2 * B * H * W * n2 * Cin * Cout)
    bytes_accessed = (2 * (xpad.size + w1k.size + w2k.size)
                      + 4 * (b1.size + b2f.size + B * Ho * Wo * Cout))

    out_nhwc = pl.pallas_call(
        kernel,
        out_shape=jax.ShapeDtypeStruct((B, Ho, Wo, Cout), jnp.float32),
        grid=(B, n_h),
        in_specs=in_specs,
        out_specs=pl.BlockSpec((None, THo, Wo, Cout), lambda b, h: (b, h, 0, 0)),
        scratch_shapes=scratch,
        compiler_params=pltpu.CompilerParams(
            dimension_semantics=("parallel", "parallel"),
            vmem_limit_bytes=vmem_limit),
        cost_estimate=pl.CostEstimate(flops=flops, transcendentals=0,
                                      bytes_accessed=bytes_accessed),
    )(*args)

    return jnp.transpose(out_nhwc, (0, 3, 1, 2))                       # back to NCHW


def _ref_forward(x, params, *, downsample):
    """Pure-JAX f32 reference replicating the PyTorch module (NCHW)."""
    B, Cin, H, W = x.shape
    Cout = params["w2"].shape[-1]
    learnable_sc = (Cin != Cout) or downsample

    def conv(v, w_hwio, b, pad):
        y = lax.conv_general_dilated(v, w_hwio, (1, 1), [(pad, pad), (pad, pad)],
                                     dimension_numbers=("NCHW", "HWIO", "NCHW"))
        return y + b.reshape(1, -1, 1, 1)

    def pool(v):  # avg_pool2d(kernel_size=2)
        s = lax.reduce_window(v, 0.0, lax.add, (1, 1, 2, 2), (1, 1, 2, 2), "VALID")
        return s / 4.0

    h = jnp.maximum(x, 0.0)
    h = conv(h, params["w1"], params["b1"], 1)
    h = jnp.maximum(h, 0.0)
    h = conv(h, params["w2"], params["b2"], 1)
    if downsample:
        h = pool(h)
    if learnable_sc:
        s = conv(x, params["wsc"][None, None], params["bsc"], 0)
        if downsample:
            s = pool(s)
    else:
        s = x
    return h + s


if __name__ == "__main__":
    key = jax.random.PRNGKey(0)
    kk = jax.random.split(key, 12)

    # Tolerance: matmuls run with bf16 operands (f32 accumulation); two chained 3x3
    # convs plus the bf16 input carry ~1e-2-level absolute error vs the f32 reference.
    RTOL = ATOL = 5e-2

    # --- config 1: downsample + channel change (fused 1x1 shortcut), concat im2col
    #     path, TH chosen by the VMEM-aware picker -------------------------------
    B, Cin, Cout, H, W = 2, 4, 8, 16, 16
    params = {
        "w1": 0.2 * jax.random.normal(kk[0], (3, 3, Cin, Cin), jnp.float32),
        "b1": 0.1 * jax.random.normal(kk[1], (Cin,), jnp.float32),
        "w2": 0.2 * jax.random.normal(kk[2], (3, 3, Cin, Cout), jnp.float32),
        "b2": 0.1 * jax.random.normal(kk[3], (Cout,), jnp.float32),
        "wsc": 0.2 * jax.random.normal(kk[4], (Cin, Cout), jnp.float32),
        "bsc": 0.1 * jax.random.normal(kk[5], (Cout,), jnp.float32),
    }
    x = jax.random.normal(kk[6], (B, Cin, H, W), jnp.float32)
    out = jax.block_until_ready(residual_block_d(x, params, downsample=True))
    ref = _ref_forward(x, params, downsample=True)
    assert out.shape == ref.shape == (B, Cout, H // 2, W // 2)
    np.testing.assert_allclose(np.asarray(out), np.asarray(ref), rtol=RTOL, atol=ATOL)

    # --- config 2: identity shortcut, no downsample, 4 row tiles (halo handoff),
    #     per-tap accumulation path forced ---------------------------------------
    C2 = 4
    params2 = {
        "w1": 0.2 * jax.random.normal(kk[7], (3, 3, C2, C2), jnp.float32),
        "b1": 0.1 * jax.random.normal(kk[8], (C2,), jnp.float32),
        "w2": 0.2 * jax.random.normal(kk[9], (3, 3, C2, C2), jnp.float32),
        "b2": 0.1 * jax.random.normal(kk[10], (C2,), jnp.float32),
    }
    x2 = jax.random.normal(kk[11], (B, C2, H, W), jnp.float32)
    out2 = jax.block_until_ready(
        residual_block_d(x2, params2, downsample=False, tile_h=4, tap_accumulate=True))
    ref2 = _ref_forward(x2, params2, downsample=False)
    assert out2.shape == ref2.shape == (B, C2, H, W)
    np.testing.assert_allclose(np.asarray(out2), np.asarray(ref2), rtol=RTOL, atol=ATOL)

    # --- config 3: H, W not multiples of 4 -> single tile, no halo operand ------
    H3 = W3 = 6
    x3 = jax.random.normal(kk[5], (B, C2, H3, W3), jnp.float32)
    out3 = jax.block_until_ready(residual_block_d(x3, params2, downsample=False))
    ref3 = _ref_forward(x3, params2, downsample=False)
    assert out3.shape == ref3.shape == (B, C2, H3, W3)
    np.testing.assert_allclose(np.asarray(out3), np.asarray(ref3), rtol=RTOL, atol=ATOL)

    print("KERNEL_OK")
</pallas_src>

<mosaic_0001>
module attributes {stable_mosaic.version = 11 : i64} {
  func.func @_resblock_kernel(%arg0: i32, %arg1: i32, %arg2: memref<1x16x20x4xbf16, #tpu.memory_space<vmem>>, %arg3: memref<1x4x20x4xbf16, #tpu.memory_space<vmem>>, %arg4: memref<36x4xbf16, #tpu.memory_space<vmem>>, %arg5: memref<1x4xf32, #tpu.memory_space<vmem>>, %arg6: memref<40x8xbf16, #tpu.memory_space<vmem>>, %arg7: memref<1x8xf32, #tpu.memory_space<vmem>>, %arg8: memref<1x8x8x8xf32, #tpu.memory_space<vmem>>, %arg9: memref<20x20x4xbf16, #tpu.memory_space<vmem>>, %arg10: memref<18x18x4xbf16, #tpu.memory_space<vmem>>, %arg11: memref<16x16x8xf32, #tpu.memory_space<vmem>>) attributes {dimension_semantics = [#tpu.dimension_semantics<parallel>, #tpu.dimension_semantics<parallel>], iteration_bounds = array<i64: 2, 1>, scalar_prefetch = 0 : i64, scratch_operands = 3 : i64, tpu.core_type = #tpu.core_type<tc>, window_params = [{transform_indices = @transform_0, window_bounds = array<i64: 1, 16, 20, 4>}, {transform_indices = @transform_1, window_bounds = array<i64: 1, 4, 20, 4>}, {pipeline_mode = #tpu.pipeline_mode<synchronous>, transform_indices = @transform_2, window_bounds = array<i64: 36, 4>}, {pipeline_mode = #tpu.pipeline_mode<synchronous>, transform_indices = @transform_3, window_bounds = array<i64: 1, 4>}, {pipeline_mode = #tpu.pipeline_mode<synchronous>, transform_indices = @transform_4, window_bounds = array<i64: 40, 8>}, {pipeline_mode = #tpu.pipeline_mode<synchronous>, transform_indices = @transform_5, window_bounds = array<i64: 1, 8>}, {transform_indices = @transform_6, window_bounds = array<i64: 1, 8, 8, 8>}]} {
    %c0 = arith.constant 0 : index
    %c0_0 = arith.constant 0 : index
    %c0_1 = arith.constant 0 : index
    %c0_2 = arith.constant 0 : index
    %0 = vector.load %arg2[%c0, %c0_0, %c0_1, %c0_2] : memref<1x16x20x4xbf16, #tpu.memory_space<vmem>>, vector<1x16x20x4xbf16>
    %1 = vector.shape_cast %0 : vector<1x16x20x4xbf16> to vector<16x20x4xbf16>
    %c0_3 = arith.constant 0 : index
    %c0_4 = arith.constant 0 : index
    %c0_5 = arith.constant 0 : index
    %2 = vector.load %arg9[%c0_3, %c0_4, %c0_5] : memref<20x20x4xbf16, #tpu.memory_space<vmem>>, vector<16x20x4xbf16>
    tpu.vector_store %arg9[%c0_3, %c0_4, %c0_5], %1 {strides = array<i32>} : memref<20x20x4xbf16, #tpu.memory_space<vmem>>, vector<16x20x4xbf16>,
    %c0_6 = arith.constant 0 : index
    %c0_7 = arith.constant 0 : index
    %c0_8 = arith.constant 0 : index
    %c0_9 = arith.constant 0 : index
    %3 = vector.load %arg3[%c0_6, %c0_7, %c0_8, %c0_9] : memref<1x4x20x4xbf16, #tpu.memory_space<vmem>>, vector<1x4x20x4xbf16>
    %4 = vector.shape_cast %3 : vector<1x4x20x4xbf16> to vector<4x20x4xbf16>
    %c16 = arith.constant 16 : index
    %c0_10 = arith.constant 0 : index
    %c0_11 = arith.constant 0 : index
    %5 = vector.load %arg9[%c16, %c0_10, %c0_11] : memref<20x20x4xbf16, #tpu.memory_space<vmem>>, vector<4x20x4xbf16>
    tpu.vector_store %arg9[%c16, %c0_10, %c0_11], %4 {strides = array<i32>} : memref<20x20x4xbf16, #tpu.memory_space<vmem>>, vector<4x20x4xbf16>,
    %c2 = arith.constant 2 : index
    %c2_12 = arith.constant 2 : index
    %c0_13 = arith.constant 0 : index
    %6 = vector.load %arg9[%c2, %c2_12, %c0_13] : memref<20x20x4xbf16, #tpu.memory_space<vmem>>, vector<16x16x4xbf16>
    %c0_14 = arith.constant 0 : index
    %c0_15 = arith.constant 0 : index
    %c0_16 = arith.constant 0 : index
    %7 = vector.load %arg9[%c0_14, %c0_15, %c0_16] : memref<20x20x4xbf16, #tpu.memory_space<vmem>>, vector<20x20x4xbf16>
    %cst = arith.constant 0.000000e+00 : bf16
    %8 = vector.broadcast %cst : bf16 to vector<20x20x4xbf16>
    %9 = arith.maximumf %7, %8 : vector<20x20x4xbf16>
    %10 = vector.extract_strided_slice %9 {offsets = [0, 1, 0], sizes = [18, 16, 4], strides = [1, 1, 1]} : vector<20x20x4xbf16> to vector<18x16x4xbf16>
    %11 = vector.extract_strided_slice %9 {offsets = [0, 2, 0], sizes = [18, 16, 4], strides = [1, 1, 1]} : vector<20x20x4xbf16> to vector<18x16x4xbf16>
    %12 = vector.extract_strided_slice %9 {offsets = [0, 3, 0], sizes = [18, 16, 4], strides = [1, 1, 1]} : vector<20x20x4xbf16> to vector<18x16x4xbf16>
    %13 = vector.extract_strided_slice %9 {offsets = [1, 1, 0], sizes = [18, 16, 4], strides = [1, 1, 1]} : vector<20x20x4xbf16> to vector<18x16x4xbf16>
    %14 = vector.extract_strided_slice %9 {offsets = [1, 2, 0], sizes = [18, 16, 4], strides = [1, 1, 1]} : vector<20x20x4xbf16> to vector<18x16x4xbf16>
    %15 = vector.extract_strided_slice %9 {offsets = [1, 3, 0], sizes = [18, 16, 4], strides = [1, 1, 1]} : vector<20x20x4xbf16> to vector<18x16x4xbf16>
    %16 = vector.extract_strided_slice %9 {offsets = [2, 1, 0], sizes = [18, 16, 4], strides = [1, 1, 1]} : vector<20x20x4xbf16> to vector<18x16x4xbf16>
    %17 = vector.extract_strided_slice %9 {offsets = [2, 2, 0], sizes = [18, 16, 4], strides = [1, 1, 1]} : vector<20x20x4xbf16> to vector<18x16x4xbf16>
    %18 = vector.extract_strided_slice %9 {offsets = [2, 3, 0], sizes = [18, 16, 4], strides = [1, 1, 1]} : vector<20x20x4xbf16> to vector<18x16x4xbf16>
    %19 = tpu.concatenate %10, %11, %12, %13, %14, %15, %16, %17, %18 in 2 : vector<18x16x4xbf16>, vector<18x16x4xbf16>, vector<18x16x4xbf16>, vector<18x16x4xbf16>, vector<18x16x4xbf16>, vector<18x16x4xbf16>, vector<18x16x4xbf16>, vector<18x16x4xbf16>, vector<18x16x4xbf16> -> vector<18x16x36xbf16>
    %20 = vector.shape_cast %19 : vector<18x16x36xbf16> to vector<288x36xbf16>
    %c0_17 = arith.constant 0 : index
    %c0_18 = arith.constant 0 : index
    %21 = vector.load %arg4[%c0_17, %c0_18] : memref<36x4xbf16, #tpu.memory_space<vmem>>, vector<36x4xbf16>
    %cst_19 = arith.constant dense<0.000000e+00> : vector<288x4xf32>
    %22 = tpu.matmul %20, %21, %cst_19 {dimension_numbers = #tpu.dot_dimension_numbers<[1], [0], [0], [1], [0, 0, 1, 1], [], []>} : vector<288x36xbf16>, vector<36x4xbf16>, vector<288x4xf32> -> vector<288x4xf32>
    %c0_20 = arith.constant 0 : index
    %c0_21 = arith.constant 0 : index
    %23 = vector.load %arg5[%c0_20, %c0_21] : memref<1x4xf32, #tpu.memory_space<vmem>>, vector<1x4xf32>
    %24 = vector.broadcast %23 : vector<1x4xf32> to vector<288x4xf32>
    %25 = arith.addf %22, %24 : vector<288x4xf32>
    %cst_22 = arith.constant 0.000000e+00 : f32
    %26 = vector.broadcast %cst_22 : f32 to vector<288x4xf32>
    %27 = arith.maximumf %25, %26 : vector<288x4xf32>
    %28 = arith.truncf %27 : vector<288x4xf32> to vector<288x4xbf16>
    %29 = vector.shape_cast %28 : vector<288x4xbf16> to vector<18x16x4xbf16>
    %cst_23 = arith.constant 0.000000e+00 : bf16
    %30 = vector.broadcast %cst_23 : bf16 to vector<18x1x4xbf16>
    %c0_24 = arith.constant 0 : index
    %c0_25 = arith.constant 0 : index
    %c0_26 = arith.constant 0 : index
    %31 = vector.load %arg10[%c0_24, %c0_25, %c0_26] : memref<18x18x4xbf16, #tpu.memory_space<vmem>>, vector<18x1x4xbf16>
    tpu.vector_store %arg10[%c0_24, %c0_25, %c0_26], %30 {strides = array<i32>} : memref<18x18x4xbf16, #tpu.memory_space<vmem>>, vector<18x1x4xbf16>,
    %c0_27 = arith.constant 0 : index
    %c17 = arith.constant 17 : index
    %c0_28 = arith.constant 0 : index
    %32 = vector.load %arg10[%c0_27, %c17, %c0_28] : memref<18x18x4xbf16, #tpu.memory_space<vmem>>, vector<18x1x4xbf16>
    tpu.vector_store %arg10[%c0_27, %c17, %c0_28], %30 {strides = array<i32>} : memref<18x18x4xbf16, #tpu.memory_space<vmem>>, vector<18x1x4xbf16>,
    %c0_29 = arith.constant 0 : index
    %c1 = arith.constant 1 : index
    %c0_30 = arith.constant 0 : index
    %33 = vector.load %arg10[%c0_29, %c1, %c0_30] : memref<18x18x4xbf16, #tpu.memory_space<vmem>>, vector<18x16x4xbf16>
    tpu.vector_store %arg10[%c0_29, %c1, %c0_30], %29 {strides = array<i32>} : memref<18x18x4xbf16, #tpu.memory_space<vmem>>, vector<18x16x4xbf16>,
    %cst_31 = arith.constant 0.000000e+00 : bf16
    %34 = vector.broadcast %cst_31 : bf16 to vector<1x16x4xbf16>
    %c0_i32 = arith.constant 0 : i32
    %35 = arith.cmpi eq, %arg1, %c0_i32 : i32
    %36 = arith.extui %35 : i1 to i32
    %c0_i32_32 = arith.constant 0 : i32
    %37 = arith.cmpi ne, %36, %c0_i32_32 : i32
    scf.if %37 {
      %c0_62 = arith.constant 0 : index
      %c1_63 = arith.constant 1 : index
      %c0_64 = arith.constant 0 : index
      %70 = vector.load %arg10[%c0_62, %c1_63, %c0_64] : memref<18x18x4xbf16, #tpu.memory_space<vmem>>, vector<1x16x4xbf16>
      tpu.vector_store %arg10[%c0_62, %c1_63, %c0_64], %34 {strides = array<i32>} : memref<18x18x4xbf16, #tpu.memory_space<vmem>>, vector<1x16x4xbf16>,
    } else {
    }
    %c0_i32_33 = arith.constant 0 : i32
    %38 = arith.cmpi eq, %arg1, %c0_i32_33 : i32
    %39 = arith.extui %38 : i1 to i32
    %c0_i32_34 = arith.constant 0 : i32
    %40 = arith.cmpi ne, %39, %c0_i32_34 : i32
    scf.if %40 {
      %c17_62 = arith.constant 17 : index
      %c1_63 = arith.constant 1 : index
      %c0_64 = arith.constant 0 : index
      %70 = vector.load %arg10[%c17_62, %c1_63, %c0_64] : memref<18x18x4xbf16, #tpu.memory_space<vmem>>, vector<1x16x4xbf16>
      tpu.vector_store %arg10[%c17_62, %c1_63, %c0_64], %34 {strides = array<i32>} : memref<18x18x4xbf16, #tpu.memory_space<vmem>>, vector<1x16x4xbf16>,
    } else {
    }
    %c0_35 = arith.constant 0 : index
    %c0_36 = arith.constant 0 : index
    %c0_37 = arith.constant 0 : index
    %41 = vector.load %arg10[%c0_35, %c0_36, %c0_37] : memref<18x18x4xbf16, #tpu.memory_space<vmem>>, vector<18x18x4xbf16>
    %42 = vector.extract_strided_slice %41 {offsets = [0, 0, 0], sizes = [16, 16, 4], strides = [1, 1, 1]} : vector<18x18x4xbf16> to vector<16x16x4xbf16>
    %43 = vector.extract_strided_slice %41 {offsets = [0, 1, 0], sizes = [16, 16, 4], strides = [1, 1, 1]} : vector<18x18x4xbf16> to vector<16x16x4xbf16>
    %44 = vector.extract_strided_slice %41 {offsets = [0, 2, 0], sizes = [16, 16, 4], strides = [1, 1, 1]} : vector<18x18x4xbf16> to vector<16x16x4xbf16>
    %45 = vector.extract_strided_slice %41 {offsets = [1, 0, 0], sizes = [16, 16, 4], strides = [1, 1, 1]} : vector<18x18x4xbf16> to vector<16x16x4xbf16>
    %46 = vector.extract_strided_slice %41 {offsets = [1, 1, 0], sizes = [16, 16, 4], strides = [1, 1, 1]} : vector<18x18x4xbf16> to vector<16x16x4xbf16>
    %47 = vector.extract_strided_slice %41 {offsets = [1, 2, 0], sizes = [16, 16, 4], strides = [1, 1, 1]} : vector<18x18x4xbf16> to vector<16x16x4xbf16>
    %48 = vector.extract_strided_slice %41 {offsets = [2, 0, 0], sizes = [16, 16, 4], strides = [1, 1, 1]} : vector<18x18x4xbf16> to vector<16x16x4xbf16>
    %49 = vector.extract_strided_slice %41 {offsets = [2, 1, 0], sizes = [16, 16, 4], strides = [1, 1, 1]} : vector<18x18x4xbf16> to vector<16x16x4xbf16>
    %50 = vector.extract_strided_slice %41 {offsets = [2, 2, 0], sizes = [16, 16, 4], strides = [1, 1, 1]} : vector<18x18x4xbf16> to vector<16x16x4xbf16>
    %51 = tpu.concatenate %42, %43, %44, %45, %46, %47, %48, %49, %50, %6 in 2 : vector<16x16x4xbf16>, vector<16x16x4xbf16>, vector<16x16x4xbf16>, vector<16x16x4xbf16>, vector<16x16x4xbf16>, vector<16x16x4xbf16>, vector<16x16x4xbf16>, vector<16x16x4xbf16>, vector<16x16x4xbf16>, vector<16x16x4xbf16> -> vector<16x16x40xbf16>
    %52 = vector.shape_cast %51 : vector<16x16x40xbf16> to vector<256x40xbf16>
    %c0_38 = arith.constant 0 : index
    %c0_39 = arith.constant 0 : index
    %53 = vector.load %arg6[%c0_38, %c0_39] : memref<40x8xbf16, #tpu.memory_space<vmem>>, vector<40x8xbf16>
    %cst_40 = arith.constant dense<0.000000e+00> : vector<256x8xf32>
    %54 = tpu.matmul %52, %53, %cst_40 {dimension_numbers = #tpu.dot_dimension_numbers<[1], [0], [0], [1], [0, 0, 1, 1], [], []>} : vector<256x40xbf16>, vector<40x8xbf16>, vector<256x8xf32> -> vector<256x8xf32>
    %c0_41 = arith.constant 0 : index
    %c0_42 = arith.constant 0 : index
    %55 = vector.load %arg7[%c0_41, %c0_42] : memref<1x8xf32, #tpu.memory_space<vmem>>, vector<1x8xf32>
    %56 = vector.broadcast %55 : vector<1x8xf32> to vector<256x8xf32>
    %57 = arith.addf %54, %56 : vector<256x8xf32>
    %58 = vector.shape_cast %57 : vector<256x8xf32> to vector<16x16x8xf32>
    %c0_43 = arith.constant 0 : index
    %c0_44 = arith.constant 0 : index
    %c0_45 = arith.constant 0 : index
    %59 = vector.load %arg11[%c0_43, %c0_44, %c0_45] : memref<16x16x8xf32, #tpu.memory_space<vmem>>, vector<16x16x8xf32>
    tpu.vector_store %arg11[%c0_43, %c0_44, %c0_45], %58 {strides = array<i32>} : memref<16x16x8xf32, #tpu.memory_space<vmem>>, vector<16x16x8xf32>,
    %c0_46 = arith.constant 0 : index
    %c0_47 = arith.constant 0 : index
    %c0_48 = arith.constant 0 : index
    %60 = tpu.strided_load %arg11[%c0_46, %c0_47, %c0_48] {strides = array<i32: 2, 2, 1>} : memref<16x16x8xf32, #tpu.memory_space<vmem>>, vector<8x8x8xf32>
    %c0_49 = arith.constant 0 : index
    %c1_50 = arith.constant 1 : index
    %c0_51 = arith.constant 0 : index
    %61 = tpu.strided_load %arg11[%c0_49, %c1_50, %c0_51] {strides = array<i32: 2, 2, 1>} : memref<16x16x8xf32, #tpu.memory_space<vmem>>, vector<8x8x8xf32>
    %c1_52 = arith.constant 1 : index
    %c0_53 = arith.constant 0 : index
    %c0_54 = arith.constant 0 : index
    %62 = tpu.strided_load %arg11[%c1_52, %c0_53, %c0_54] {strides = array<i32: 2, 2, 1>} : memref<16x16x8xf32, #tpu.memory_space<vmem>>, vector<8x8x8xf32>
    %c1_55 = arith.constant 1 : index
    %c1_56 = arith.constant 1 : index
    %c0_57 = arith.constant 0 : index
    %63 = tpu.strided_load %arg11[%c1_55, %c1_56, %c0_57] {strides = array<i32: 2, 2, 1>} : memref<16x16x8xf32, #tpu.memory_space<vmem>>, vector<8x8x8xf32>
    %64 = arith.addf %60, %61 : vector<8x8x8xf32>
    %65 = arith.addf %64, %62 : vector<8x8x8xf32>
    %66 = arith.addf %65, %63 : vector<8x8x8xf32>
    %c0_58 = arith.constant 0 : index
    %c0_59 = arith.constant 0 : index
    %c0_60 = arith.constant 0 : index
    %c0_61 = arith.constant 0 : index
    %67 = vector.load %arg8[%c0_58, %c0_59, %c0_60, %c0_61] : memref<1x8x8x8xf32, #tpu.memory_space<vmem>>, vector<1x8x8x8xf32>
    %68 = vector.shape_cast %67 : vector<1x8x8x8xf32> to vector<8x8x8xf32>
    %69 = vector.shape_cast %66 : vector<8x8x8xf32> to vector<1x8x8x8xf32>
    tpu.vector_store %arg8[%c0_58, %c0_59, %c0_60, %c0_61], %69 {strides = array<i32>} : memref<1x8x8x8xf32, #tpu.memory_space<vmem>>, vector<1x8x8x8xf32>,
    return
  }
  func.func @transform_0(%arg0: i32, %arg1: i32) -> (i32, i32, i32, i32) {
    %c0_i32 = arith.constant 0 : i32
    %c0_i32_0 = arith.constant 0 : i32
    %c0_i32_1 = arith.constant 0 : i32
    return %arg0, %arg1, %c0_i32, %c0_i32_0 : i32, i32, i32, i32
  }
  func.func @transform_1(%arg0: i32, %arg1: i32) -> (i32, i32, i32, i32) {
    %c1_i32 = arith.constant 1 : i32
    %0 = arith.addi %arg1, %c1_i32 : i32
    %c4_i32 = arith.constant 4 : i32
    %1 = arith.muli %0, %c4_i32 : i32
    %c0_i32 = arith.constant 0 : i32
    %c0_i32_0 = arith.constant 0 : i32
    %c0_i32_1 = arith.constant 0 : i32
    return %arg0, %1, %c0_i32, %c0_i32_0 : i32, i32, i32, i32
  }
  func.func @transform_2(%arg0: i32, %arg1: i32) -> (i32, i32) {
    %c0_i32 = arith.constant 0 : i32
    %c0_i32_0 = arith.constant 0 : i32
    %c0_i32_1 = arith.constant 0 : i32
    return %c0_i32, %c0_i32_0 : i32, i32
  }
  func.func @transform_3(%arg0: i32, %arg1: i32) -> (i32, i32) {
    %c0_i32 = arith.constant 0 : i32
    %c0_i32_0 = arith.constant 0 : i32
    %c0_i32_1 = arith.constant 0 : i32
    return %c0_i32, %c0_i32_0 : i32, i32
  }
  func.func @transform_4(%arg0: i32, %arg1: i32) -> (i32, i32) {
    %c0_i32 = arith.constant 0 : i32
    %c0_i32_0 = arith.constant 0 : i32
    %c0_i32_1 = arith.constant 0 : i32
    return %c0_i32, %c0_i32_0 : i32, i32
  }
  func.func @transform_5(%arg0: i32, %arg1: i32) -> (i32, i32) {
    %c0_i32 = arith.constant 0 : i32
    %c0_i32_0 = arith.constant 0 : i32
    %c0_i32_1 = arith.constant 0 : i32
    return %c0_i32, %c0_i32_0 : i32, i32
  }
  func.func @transform_6(%arg0: i32, %arg1: i32) -> (i32, i32, i32, i32) {
    %c0_i32 = arith.constant 0 : i32
    %c0_i32_0 = arith.constant 0 : i32
    %c0_i32_1 = arith.constant 0 : i32
    return %arg0, %arg1, %c0_i32, %c0_i32_0 : i32, i32, i32, i32
  }
}

</mosaic_0001>

<bundles_post_ra>
// kernel: tpu_custom_call.1
= control target key start
LH: loop header
LB: loop body
LE: loop exit
PB: predicated region body
PF: predicated region fallthrough
CT: control target
= control target key end

     0   :  { %11 = vsyncpa [#allocation6], 0  ;;  %s9011_s0 = inlined_call_operand.vmem [shape: bf16[2,20,20,4], index: 0, kind: input, shape index: {}]   ;;  %s9012_s1 = inlined_call_operand.vmem [shape: bf16[2,20,20,4], index: 1, kind: input, shape index: {}]   ;;  %s9013_s2 = inlined_call_operand.vmem [shape: bf16[36,4], index: 2, kind: input, shape index: {}]   ;;  %s9014_s3 = inlined_call_operand.vmem [shape: f32[1,4], index: 3, kind: input, shape index: {}]   ;;  %s9015_s4 = inlined_call_operand.vmem [shape: bf16[40,8], index: 4, kind: input, shape index: {}]   ;;  %s9016_s5 = inlined_call_operand.vmem [shape: f32[1,8], index: 5, kind: input, shape index: {}]   ;;  %s9017_s6 = inlined_call_operand.hbm [shape: f32[2,8,8,8], index: 6, kind: output, shape index: {}]  }
   0x1   :  { %13 = vsyncpa [#allocation6 + $0x1], 0  ;;  %s5874_s21 = smov 0   ;;  %s5876_s22 = smov 0  }
   0x2   :  { %s5878_s23 = smov 0   ;;  %s5880_s24 = smov 0  }
   0x3   :  { %s5882_s25 = smov 0   ;;  %s5884_s26 = smov 0  }
   0x4 LB: > { %s5232_s27 = sadd.s32 4294967295, %s5825_s26   ;;  %s5233_s28 = sadd.s32 4294967294, %s5825_s26   ;;  %s5825_s26 = sphi %s5884_s26, %s19_s26   ;;  %s5821_s25 = sphi %s5882_s25, %s9558_s25   ;;  %s5817_s24 = sphi %s5880_s24, %s9557_s24   ;;  %s5813_s23 = sphi %s5878_s23, %s9556_s23   ;;  %s5809_s22 = sphi %s5876_s22, %s9555_s22   ;;  %s5805_s21 = sphi %s5874_s21, %s9554_s21  }
   0x5   : > { %s31_s29 = sadd.s32 1, %s5821_s25  ;;  %s184_s30 = sadd.s32 1, %s5813_s23 }
   0x6   : > { %p33_p0 = scmp.ge.s32.totalorder %s31_s29, 2  ;;  %p194_p1 = scmp.ne.s32.totalorder %s5813_s23, %s5809_s22 }
   0x7   : > { %p195_p2 = scmp.eq.s32.totalorder %s5232_s27, 1  ;;  %p200_p3 = scmp.ne.s32.totalorder %s5809_s22, %s5805_s21 }
   0x8   : > { %s9560_s29 = smov (%p33_p0, %s31_s29), 0  ;;  %p201_p5 = scmp.eq.s32.totalorder %s5233_s28, 1 }
   0x9   : > { %p5914_p4 = por %p195_p2, %p194_p1  ;;  %s179_s8 = ssub.s32 %s5821_s25, %s9560_s29 }
   0xa   : > { %p5236_p6 = scmp.ge.s32.totalorder %s5825_s26, 1  ;;  %p182_p7 = scmp.eq.s32.totalorder %s179_s8, 0 }
   0xb   : > { %p5921_p8 = por %p201_p5, %p200_p3  ;;  %p273_p9 = scmp.lt.s32.totalorder %s5825_s26, 3 }
   0xc   : > { %s5927_s10 = scalar_select %p182_p7, %s5813_s23, %s184_s30  }
   0xd   : > { %p274_p10 = pnand %p5236_p6, %p273_p9 }
   0xf   : > { %277 = sbr.rel (%p274_p10) target bundleno = 1343 (0x53f), region = 44 }
  0x14   : > { %p331_p11 = scmp.lt.s32.totalorder %s5817_s24, 1  ;;  %vm414_vm0 = vcmask 25600   ;;  %vm411_vm1 = vcmask 27648   ;;  %v9047_v27 = vmov 0   ;;  %vm799_vm2 = vsmask.f32 7424 }
  0x15   : > { %s5828_s16 = smov 4   ;;  %vm9154_vm3 = vcmask 1046528   ;;  %s5829_s27 = smov 8   ;;  %vm2579_vm4 = vcmask 1041408   ;;  %vm1806_vm5 = vcmask 64512   ;;  %vm1733_vm6 = vcmask 31744  }
  0x16   : > { %s5931_s11 = scalar_select %p331_p11, %s5817_s24, 1  ;;  %vm1879_vm7 = vcmask 97280   ;;  %vm1952_vm8 = vcmask 130048   ;;  %vm2025_vm9 = vcmask 162816   ;;  %vm2098_vm10 = vcmask 195584  }
  0x17   : > { %s5830_s28 = smov 12   ;;  %s5831_s30 = smov 16   ;;  %vm9157_vm11 = vcmask 228352   ;;  %vm9156_vm12 = vcmask 261120   ;;  %vm9155_vm13 = vcmask 293888   ;;  %vm2814_vm14 = vcmask 24576  }
  0x18   : > { %s5592_s12 = smul.u32 240, %s5931_s11  ;;  %s5832_s8 = smov 20   ;;  %vm9153_vm15 = vsmask.f32 256 }
  0x19   : > { %s5833_s11 = smov 24   ;;  %s5835_s18 = smov 32  }
  0x1a   : > { %s5939_s15 = scalar_lea.vmem %s9011_s0, %s5592_s12  ;;  %s6151_s17 = sadd.s32 192, %s5592_s12 }
  0x1b   : > { %v368_v0 = vld [vmem:[%s5939_s15 + $0x14] sm:$0x3]  ;;  %v365_v1 = vld [vmem:[%s5939_s15 + $0x8] sm:$0x3]  ;;  %v371_v2 = vld [vmem:[%s5939_s15 + $0x20] sm:$0x3]  ;;  %s6197_s20 = scalar_lea.vmem %s9012_s1, %s6151_s17 }
  0x1c   : > { %418 = vst.msk [vmem:[#allocation2 + $0x14] sm:$0x3] %vm414_vm0, %v368_v0  ;;  %415 = vst.msk [vmem:[#allocation2 + $0x8] sm:$0x3] %vm414_vm0, %v365_v1  ;;  %v363_v3 = vld [vmem:[%s5939_s15] sm:$0xf] }
  0x1d   : > { %421 = vst.msk [vmem:[#allocation2 + $0x20] sm:$0x3] %vm414_vm0, %v371_v2  ;;  %v364_v4 = vld [vmem:[%s5939_s15 + $0x4] sm:$0xf]  ;;  %v374_v5 = vld [vmem:[%s5939_s15 + $0x2c] sm:$0x3] }
  0x1e   : > { %412 = vst.msk [vmem:[#allocation2] sm:$0xf] %vm411_vm1, %v363_v3  ;;  %413 = vst.msk [vmem:[#allocation2 + $0x4] sm:$0xf] %vm411_vm1, %v364_v4  ;;  %v369_v6 = vld [vmem:[%s5939_s15 + $0x18] sm:$0xf] }
  0x1f   : > { %424 = vst.msk [vmem:[#allocation2 + $0x2c] sm:$0x3] %vm414_vm0, %v374_v5  ;;  %v370_v7 = vld [vmem:[%s5939_s15 + $0x1c] sm:$0xf]  ;;  %v377_v8 = vld [vmem:[%s5939_s15 + $0x38] sm:$0x3] }
  0x20   : > { %419 = vst.msk [vmem:[#allocation2 + $0x18] sm:$0xf] %vm411_vm1, %v369_v6  ;;  %420 = vst.msk [vmem:[#allocation2 + $0x1c] sm:$0xf] %vm411_vm1, %v370_v7  ;;  %v372_v9 = vld [vmem:[%s5939_s15 + $0x24] sm:$0xf] }
  0x21   : > { %427 = vst.msk [vmem:[#allocation2 + $0x38] sm:$0x3] %vm414_vm0, %v377_v8  ;;  %v373_v10 = vld [vmem:[%s5939_s15 + $0x28] sm:$0xf]  ;;  %v380_v11 = vld [vmem:[%s5939_s15 + $0x44] sm:$0x3] }
  0x22   : > { %422 = vst.msk [vmem:[#allocation2 + $0x24] sm:$0xf] %vm411_vm1, %v372_v9  ;;  %423 = vst.msk [vmem:[#allocation2 + $0x28] sm:$0xf] %vm411_vm1, %v373_v10  ;;  %v375_v12 = vld [vmem:[%s5939_s15 + $0x30] sm:$0xf] }
  0x23   : > { %430 = vst.msk [vmem:[#allocation2 + $0x44] sm:$0x3] %vm414_vm0, %v380_v11  ;;  %v376_v13 = vld [vmem:[%s5939_s15 + $0x34] sm:$0xf]  ;;  %v383_v14 = vld [vmem:[%s5939_s15 + $0x50] sm:$0x3] }
  0x24   : > { %425 = vst.msk [vmem:[#allocation2 + $0x30] sm:$0xf] %vm411_vm1, %v375_v12  ;;  %426 = vst.msk [vmem:[#allocation2 + $0x34] sm:$0xf] %vm411_vm1, %v376_v13  ;;  %v378_v15 = vld [vmem:[%s5939_s15 + $0x3c] sm:$0xf] }
  0x25   : > { %433 = vst.msk [vmem:[#allocation2 + $0x50] sm:$0x3] %vm414_vm0, %v383_v14  ;;  %v379_v16 = vld [vmem:[%s5939_s15 + $0x40] sm:$0xf]  ;;  %v366_v17 = vld [vmem:[%s5939_s15 + $0xc] sm:$0xf] }
  0x26   : > { %428 = vst.msk [vmem:[#allocation2 + $0x3c] sm:$0xf] %vm411_vm1, %v378_v15  ;;  %429 = vst.msk [vmem:[#allocation2 + $0x40] sm:$0xf] %vm411_vm1, %v379_v16  ;;  %v367_v18 = vld [vmem:[%s5939_s15 + $0x10] sm:$0xf] }
  0x27   : > { %416 = vst.msk [vmem:[#allocation2 + $0xc] sm:$0xf] %vm411_vm1, %v366_v17  ;;  %v381_v19 = vld [vmem:[%s5939_s15 + $0x48] sm:$0xf]  ;;  %v382_v20 = vld [vmem:[%s5939_s15 + $0x4c] sm:$0xf] }
  0x28   : > { %417 = vst.msk [vmem:[#allocation2 + $0x10] sm:$0xf] %vm411_vm1, %v367_v18  ;;  %431 = vst.msk [vmem:[#allocation2 + $0x48] sm:$0xf] %vm411_vm1, %v381_v19  ;;  %v386_v21 = vld [vmem:[%s5939_s15 + $0x5c] sm:$0x3] }
  0x29   : > { %432 = vst.msk [vmem:[#allocation2 + $0x4c] sm:$0xf] %vm411_vm1, %v382_v20  ;;  %v384_v22 = vld [vmem:[%s5939_s15 + $0x54] sm:$0xf]  ;;  %v385_v23 = vld [vmem:[%s5939_s15 + $0x58] sm:$0xf] }
  0x2a   : > { %v540_v24 = vld [vmem:[#allocation2 + $0x14] sm:$0x3]  ;;  %v537_v25 = vld [vmem:[#allocation2 + $0x8] sm:$0x3]  ;;  %v543_v26 = vld [vmem:[#allocation2 + $0x20] sm:$0x3] }
  0x2b   : > { %436 = vst.msk [vmem:[#allocation2 + $0x5c] sm:$0x3] %vm414_vm0, %v386_v21  ;;  %v600_v28 = vmax.bf16 %v9047_v27, %v540_v24  ;;  %v597_v29 = vmax.bf16 %v9047_v27, %v537_v25  ;;  %v603_v30 = vmax.bf16 %v9047_v27, %v543_v26  ;;  %v535_v31 = vld [vmem:[#allocation2] sm:$0xf]  ;;  %v536_v32 = vld [vmem:[#allocation2 + $0x4] sm:$0xf] }
  0x2c   : > { %434 = vst.msk [vmem:[#allocation2 + $0x54] sm:$0xf] %vm411_vm1, %v384_v22  ;;  %435 = vst.msk [vmem:[#allocation2 + $0x58] sm:$0xf] %vm411_vm1, %v385_v23  ;;  %v546_v33 = vld [vmem:[#allocation2 + $0x2c] sm:$0x3]  ;;  %v595_v34 = vmax.bf16 %v9047_v27, %v535_v31  ;;  %v596_v35 = vmax.bf16 %v9047_v27, %v536_v32 }
  0x2d   : > { %v606_v36 = vmax.bf16 %v9047_v27, %v546_v33  ;;  %v541_v37 = vld [vmem:[#allocation2 + $0x18] sm:$0xf]  ;;  %v542_v38 = vld [vmem:[#allocation2 + $0x1c] sm:$0xf]  ;;  %v5995_v40 = vcombine.low %v600_v28, %v600_v28  ;;  %v5997_v41 = vcombine.low %v597_v29, %v597_v29  ;;  %v5999_v42 = vcombine.low %v603_v30, %v603_v30  ;;  %v544_v47 = vld [vmem:[#allocation2 + $0x24] sm:$0xf] }
  0x2e   : > { %v549_v39 = vld [vmem:[#allocation2 + $0x38] sm:$0x3]  ;;  %v601_v43 = vmax.bf16 %v9047_v27, %v541_v37  ;;  %v6002_v44 = vcombine.low %v595_v34, %v596_v35  ;;  %v602_v45 = vmax.bf16 %v9047_v27, %v542_v38  ;;  %v545_v52 = vld [vmem:[#allocation2 + $0x28] sm:$0xf]  ;;  %v552_v57 = vld [vmem:[#allocation2 + $0x44] sm:$0x3]  ;;  %v604_v61 = vmax.bf16 %v9047_v27, %v544_v47 }
  0x2f   : > { %9160 = vst [vmem:[#allocation8_spill] sm:$0xff] %v5997_v41  ;;  %v609_v46 = vmax.bf16 %v9047_v27, %v549_v39  ;;  %v9018_v48 = vshrl.u32 %v5995_v40, 16  ;;  %v812_v49 = vshrl.u32 %v5997_v41, 16  ;;  %v808_v50 = vshll.u32 %v5997_v41, 16  ;;  %v547_v62 = vld [vmem:[#allocation2 + $0x30] sm:$0xf] }
  0x30   : > { %9161 = vst [vmem:[#allocation9_spill] sm:$0xff] %v6002_v44  ;;  %v6009_v51 = vcombine.low %v606_v36, %v606_v36  ;;  %v6012_v53 = vshrl.u32 %v5999_v42, 16  ;;  %v801_v54 = vshrl.u32 %v6002_v44, 16  ;;  %v803_v55 = vshll.u32 %v6002_v44, 16  ;;  %v548_v3 = vld [vmem:[#allocation2 + $0x34] sm:$0xf] }
  0x31   : > { %v6016_v56 = vcombine.low %v601_v43, %v602_v45  ;;  %1058 = vrot.lane.b32.xlu1 %v9018_v48, %s5828_s16  ;;  %1054 = vrot.lane.b32.xlu0 %v812_v49, %s5828_s16  ;;  %v810_v58 = vrot.slane %v808_v50, 1  ;;  %v836_v59 = vshll.u32 %v5999_v42, 16  ;;  %v6023_v60 = vcombine.low %v609_v46, %v609_v46  ;;  %v555_v8 = vld [vmem:[#allocation2 + $0x50] sm:$0x3]  ;;  %v550_v13 = vld [vmem:[#allocation2 + $0x3c] sm:$0xf] }
  0x32   : > { %v805_v63 = vrot.slane %v803_v55, 1  ;;  %v605_v2 = vmax.bf16 %v9047_v27, %v545_v52  ;;  %v6030_v4 = vshrl.u32 %v6009_v51, 16  ;;  %v850_v6 = vshll.u32 %v6009_v51, 16  ;;  %v551_v14 = vld [vmem:[#allocation2 + $0x40] sm:$0xf]  ;;  %s5834_s12 = smov 28  }
  0x33   : > { %v829_v0 = vshrl.u32 %v6016_v56, 16  ;;  %v831_v1 = vshll.u32 %v6016_v56, 16  ;;  %v838_v5 = vrot.slane %v836_v59, 1  ;;  %v612_v7 = vmax.bf16 %v9047_v27, %v552_v57  ;;  %v538_v19 = vld [vmem:[#allocation2 + $0xc] sm:$0xf]  ;;  %s5837_s13 = smov [#allocation5]  }
  0x34   : > { %v806_v9 = vor.u32 %v805_v63, %v801_v54  ;;  %v6034_v11 = vcombine.low %v604_v61, %v605_v2  ;;  %v607_v12 = vmax.bf16 %v9047_v27, %v547_v62  ;;  %v6040_v15 = vshrl.u32 %v6023_v60, 16  ;;  %v539_v20 = vld [vmem:[#allocation2 + $0x10] sm:$0xf]  ;;  %v389_v21 = vld [vmem:[%s5939_s15 + $0x68] sm:$0x3] }
  0x35   : > { %v833_v10 = vrot.slane %v831_v1, 1  ;;  %1062 = vrot.lane.b32.xlu1 %v6012_v53, %s5828_s16  ;;  %v852_v16 = vrot.slane %v850_v6, 1  ;;  %v6042_v17 = vcombine.low %v612_v7, %v612_v7  ;;  %v608_v18 = vmax.bf16 %v9047_v27, %v548_v3  ;;  %439 = vst.msk [vmem:[#allocation2 + $0x68] sm:$0x3] %vm414_vm0, %v389_v21  ;;  %v387_v26 = vld [vmem:[%s5939_s15 + $0x60] sm:$0xf] }
  0x36   : > { %v811_v22 = vsel %vm799_vm2, %v806_v9, %v810_v58  ;;  %v843_v24 = vshrl.u32 %v6034_v11, 16  ;;  %v845_v25 = vshll.u32 %v6034_v11, 16  ;;  %v388_v28 = vld [vmem:[%s5939_s15 + $0x64] sm:$0xf]  ;;  %v864_v31 = vshll.u32 %v6023_v60, 16 }
  0x37   : > { %v834_v23 = vor.u32 %v833_v10, %v829_v0  ;;  %1052 = vrot.lane.b32.xlu0 %v811_v22, %s5828_s16  ;;  %v6054_v29 = vshrl.u32 %v6042_v17, 16  ;;  %v6056_v30 = vcombine.low %v607_v12, %v608_v18  ;;  %v615_v32 = vmax.bf16 %v9047_v27, %v555_v8  ;;  %437 = vst.msk [vmem:[#allocation2 + $0x60] sm:$0xf] %vm411_vm1, %v387_v26  ;;  %v392_v33 = vld [vmem:[%s5939_s15 + $0x74] sm:$0x3] }
  0x38   : > { %438 = vst.msk [vmem:[#allocation2 + $0x64] sm:$0xf] %vm411_vm1, %v388_v28  ;;  %v390_v34 = vld [vmem:[%s5939_s15 + $0x6c] sm:$0xf]  ;;  %v847_v36 = vrot.slane %v845_v25, 1  ;;  %v610_v37 = vmax.bf16 %v9047_v27, %v550_v13  ;;  %v611_v38 = vmax.bf16 %v9047_v27, %v551_v14  ;;  %v878_v52 = vshll.u32 %v6042_v17, 16 }
  0x39   : > { %9162 = vst [vmem:[#allocation10_spill] sm:$0xff] %v6054_v29  ;;  %v6065_v35 = vsel %vm799_vm2, %v834_v23, %v838_v5  ;;  %v553_v39 = vld [vmem:[#allocation2 + $0x48] sm:$0xf]  ;;  %v554_v43 = vld [vmem:[#allocation2 + $0x4c] sm:$0xf]  ;;  %1066 = vrot.lane.b32.xlu1 %v6030_v4, %s5828_s16  ;;  %v857_v47 = vshrl.u32 %v6056_v30, 16  ;;  %v6077_v50 = vcombine.low %v615_v32, %v615_v32  ;;  %v598_v58 = vmax.bf16 %v9047_v27, %v538_v19 }
  0x3a   : > { %442 = vst.msk [vmem:[#allocation2 + $0x74] sm:$0x3] %vm414_vm0, %v392_v33  ;;  %v391_v45 = vld [vmem:[%s5939_s15 + $0x70] sm:$0xf]  ;;  %v395_v46 = vld [vmem:[%s5939_s15 + $0x80] sm:$0x3]  ;;  %v848_v55 = vor.u32 %v847_v36, %v843_v24  ;;  %v6083_v57 = vcombine.low %v610_v37, %v611_v38  ;;  %v599_v59 = vmax.bf16 %v9047_v27, %v539_v20  ;;  %v613_v20 = vmax.bf16 %v9047_v27, %v553_v39 }
  0x3b   : > { %440 = vst.msk [vmem:[#allocation2 + $0x6c] sm:$0xf] %vm411_vm1, %v390_v34  ;;  %v859_v49 = vshll.u32 %v6056_v30, 16  ;;  %9163 = vst [vmem:[#allocation11_spill] sm:$0xff] %v6077_v50  ;;  %v393_v54 = vld [vmem:[%s5939_s15 + $0x78] sm:$0xf]  ;;  %1060 = vrot.lane.b32.xlu0 %v6065_v35, %s5828_s16 }
  0x3c   : > { %441 = vst.msk [vmem:[#allocation2 + $0x70] sm:$0xf] %vm411_vm1, %v391_v45  ;;  %v558_v61 = vld [vmem:[#allocation2 + $0x5c] sm:$0x3]  ;;  %v556_v62 = vld [vmem:[#allocation2 + $0x54] sm:$0xf]  ;;  %v6102_v8 = vsel %vm799_vm2, %v848_v55, %v852_v16  ;;  %v6106_v12 = vcombine.low %v598_v58, %v599_v59  ;;  %v614_v16 = vmax.bf16 %v9047_v27, %v554_v43 }
  0x3d   : > { %445 = vst.msk [vmem:[#allocation2 + $0x80] sm:$0x3] %vm414_vm0, %v395_v46  ;;  %v394_v63 = vld [vmem:[%s5939_s15 + $0x7c] sm:$0xf]  ;;  %v398_v0 = vld [vmem:[%s5939_s15 + $0x8c] sm:$0x3]  ;;  %1070 = vrot.lane.b32.xlu1 %v6040_v15, %s5828_s16  ;;  %v618_v33 = vmax.bf16 %v9047_v27, %v558_v61  ;;  %v616_v34 = vmax.bf16 %v9047_v27, %v556_v62 }
  0x3e   : > { %443 = vst.msk [vmem:[#allocation2 + $0x78] sm:$0xf] %vm411_vm1, %v393_v54  ;;  %v396_v1 = vld [vmem:[%s5939_s15 + $0x84] sm:$0xf]  ;;  %v861_v2 = vrot.slane %v859_v49, 1  ;;  %v866_v3 = vrot.slane %v864_v31, 1  ;;  %v6123_v31 = vcombine.low %v613_v20, %v614_v16 }
  0x3f   : > { %v6094_v5 = vshrl.u32 %v6077_v50, 16  ;;  %v822_v6 = vshll.u32 %v5995_v40, 16  ;;  %444 = vst.msk [vmem:[#allocation2 + $0x7c] sm:$0xf] %vm411_vm1, %v394_v63  ;;  %v397_v7 = vld [vmem:[%s5939_s15 + $0x88] sm:$0xf]  ;;  %1064 = vrot.lane.b32.xlu0 %v6102_v8, %s5828_s16 }
  0x40   : > { %448 = vst.msk [vmem:[#allocation2 + $0x8c] sm:$0x3] %vm414_vm0, %v398_v0  ;;  %v871_v9 = vshrl.u32 %v6083_v57, 16  ;;  %v873_v10 = vshll.u32 %v6083_v57, 16  ;;  %v401_v13 = vld [vmem:[%s5939_s15 + $0x98] sm:$0x3]  ;;  %v862_v18 = vor.u32 %v861_v2, %v857_v47  ;;  %v6136_v47 = vcombine.low %v618_v33, %v618_v33 }
  0x41   : > { %9164 = vst [vmem:[#allocation12_spill] sm:$0xff] %v6094_v5  ;;  %446 = vst.msk [vmem:[#allocation2 + $0x84] sm:$0xf] %vm411_vm1, %v396_v1  ;;  %v399_v14 = vld [vmem:[%s5939_s15 + $0x90] sm:$0xf]  ;;  %v880_v19 = vrot.slane %v878_v52, 1  ;;  %1074 = vrot.lane.b32.xlu1 %v6054_v29, %s5828_s16 }
  0x42   : > { %447 = vst.msk [vmem:[#allocation2 + $0x88] sm:$0xf] %vm411_vm1, %v397_v7  ;;  %v557_v21 = vld [vmem:[#allocation2 + $0x58] sm:$0xf]  ;;  %v400_v22 = vld [vmem:[%s5939_s15 + $0x94] sm:$0xf]  ;;  %v6129_v37 = vsel %vm799_vm2, %v862_v18, %v866_v3 }
  0x43   : > { %451 = vst.msk [vmem:[#allocation2 + $0x98] sm:$0x3] %vm414_vm0, %v401_v13  ;;  %v875_v23 = vrot.slane %v873_v10, 1  ;;  %v815_v24 = vshrl.u32 %v6106_v12, 16  ;;  %v817_v25 = vshll.u32 %v6106_v12, 16  ;;  %v824_v26 = vrot.slane %v822_v6, 1  ;;  %1068 = vrot.lane.b32.xlu0 %v6129_v37, %s5828_s16 }
  0x44   : > { %449 = vst.msk [vmem:[#allocation2 + $0x90] sm:$0xf] %vm411_vm1, %v399_v14  ;;  %v561_v28 = vld [vmem:[#allocation2 + $0x68] sm:$0x3]  ;;  %450 = vst.msk [vmem:[#allocation2 + $0x94] sm:$0xf] %vm411_vm1, %v400_v22  ;;  %v617_v43 = vmax.bf16 %v9047_v27, %v557_v21 }
  0x45   : > { %v892_v32 = vshll.u32 %v6077_v50, 16  ;;  %v559_v36 = vld [vmem:[#allocation2 + $0x60] sm:$0xf]  ;;  %v876_v38 = vor.u32 %v875_v23, %v871_v9  ;;  %v819_v39 = vrot.slane %v817_v25, 1  ;;  %v885_v45 = vshrl.u32 %v6123_v31, 16  ;;  %9165 = vst [vmem:[#allocation13_spill] sm:$0xff] %v6136_v47  ;;  %1078 = vrot.lane.b32.xlu1 %v6094_v5, %s5828_s16 }
  0x46   : > { %v887_v46 = vshll.u32 %v6123_v31, 16  ;;  %v621_v49 = vmax.bf16 %v9047_v27, %v561_v28  ;;  %v560_v52 = vld [vmem:[#allocation2 + $0x64] sm:$0xf]  ;;  %v6140_v58 = vcombine.low %v616_v34, %v617_v43  ;;  %v619_v59 = vmax.bf16 %v9047_v27, %v559_v36  ;;  %v564_v61 = vld [vmem:[#allocation2 + $0x74] sm:$0x3] }
  0x47   : > { %v404_v54 = vld [vmem:[%s5939_s15 + $0xa4] sm:$0x3]  ;;  %v820_v55 = vor.u32 %v819_v39, %v815_v24  ;;  %v894_v63 = vrot.slane %v892_v32, 1  ;;  %v906_v0 = vshll.u32 %v6136_v47, 16  ;;  %v562_v2 = vld [vmem:[#allocation2 + $0x6c] sm:$0xf]  ;;  %v6154_v3 = vsel %vm799_vm2, %v876_v38, %v880_v19 }
  0x48   : > { %9166 = vst [vmem:[#allocation14_spill] sm:$0xff] %v6140_v58  ;;  %454 = vst.msk [vmem:[#allocation2 + $0xa4] sm:$0x3] %vm414_vm0, %v404_v54  ;;  %v889_v62 = vrot.slane %v887_v46, 1  ;;  %v6147_v1 = vcombine.low %v621_v49, %v621_v49  ;;  %v899_v6 = vshrl.u32 %v6140_v58, 16  ;;  %v901_v7 = vshll.u32 %v6140_v58, 16  ;;  %1072 = vrot.lane.b32.xlu0 %v6154_v3, %s5828_s16 }
  0x49   : > { %9168 = vst [vmem:[#allocation16_spill] sm:$0xff] %v6154_v3  ;;  %v620_v9 = vmax.bf16 %v9047_v27, %v560_v52  ;;  %v563_v10 = vld [vmem:[#allocation2 + $0x70] sm:$0xf]  ;;  %v567_v13 = vld [vmem:[#allocation2 + $0x80] sm:$0x3]  ;;  %v6162_v14 = vsel %vm799_vm2, %v820_v55, %v824_v26  ;;  %v6165_v19 = vshrl.u32 %v6136_v47, 16  ;;  %v624_v24 = vmax.bf16 %v9047_v27, %v564_v61 }
  0x4a   : > { %9167 = vst [vmem:[#allocation15_spill] sm:$0xff] %v6147_v1  ;;  %v890_v18 = vor.u32 %v889_v62, %v885_v45  ;;  %v908_v20 = vrot.slane %v906_v0, 1  ;;  %v565_v16 = vld [vmem:[#allocation2 + $0x78] sm:$0xf]  ;;  %v566_v21 = vld [vmem:[#allocation2 + $0x7c] sm:$0xf]  ;;  %v622_v25 = vmax.bf16 %v9047_v27, %v562_v2  ;;  %v623_v34 = vmax.bf16 %v9047_v27, %v563_v10  ;;  %1056 = vrot.lane.b32.xlu1 %v6162_v14, %s5828_s16 }
  0x4b   : > { %9169 = vst [vmem:[#allocation17_spill] sm:$0xff] %v6165_v19  ;;  %v903_v22 = vrot.slane %v901_v7, 1  ;;  %v6167_v23 = vcombine.low %v619_v59, %v620_v9  ;;  %v402_v28 = vld [vmem:[%s5939_s15 + $0x9c] sm:$0xf]  ;;  %v403_v32 = vld [vmem:[%s5939_s15 + $0xa0] sm:$0xf]  ;;  %v627_v36 = vmax.bf16 %v9047_v27, %v567_v13  ;;  %v6187_v52 = vcombine.low %v624_v24, %v624_v24 }
  0x4c   : > { %v6176_v26 = vsel %vm799_vm2, %v890_v18, %v894_v63  ;;  %v920_v33 = vshll.u32 %v6147_v1, 16  ;;  %v570_v38 = vld [vmem:[#allocation2 + $0x8c] sm:$0x3]  ;;  %452 = vst.msk [vmem:[#allocation2 + $0x9c] sm:$0xf] %vm411_vm1, %v402_v28  ;;  %v6201_v61 = vcombine.low %v622_v25, %v623_v34  ;;  %v625_v62 = vmax.bf16 %v9047_v27, %v565_v16 }
  0x4d   : > { %9170 = vst [vmem:[#allocation18_spill] sm:$0xff] %v6167_v23  ;;  %9171 = vst [vmem:[#allocation19_spill] sm:$0xff] %v6176_v26  ;;  %v407_v39 = vld [vmem:[%s5939_s15 + $0xb0] sm:$0x3]  ;;  %v405_v43 = vld [vmem:[%s5939_s15 + $0xa8] sm:$0xf]  ;;  %v904_v45 = vor.u32 %v903_v22, %v899_v6  ;;  %v626_v63 = vmax.bf16 %v9047_v27, %v566_v21  ;;  %v6213_v13 = vcombine.low %v627_v36, %v627_v36  ;;  %1076 = vrot.lane.b32.xlu0 %v6176_v26, %s5828_s16 }
  0x4e   : > { %453 = vst.msk [vmem:[#allocation2 + $0xa0] sm:$0xf] %vm411_vm1, %v403_v32  ;;  %v913_v46 = vshrl.u32 %v6167_v23, 16  ;;  %v915_v49 = vshll.u32 %v6167_v23, 16  ;;  %v568_v54 = vld [vmem:[#allocation2 + $0x84] sm:$0xf]  ;;  %1082 = vrot.lane.b32.xlu1 %v6165_v19, %s5828_s16 }
  0x4f   : > { %457 = vst.msk [vmem:[#allocation2 + $0xb0] sm:$0x3] %vm414_vm0, %v407_v39  ;;  %v406_v55 = vld [vmem:[%s5939_s15 + $0xac] sm:$0xf]  ;;  %v410_v59 = vld [vmem:[%s5939_s15 + $0xbc] sm:$0x3]  ;;  %v6222_v25 = vcombine.low %v625_v62, %v626_v63  ;;  %v6227_v34 = vsel %vm799_vm2, %v904_v45, %v908_v20 }
  0x50   : > { %455 = vst.msk [vmem:[#allocation2 + $0xa8] sm:$0xf] %vm411_vm1, %v405_v43  ;;  %v569_v0 = vld [vmem:[#allocation2 + $0x88] sm:$0xf]  ;;  %456 = vst.msk [vmem:[#allocation2 + $0xac] sm:$0xf] %vm411_vm1, %v406_v55  ;;  %v630_v43 = vmax.bf16 %v9047_v27, %v570_v38 }
  0x51   : > { %460 = vst.msk [vmem:[#allocation2 + $0xbc] sm:$0x3] %vm414_vm0, %v410_v59  ;;  %v408_v2 = vld [vmem:[%s5939_s15 + $0xb4] sm:$0xf]  ;;  %v409_v6 = vld [vmem:[%s5939_s15 + $0xb8] sm:$0xf]  ;;  %1080 = vrot.lane.b32.xlu0 %v6227_v34, %s5828_s16 }
  0x52   : > { %v6210_v7 = vshrl.u32 %v6147_v1, 16  ;;  %v917_v9 = vrot.slane %v915_v49, 1  ;;  %v934_v10 = vshll.u32 %v6187_v52, 16  ;;  %v573_v18 = vld [vmem:[#allocation2 + $0x98] sm:$0x3]  ;;  %v927_v22 = vshrl.u32 %v6201_v61, 16 }
  0x53   : > { %v571_v16 = vld [vmem:[#allocation2 + $0x90] sm:$0xf]  ;;  %458 = vst.msk [vmem:[#allocation2 + $0xb4] sm:$0xf] %vm411_vm1, %v408_v2  ;;  %459 = vst.msk [vmem:[#allocation2 + $0xb8] sm:$0xf] %vm411_vm1, %v409_v6  ;;  %v628_v2 = vmax.bf16 %v9047_v27, %v568_v54  ;;  %v6242_v45 = vcombine.low %v630_v43, %v630_v43 }
  0x54   : > { %9172 = vst [vmem:[#allocation20_spill] sm:$0xff] %v6210_v7  ;;  %v463_v21 = vld [vmem:[%s6197_s20 + $0x8] sm:$0x3]  ;;  %v929_v24 = vshll.u32 %v6201_v61, 16  ;;  %v572_v28 = vld [vmem:[#allocation2 + $0x94] sm:$0xf]  ;;  %v918_v36 = vor.u32 %v917_v9, %v913_v46  ;;  %v629_v46 = vmax.bf16 %v9047_v27, %v569_v0  ;;  %1086 = vrot.lane.b32.xlu1 %v6210_v7, %s5828_s16 }
  0x55   : > { %476 = vst.msk [vmem:[#allocation2 + $0xc8] sm:$0x3] %vm414_vm0, %v463_v21  ;;  %v461_v32 = vld [vmem:[%s6197_s20] sm:$0xf]  ;;  %9173 = vst [vmem:[#allocation21_spill] sm:$0xff] %v6227_v34  ;;  %v922_v39 = vrot.slane %v920_v33, 1  ;;  %v631_v21 = vmax.bf16 %v9047_v27, %v571_v16  ;;  %v632_v43 = vmax.bf16 %v9047_v27, %v572_v28 }
  0x56   : > { %v462_v49 = vld [vmem:[%s6197_s20 + $0x4] sm:$0xf]  ;;  %474 = vst.msk [vmem:[#allocation2 + $0xc0] sm:$0xf] %vm411_vm1, %v461_v32  ;;  %v466_v55 = vld [vmem:[%s6197_s20 + $0x14] sm:$0x3]  ;;  %v6256_v0 = vcombine.low %v628_v2, %v629_v46 }
  0x57   : > { %v931_v59 = vrot.slane %v929_v24, 1  ;;  %v936_v62 = vrot.slane %v934_v10, 1  ;;  %v943_v63 = vshll.u32 %v6222_v25, 16  ;;  %475 = vst.msk [vmem:[#allocation2 + $0xc4] sm:$0xf] %vm411_vm1, %v462_v49  ;;  %v941_v33 = vshrl.u32 %v6222_v25, 16 }
  0x58   : > { %479 = vst.msk [vmem:[#allocation2 + $0xd4] sm:$0x3] %vm414_vm0, %v466_v55  ;;  %v464_v20 = vld [vmem:[%s6197_s20 + $0xc] sm:$0xf]  ;;  %v948_v38 = vshll.u32 %v6213_v13, 16  ;;  %9174 = vst [vmem:[#allocation22_spill] sm:$0xff] %v6242_v45  ;;  %v633_v10 = vmax.bf16 %v9047_v27, %v573_v18  ;;  %v6251_v24 = vsel %vm799_vm2, %v918_v36, %v922_v39 }
  0x59   : > { %v576_v6 = vld [vmem:[#allocation2 + $0xa4] sm:$0x3]  ;;  %477 = vst.msk [vmem:[#allocation2 + $0xcc] sm:$0xf] %vm411_vm1, %v464_v20  ;;  %v932_v54 = vor.u32 %v931_v59, %v927_v22  ;;  %v945_v9 = vrot.slane %v943_v63, 1  ;;  %9175 = vst [vmem:[#allocation23_spill] sm:$0xff] %v6251_v24  ;;  %v6270_v63 = vcombine.low %v631_v21, %v632_v43  ;;  %1084 = vrot.lane.b32.xlu0 %v6251_v24, %s5828_s16 }
  0x5a   : > { %v6254_v32 = vshrl.u32 %v6187_v52, 16  ;;  %v6262_v22 = vshrl.u32 %v6213_v13, 16  ;;  %v962_v18 = vshll.u32 %v6242_v45, 16  ;;  %v636_v16 = vmax.bf16 %v9047_v27, %v576_v6  ;;  %v574_v49 = vld [vmem:[#allocation2 + $0x9c] sm:$0xf]  ;;  %s5836_s15 = smov 36  }
  0x5b   : > { %v465_v36 = vld [vmem:[%s6197_s20 + $0x10] sm:$0xf]  ;;  %v950_v39 = vrot.slane %v948_v38, 1  ;;  %v957_v55 = vshll.u32 %v6256_v0, 16  ;;  %v6268_v59 = vcombine.low %v633_v10, %v633_v10  ;;  %9179 = vst [vmem:[#allocation27_spill] sm:$0xff] %v6270_v63  ;;  %v6276_v2 = vsel %vm799_vm2, %v932_v54, %v936_v62 }
  0x5c   : > { %9176 = vst [vmem:[#allocation24_spill] sm:$0xff] %v6254_v32  ;;  %9177 = vst [vmem:[#allocation25_spill] sm:$0xff] %v6262_v22  ;;  %v575_v28 = vld [vmem:[#allocation2 + $0xa0] sm:$0xf]  ;;  %v946_v20 = vor.u32 %v945_v9, %v941_v33  ;;  %v6278_v46 = vcombine.low %v636_v16, %v636_v16  ;;  %v579_v6 = vld [vmem:[#allocation2 + $0xb0] sm:$0x3]  ;;  %v634_v43 = vmax.bf16 %v9047_v27, %v574_v49  ;;  %1090 = vrot.lane.b32.xlu1 %v6254_v32, %s5828_s16 }
  0x5d   : > { %9178 = vst [vmem:[#allocation26_spill] sm:$0xff] %v6268_v59  ;;  %478 = vst.msk [vmem:[#allocation2 + $0xd0] sm:$0xf] %vm411_vm1, %v465_v36  ;;  %v577_v38 = vld [vmem:[#allocation2 + $0xa8] sm:$0xf]  ;;  %v955_v48 = vshrl.u32 %v6256_v0, 16  ;;  %v635_v33 = vmax.bf16 %v9047_v27, %v575_v28  ;;  %v639_v24 = vmax.bf16 %v9047_v27, %v579_v6  ;;  %1088 = vrot.lane.b32.xlu0 %v6276_v2, %s5828_s16 }
  0x5e   : > { %9180 = vst [vmem:[#allocation28_spill] sm:$0xff] %v6276_v2  ;;  %9181 = vst [vmem:[#allocation29_spill] sm:$0xff] %v6278_v46  ;;  %v959_v10 = vrot.slane %v957_v55, 1  ;;  %v971_v21 = vshll.u32 %v6270_v63, 16  ;;  %v578_v7 = vld [vmem:[#allocation2 + $0xac] sm:$0xf]  ;;  %v637_v49 = vmax.bf16 %v9047_v27, %v577_v38  ;;  %v6300_v5 = vsel %vm799_vm2, %v946_v20, %v950_v39 }
  0x5f   : > { %v6286_v36 = vshrl.u32 %v6242_v45, 16  ;;  %v964_v62 = vrot.slane %v962_v18, 1  ;;  %v582_v54 = vld [vmem:[#allocation2 + $0xbc] sm:$0x3]  ;;  %v580_v9 = vld [vmem:[#allocation2 + $0xb4] sm:$0xf]  ;;  %v6295_v34 = vcombine.low %v634_v43, %v635_v33  ;;  %v638_v28 = vmax.bf16 %v9047_v27, %v578_v7 }
  0x60   : > { %v969_v16 = vshrl.u32 %v6270_v63, 16  ;;  %v976_v55 = vshll.u32 %v6268_v59, 16  ;;  %v581_v19 = vld [vmem:[#allocation2 + $0xb8] sm:$0xf]  ;;  %v973_v32 = vrot.slane %v971_v21, 1  ;;  %v990_v18 = vshll.u32 %v6278_v46, 16  ;;  %1094 = vrot.lane.b32.xlu1 %v6262_v22, %s5828_s16 }
  0x61   : > { %9182 = vst [vmem:[#allocation30_spill] sm:$0xff] %v6286_v36  ;;  %9183 = vst [vmem:[#allocation31_spill] sm:$0xff] %v6295_v34  ;;  %v960_v26 = vor.u32 %v959_v10, %v955_v48  ;;  %v640_v29 = vmax.bf16 %v9047_v27, %v580_v9  ;;  %v583_v6 = vld [vmem:[#allocation2 + $0xc0] sm:$0xf]  ;;  %v6306_v38 = vshrl.u32 %v6268_v59, 16  ;;  %v985_v21 = vshll.u32 %v6295_v34, 16  ;;  %1092 = vrot.lane.b32.xlu0 %v6300_v5, %s5828_s16 }
  0x62   : > { %9184 = vst [vmem:[#allocation32_spill] sm:$0xff] %v6300_v5  ;;  %v6309_v43 = vcombine.low %v637_v49, %v638_v28  ;;  %v584_v33 = vld [vmem:[#allocation2 + $0xc4] sm:$0xf]  ;;  %v978_v2 = vrot.slane %v976_v55, 1  ;;  %v6311_v7 = vcombine.low %v639_v24, %v639_v24  ;;  %v642_v39 = vmax.bf16 %v9047_v27, %v582_v54  ;;  %v585_v20 = vld [vmem:[#allocation2 + $0xc8] sm:$0x3] }
  0x63   : > { %9185 = vst [vmem:[#allocation33_spill] sm:$0xff] %v6306_v38  ;;  %v641_v48 = vmax.bf16 %v9047_v27, %v581_v19  ;;  %v974_v10 = vor.u32 %v973_v32, %v969_v16  ;;  %v992_v9 = vrot.slane %v990_v18, 1  ;;  %v586_v3 = vld [vmem:[#allocation2 + $0xcc] sm:$0xf]  ;;  %v6319_v49 = vsel %vm799_vm2, %v960_v26, %v964_v62 }
  0x64   : > { %9186 = vst [vmem:[#allocation34_spill] sm:$0xff] %v6309_v43  ;;  %9187 = vst [vmem:[#allocation35_spill] sm:$0xff] %v6311_v7  ;;  %v999_v22 = vshll.u32 %v6309_v43, 16  ;;  %v983_v55 = vshrl.u32 %v6295_v34, 16  ;;  %v987_v24 = vrot.slane %v985_v21, 1  ;;  %1098 = vrot.lane.b32.xlu1 %v6286_v36, %s5828_s16  ;;  %v643_v19 = vmax.bf16 %v9047_v27, %v583_v6 }
  0x65   : > { %9188 = vst [vmem:[#allocation36_spill] sm:$0xff] %v6319_v49  ;;  %v6322_v28 = vcombine.low %v640_v29, %v641_v48  ;;  %v644_v54 = vmax.bf16 %v9047_v27, %v584_v33  ;;  %v587_v32 = vld [vmem:[#allocation2 + $0xd0] sm:$0xf]  ;;  %v997_v16 = vshrl.u32 %v6309_v43, 16  ;;  %v1004_v5 = vshll.u32 %v6311_v7, 16  ;;  %1096 = vrot.lane.b32.xlu0 %v6319_v49, %s5828_s16 }
  0x66   : > { %v1001_v18 = vrot.slane %v999_v22, 1  ;;  %v6330_v26 = vcombine.low %v642_v39, %v642_v39  ;;  %v6335_v29 = vsel %vm799_vm2, %v974_v10, %v978_v2  ;;  %v645_v62 = vmax.bf16 %v9047_v27, %v585_v20  ;;  %v588_v48 = vld [vmem:[#allocation2 + $0xd4] sm:$0x3] }
  0x67   : > { %9189 = vst [vmem:[#allocation37_spill] sm:$0xff] %v6322_v28  ;;  %9191 = vst [vmem:[#allocation39_spill] sm:$0xff] %v6335_v29  ;;  %v988_v21 = vor.u32 %v987_v24, %v983_v55  ;;  %v1013_v6 = vshll.u32 %v6322_v28, 16  ;;  %v6339_v33 = vcombine.low %v643_v19, %v644_v54  ;;  %v646_v22 = vmax.bf16 %v9047_v27, %v586_v3 }
  0x68   : > { %9190 = vst [vmem:[#allocation38_spill] sm:$0xff] %v6330_v26  ;;  %1102 = vrot.lane.b32.xlu1 %v6306_v38, %s5828_s16  ;;  %v6345_v39 = vshrl.u32 %v6278_v46, 16  ;;  %v1006_v36 = vrot.slane %v1004_v5, 1  ;;  %v1018_v2 = vshll.u32 %v6330_v26, 16  ;;  %v647_v10 = vmax.bf16 %v9047_v27, %v587_v32 }
  0x69   : > { %9192 = vst [vmem:[#allocation40_spill] sm:$0xff] %v6339_v33  ;;  %1100 = vrot.lane.b32.xlu0 %v6335_v29, %s5828_s16  ;;  %v1002_v20 = vor.u32 %v1001_v18, %v997_v16  ;;  %v1011_v55 = vshrl.u32 %v6322_v28, 16  ;;  %v6352_v24 = vcombine.low %v645_v62, %v645_v62  ;;  %v648_v3 = vmax.bf16 %v9047_v27, %v588_v48 }
  0x6a   : > { %9193 = vst [vmem:[#allocation41_spill] sm:$0xff] %v6345_v39  ;;  %v6356_v19 = vsel %vm799_vm2, %v988_v21, %v992_v9  ;;  %v1015_v54 = vrot.slane %v1013_v6, 1  ;;  %v1027_v5 = vshll.u32 %v6339_v33, 16  ;;  %v6359_v38 = vcombine.low %v646_v22, %v647_v10 }
  0x6b   : > { %9194 = vst [vmem:[#allocation42_spill] sm:$0xff] %v6352_v24  ;;  %9195 = vst [vmem:[#allocation43_spill] sm:$0xff] %v6356_v19  ;;  %v6364_v32 = vshrl.u32 %v6311_v7, 16  ;;  %v6369_v16 = vsel %vm799_vm2, %v1002_v20, %v1006_v36  ;;  %v1020_v18 = vrot.slane %v1018_v2, 1  ;;  %v1032_v9 = vshll.u32 %v6352_v24, 16 }
  0x6c   : > { %9196 = vst [vmem:[#allocation44_spill] sm:$0xff] %v6359_v38  ;;  %1106 = vrot.lane.b32.xlu1 %v6345_v39, %s5828_s16  ;;  %9198 = vst [vmem:[#allocation46_spill] sm:$0xff] %v6369_v16  ;;  %v6372_v62 = vcombine.low %v648_v3, %v648_v3  ;;  %v1016_v21 = vor.u32 %v1015_v54, %v1011_v55  ;;  %v1025_v6 = vshrl.u32 %v6339_v33, 16  ;;  %v1029_v48 = vrot.slane %v1027_v5, 1 }
  0x6d   : > { %9197 = vst [vmem:[#allocation45_spill] sm:$0xff] %v6364_v32  ;;  %1104 = vrot.lane.b32.xlu0 %v6356_v19, %s5828_s16  ;;  %v1041_v22 = vshll.u32 %v6359_v38, 16  ;;  %v6379_v10 = vshrl.u32 %v6330_v26, 16  ;;  %v1034_v36 = vrot.slane %v1032_v9, 1  ;;  %v1039_v3 = vshrl.u32 %v6359_v38, 16 }
  0x6e   : > { %9199 = vst [vmem:[#allocation47_spill] sm:$0xff] %v6372_v62  ;;  %v1046_v2 = vshll.u32 %v6372_v62, 16  ;;  %v6385_v20 = vsel %vm799_vm2, %v1016_v21, %v1020_v18  ;;  %v1030_v55 = vor.u32 %v1029_v48, %v1025_v6  ;;  %v6391_v5 = vshrl.u32 %v6352_v24, 16 }
  0x6f   : > { %9200 = vst [vmem:[#allocation48_spill] sm:$0xff] %v6379_v10  ;;  %9201 = vst [vmem:[#allocation49_spill] sm:$0xff] %v6385_v20  ;;  %v1043_v54 = vrot.slane %v1041_v22, 1  ;;  %v6401_v21 = vshrl.u32 %v6372_v62, 16  ;;  %v1126_v48 = vrot.slane %v5997_v41, 1  ;;  %v1125_v22 = vrot.slane %v6002_v44, 1 }
  0x70   : > { %1110 = vrot.lane.b32.xlu1 %v6364_v32, %s5828_s16  ;;  %9202 = vst [vmem:[#allocation50_spill] sm:$0xff] %v6391_v5  ;;  %v6396_v9 = vsel %vm799_vm2, %v1030_v55, %v1034_v36  ;;  %v1048_v18 = vrot.slane %v1046_v2, 1  ;;  %v6416_v2 = vrot.slane %v5995_v40, 1  ;;  %v1128_v55 = vrot.slane %v6106_v12, 1 }
  0x71   : > { %1108 = vrot.lane.b32.xlu0 %v6369_v16, %s5828_s16  ;;  %9203 = vst [vmem:[#allocation51_spill] sm:$0xff] %v6396_v9  ;;  %v1044_v27 = vor.u32 %v1043_v54, %v1039_v3  ;;  %9204 = vst [vmem:[#allocation52_spill] sm:$0xff] %v6401_v21  ;;  %v1127_v36 = vsel %vm9154_vm3, %v1125_v22, %v1126_v48  ;;  %v467_v3 = vld [vmem:[%s6197_s20 + $0x18] sm:$0xf]  ;;  %v468_v54 = vld [vmem:[%s6197_s20 + $0x1c] sm:$0xf] }
  0x72   : > { %480 = vst.msk [vmem:[#allocation2 + $0xd8] sm:$0xf] %vm411_vm1, %v467_v3  ;;  %481 = vst.msk [vmem:[#allocation2 + $0xdc] sm:$0xf] %vm411_vm1, %v468_v54  ;;  %v6432_v22 = vrot.slane %v5999_v42, 1  ;;  %v6456_v54 = vrot.slane %v6023_v60, 1 }
  0x73   : > { %v6406_v6 = vsel %vm799_vm2, %v1044_v27, %v1048_v18  ;;  %v469_v27 = vld [vmem:[%s6197_s20 + $0x20] sm:$0x3]  ;;  %v6429_v18 = vsel %vm9154_vm3, %v1128_v55, %v6416_v2  ;;  %v1134_v55 = vrot.slane %v6034_v11, 1  ;;  %v6504_v16 = vrot.slane %v6147_v1, 1 }
  0x74   : > { %1114 = vrot.lane.b32.xlu1 %v6379_v10, %s5828_s16  ;;  %9205 = vst [vmem:[#allocation53_spill] sm:$0xff] %v6406_v6  ;;  %482 = vst.msk [vmem:[#allocation2 + $0xe0] sm:$0x3] %vm414_vm0, %v469_v27  ;;  %v6444_v27 = vrot.slane %v6009_v51, 1  ;;  %v6516_v19 = vrot.slane %v6187_v52, 1  ;;  %v6528_v49 = vrot.slane %v6213_v13, 1 }
  0x75   : > { %1112 = vrot.lane.b32.xlu0 %v6385_v20, %s5828_s16  ;;  %v6492_v20 = vrot.slane %v6136_v47, 1  ;;  %9207 = vst [vmem:[#allocation55_spill] sm:$0xff] %v6504_v16 }
  0x76   : > { %v6453_v3 = vsel %vm9154_vm3, %v1134_v55, %v6444_v27  ;;  %v1140_v55 = vrot.slane %v6083_v57, 1  ;;  %9209 = vst [vmem:[#allocation57_spill] sm:$0xff] %v6516_v19  ;;  %9211 = vst [vmem:[#allocation59_spill] sm:$0xff] %v6528_v49 }
  0x77   : > { %9206 = vst [vmem:[#allocation54_spill] sm:$0xff] %v6492_v20 }
  0x78   : > { %1118 = vrot.lane.b32.xlu1 %v6391_v5, %s5828_s16 }
  0x79   : > { %1116 = vrot.lane.b32.xlu0 %v6396_v9, %s5828_s16  ;;  %v6480_v9 = vrot.slane %v6077_v50, 1 }
  0x7c   : > { %1122 = vrot.lane.b32.xlu1 %v6401_v21, %s5828_s16 }
  0x7d   : > { %1120 = vrot.lane.b32.xlu0 %v6406_v6, %s5828_s16  ;;  %v6468_v6 = vrot.slane %v6042_v17, 1 }
  0x7f   : > { %v6477_v5 = vsel %vm9154_vm3, %v1140_v55, %v6468_v6  ;;  %v1146_v55 = vrot.slane %v6140_v58, 1 }
  0x80   : > { %1181 = vrot.lane.b32.xlu1 %v1126_v48, %s5829_s27  ;;  %v1131_v48 = vrot.slane %v6016_v56, 1 }
  0x81   : > { %1179 = vrot.lane.b32.xlu0 %v1127_v36, %s5829_s27  ;;  %v6501_v32 = vsel %vm9154_vm3, %v1146_v55, %v6492_v20  ;;  %v1152_v55 = vrot.slane %v6201_v61, 1 }
  0x82   : > { %v6441_v36 = vsel %vm9154_vm3, %v1131_v48, %v6432_v22  ;;  %v1137_v48 = vrot.slane %v6056_v30, 1 }
  0x83   : > { %v6525_v29 = vsel %vm9154_vm3, %v1152_v55, %v6516_v19  ;;  %v1158_v55 = vrot.slane %v6256_v0, 1 }
  0x84   : > { %1185 = vrot.lane.b32.xlu1 %v6416_v2, %s5829_s27  ;;  %v6465_v21 = vsel %vm9154_vm3, %v1137_v48, %v6456_v54  ;;  %v1143_v48 = vrot.slane %v6123_v31, 1  ;;  %9210 = vst [vmem:[#allocation58_spill] sm:$0xff] %v6525_v29 }
  0x85   : > { %1183 = vrot.lane.b32.xlu0 %v6429_v18, %s5829_s27 }
  0x86   : > { %v6489_v10 = vsel %vm9154_vm3, %v1143_v48, %v6480_v9  ;;  %v1149_v48 = vrot.slane %v6167_v23, 1 }
  0x88   : > { %1189 = vrot.lane.b32.xlu1 %v6432_v22, %s5829_s27  ;;  %v6513_v39 = vsel %vm9154_vm3, %v1149_v48, %v6504_v16  ;;  %v1155_v48 = vrot.slane %v6222_v25, 1 }
  0x89   : > { %1187 = vrot.lane.b32.xlu0 %v6441_v36, %s5829_s27  ;;  %9208 = vst [vmem:[#allocation56_spill] sm:$0xff] %v6513_v39 }
  0x8a   : > { %v6537_v41 = vsel %vm9154_vm3, %v1155_v48, %v6528_v49  ;;  %v6556_v48 = vrot.slane %v6268_v59, 1 }
  0x8b   : > { %9212 = vst [vmem:[#allocation60_spill] sm:$0xff] %v6537_v41 }
  0x8c   : > { %1193 = vrot.lane.b32.xlu1 %v6444_v27, %s5829_s27  ;;  %9217 = vst [vmem:[#allocation65_spill] sm:$0xff] %v6556_v48 }
  0x8d   : > { %1191 = vrot.lane.b32.xlu0 %v6453_v3, %s5829_s27 }
  0x90   : > { %1197 = vrot.lane.b32.xlu1 %v6456_v54, %s5829_s27 }
  0x91   : > { %1195 = vrot.lane.b32.xlu0 %v6465_v21, %s5829_s27 }
  0x94   : > { %1201 = vrot.lane.b32.xlu1 %v6468_v6, %s5829_s27 }
  0x95   : > { %1199 = vrot.lane.b32.xlu0 %v6477_v5, %s5829_s27 }
  0x98   : > { %1205 = vrot.lane.b32.xlu1 %v6480_v9, %s5829_s27 }
  0x99   : > { %1203 = vrot.lane.b32.xlu0 %v6489_v10, %s5829_s27 }
  0x9c   : > { %1209 = vrot.lane.b32.xlu1 %v6492_v20, %s5829_s27 }
  0x9d   : > { %1207 = vrot.lane.b32.xlu0 %v6501_v32, %s5829_s27 }
  0xa0   : > { %1213 = vrot.lane.b32.xlu1 %v6504_v16, %s5829_s27  ;;  %v6540_v16 = vrot.slane %v6242_v45, 1 }
  0xa1   : > { %1211 = vrot.lane.b32.xlu0 %v6513_v39, %s5829_s27  ;;  %v1161_v39 = vrot.slane %v6270_v63, 1 }
  0xa2   : > { %9213 = vst [vmem:[#allocation61_spill] sm:$0xff] %v6540_v16 }
  0xa3   : > { %v6547_v44 = vpop.permute.xlu1 %1058 }
  0xa4   : > { %1217 = vrot.lane.b32.xlu1 %v6516_v19, %s5829_s27  ;;  %9214 = vst [vmem:[#allocation62_spill] sm:$0xff] %v6547_v44  ;;  %v6549_v19 = vpop.permute.xlu0 %1054 }
  0xa5   : > { %1215 = vrot.lane.b32.xlu0 %v6525_v29, %s5829_s27  ;;  %9215 = vst [vmem:[#allocation63_spill] sm:$0xff] %v6549_v19  ;;  %v6553_v29 = vsel %vm9154_vm3, %v1158_v55, %v6540_v16  ;;  %v6570_v55 = vrot.slane %v6278_v46, 1  ;;  %v1164_v19 = vrot.slane %v6295_v34, 1 }
  0xa6   : > { %9216 = vst [vmem:[#allocation64_spill] sm:$0xff] %v6553_v29 }
  0xa7   : > { %9220 = vst [vmem:[#allocation68_spill] sm:$0xff] %v6570_v55 }
  0xa8   : > { %1221 = vrot.lane.b32.xlu1 %v6528_v49, %s5829_s27  ;;  %v6563_v49 = vpop.permute.xlu1 %1062 }
  0xa9   : > { %1219 = vrot.lane.b32.xlu0 %v6537_v41, %s5829_s27  ;;  %9218 = vst [vmem:[#allocation66_spill] sm:$0xff] %v6563_v49  ;;  %v6567_v41 = vsel %vm9154_vm3, %v1161_v39, %v6556_v48  ;;  %v6573_v44 = vpop.permute.xlu0 %1052  ;;  %v6586_v39 = vrot.slane %v6311_v7, 1  ;;  %v1167_v49 = vrot.slane %v6309_v43, 1 }
  0xaa   : > { %9219 = vst [vmem:[#allocation67_spill] sm:$0xff] %v6567_v41  ;;  %9221 = vst [vmem:[#allocation69_spill] sm:$0xff] %v6573_v44 }
  0xab   : > { %9224 = vst [vmem:[#allocation72_spill] sm:$0xff] %v6586_v39 }
  0xac   : > { %1225 = vrot.lane.b32.xlu1 %v6540_v16, %s5829_s27  ;;  %v6579_v16 = vpop.permute.xlu1 %1066 }
  0xad   : > { %1223 = vrot.lane.b32.xlu0 %v6553_v29, %s5829_s27  ;;  %9222 = vst [vmem:[#allocation70_spill] sm:$0xff] %v6579_v16  ;;  %v6583_v29 = vsel %vm9154_vm3, %v1164_v19, %v6570_v55  ;;  %v6589_v20 = vpop.permute.xlu0 %1060  ;;  %v6602_v19 = vrot.slane %v6330_v26, 1  ;;  %v1170_v16 = vrot.slane %v6322_v28, 1 }
  0xae   : > { %9223 = vst [vmem:[#allocation71_spill] sm:$0xff] %v6583_v29  ;;  %9225 = vst [vmem:[#allocation73_spill] sm:$0xff] %v6589_v20 }
  0xaf   : > { %9228 = vst [vmem:[#allocation76_spill] sm:$0xff] %v6602_v19 }
  0xb0   : > { %1229 = vrot.lane.b32.xlu1 %v6556_v48, %s5829_s27  ;;  %v6595_v48 = vpop.permute.xlu1 %1070 }
  0xb1   : > { %1227 = vrot.lane.b32.xlu0 %v6567_v41, %s5829_s27  ;;  %9226 = vst [vmem:[#allocation74_spill] sm:$0xff] %v6595_v48  ;;  %v6599_v41 = vsel %vm9154_vm3, %v1167_v49, %v6586_v39  ;;  %v6605_v44 = vpop.permute.xlu0 %1064  ;;  %v6618_v49 = vrot.slane %v6352_v24, 1  ;;  %v1173_v48 = vrot.slane %v6339_v33, 1 }
  0xb2   : > { %9227 = vst [vmem:[#allocation75_spill] sm:$0xff] %v6599_v41  ;;  %9229 = vst [vmem:[#allocation77_spill] sm:$0xff] %v6605_v44 }
  0xb3   : > { %9232 = vst [vmem:[#allocation80_spill] sm:$0xff] %v6618_v49 }
  0xb4   : > { %1233 = vrot.lane.b32.xlu1 %v6570_v55, %s5829_s27  ;;  %v6611_v55 = vpop.permute.xlu1 %1074 }
  0xb5   : > { %1231 = vrot.lane.b32.xlu0 %v6583_v29, %s5829_s27  ;;  %9230 = vst [vmem:[#allocation78_spill] sm:$0xff] %v6611_v55  ;;  %v6615_v29 = vsel %vm9154_vm3, %v1170_v16, %v6602_v19  ;;  %v6621_v20 = vpop.permute.xlu0 %1068  ;;  %v6634_v16 = vrot.slane %v6372_v62, 1  ;;  %v1176_v55 = vrot.slane %v6359_v38, 1 }
  0xb6   : > { %9231 = vst [vmem:[#allocation79_spill] sm:$0xff] %v6615_v29  ;;  %9233 = vst [vmem:[#allocation81_spill] sm:$0xff] %v6621_v20  ;;  %v590_v20 = vld [vmem:[#allocation2 + $0xdc] sm:$0xf] }
  0xb7   : > { %9236 = vst [vmem:[#allocation84_spill] sm:$0xff] %v6634_v16 }
  0xb8   : > { %1237 = vrot.lane.b32.xlu1 %v6586_v39, %s5829_s27  ;;  %v6627_v39 = vpop.permute.xlu1 %1078 }
  0xb9   : > { %1235 = vrot.lane.b32.xlu0 %v6599_v41, %s5829_s27  ;;  %9234 = vst [vmem:[#allocation82_spill] sm:$0xff] %v6627_v39  ;;  %v6631_v41 = vsel %vm9154_vm3, %v1173_v48, %v6618_v49 }
  0xba   : > { %9235 = vst [vmem:[#allocation83_spill] sm:$0xff] %v6631_v41  ;;  %v6637_v44 = vpop.permute.xlu0 %1072 }
  0xbb   : > { %9237 = vst [vmem:[#allocation85_spill] sm:$0xff] %v6637_v44 }
  0xbc   : > { %1241 = vrot.lane.b32.xlu1 %v6602_v19, %s5829_s27  ;;  %v6643_v19 = vpop.permute.xlu1 %1056 }
  0xbd   : > { %1239 = vrot.lane.b32.xlu0 %v6615_v29, %s5829_s27  ;;  %v6647_v29 = vsel %vm9154_vm3, %v1176_v55, %v6634_v16 }
  0xbe   : > { %9238 = vst [vmem:[#allocation86_spill] sm:$0xff] %v6647_v29 }
  0xbf   : > { %v6649_v48 = vpop.permute.xlu0 %1076 }
  0xc0   : > { %1245 = vrot.lane.b32.xlu1 %v6618_v49, %s5829_s27  ;;  %9239 = vst [vmem:[#allocation87_spill] sm:$0xff] %v6649_v48  ;;  %v6655_v39 = vpop.permute.xlu1 %1082 }
  0xc1   : > { %1243 = vrot.lane.b32.xlu0 %v6631_v41, %s5829_s27  ;;  %9240 = vst [vmem:[#allocation88_spill] sm:$0xff] %v6655_v39 }
  0xc3   : > { %v6657_v49 = vpop.permute.xlu0 %1080 }
  0xc4   : > { %1249 = vrot.lane.b32.xlu1 %v6634_v16, %s5829_s27  ;;  %9241 = vst [vmem:[#allocation89_spill] sm:$0xff] %v6657_v49 }
  0xc5   : > { %1247 = vrot.lane.b32.xlu0 %v6647_v29, %s5829_s27 }
  0xc6   : > { %v6663_v55 = vpop.permute.xlu1 %1086 }
  0xc7   : > { %9242 = vst [vmem:[#allocation90_spill] sm:$0xff] %v6663_v55 }
  0xc8   : > { %1261 = vrot.lane.b32.xlu1 %v5995_v40, %s5830_s28 }
  0xc9   : > { %1259 = vrot.lane.b32.xlu0 %v6106_v12, %s5830_s28 }
  0xcb   : > { %v6665_v41 = vpop.permute.xlu0 %1084 }
  0xcc   : > { %9243 = vst [vmem:[#allocation91_spill] sm:$0xff] %v6665_v41  ;;  %1265 = vrot.lane.b32.xlu1 %v5999_v42, %s5830_s28 }
  0xcd   : > { %1263 = vrot.lane.b32.xlu0 %v6016_v56, %s5830_s28 }
  0xce   : > { %v6671_v16 = vpop.permute.xlu1 %1090 }
  0xcf   : > { %9244 = vst [vmem:[#allocation92_spill] sm:$0xff] %v6671_v16  ;;  %v6673_v29 = vpop.permute.xlu0 %1088 }
  0xd0   : > { %9245 = vst [vmem:[#allocation93_spill] sm:$0xff] %v6673_v29  ;;  %1269 = vrot.lane.b32.xlu1 %v6009_v51, %s5830_s28 }
  0xd1   : > { %1267 = vrot.lane.b32.xlu0 %v6034_v11, %s5830_s28 }
  0xd2   : > { %v6679_v39 = vpop.permute.xlu1 %1094 }
  0xd3   : > { %9246 = vst [vmem:[#allocation94_spill] sm:$0xff] %v6679_v39  ;;  %v6681_v55 = vpop.permute.xlu0 %1092 }
  0xd4   : > { %9247 = vst [vmem:[#allocation95_spill] sm:$0xff] %v6681_v55  ;;  %1273 = vrot.lane.b32.xlu1 %v6023_v60, %s5830_s28 }
  0xd5   : > { %1271 = vrot.lane.b32.xlu0 %v6056_v30, %s5830_s28 }
  0xd6   : > { %v6687_v41 = vpop.permute.xlu1 %1098 }
  0xd7   : > { %9248 = vst [vmem:[#allocation96_spill] sm:$0xff] %v6687_v41  ;;  %v6689_v16 = vpop.permute.xlu0 %1096 }
  0xd8   : > { %9249 = vst [vmem:[#allocation97_spill] sm:$0xff] %v6689_v16  ;;  %1277 = vrot.lane.b32.xlu1 %v6042_v17, %s5830_s28 }
  0xd9   : > { %1275 = vrot.lane.b32.xlu0 %v6083_v57, %s5830_s28 }
  0xda   : > { %v6695_v29 = vpop.permute.xlu1 %1102 }
  0xdb   : > { %9250 = vst [vmem:[#allocation98_spill] sm:$0xff] %v6695_v29  ;;  %v6697_v39 = vpop.permute.xlu0 %1100 }
  0xdc   : > { %9251 = vst [vmem:[#allocation99_spill] sm:$0xff] %v6697_v39  ;;  %1281 = vrot.lane.b32.xlu1 %v6077_v50, %s5830_s28 }
  0xdd   : > { %1279 = vrot.lane.b32.xlu0 %v6123_v31, %s5830_s28 }
  0xde   : > { %v6703_v55 = vpop.permute.xlu1 %1106 }
  0xdf   : > { %9252 = vst [vmem:[#allocation100_spill] sm:$0xff] %v6703_v55  ;;  %v6705_v41 = vpop.permute.xlu0 %1104 }
  0xe0   : > { %9253 = vst [vmem:[#allocation101_spill] sm:$0xff] %v6705_v41  ;;  %1285 = vrot.lane.b32.xlu1 %v6136_v47, %s5830_s28 }
  0xe1   : > { %1283 = vrot.lane.b32.xlu0 %v6140_v58, %s5830_s28 }
  0xe2   : > { %v6711_v16 = vpop.permute.xlu1 %1110 }
  0xe3   : > { %9254 = vst [vmem:[#allocation102_spill] sm:$0xff] %v6711_v16  ;;  %v6713_v29 = vpop.permute.xlu0 %1108 }
  0xe4   : > { %9255 = vst [vmem:[#allocation103_spill] sm:$0xff] %v6713_v29  ;;  %1289 = vrot.lane.b32.xlu1 %v6147_v1, %s5830_s28 }
  0xe5   : > { %1287 = vrot.lane.b32.xlu0 %v6167_v23, %s5830_s28 }
  0xe6   : > { %v6719_v39 = vpop.permute.xlu1 %1114 }
  0xe7   : > { %9256 = vst [vmem:[#allocation104_spill] sm:$0xff] %v6719_v39  ;;  %v6721_v55 = vpop.permute.xlu0 %1112 }
  0xe8   : > { %9257 = vst [vmem:[#allocation105_spill] sm:$0xff] %v6721_v55  ;;  %1293 = vrot.lane.b32.xlu1 %v6187_v52, %s5830_s28 }
  0xe9   : > { %1291 = vrot.lane.b32.xlu0 %v6201_v61, %s5830_s28 }
  0xea   : > { %v6727_v41 = vpop.permute.xlu1 %1118 }
  0xeb   : > { %9258 = vst [vmem:[#allocation106_spill] sm:$0xff] %v6727_v41  ;;  %v6729_v16 = vpop.permute.xlu0 %1116 }
  0xec   : > { %9259 = vst [vmem:[#allocation107_spill] sm:$0xff] %v6729_v16  ;;  %1297 = vrot.lane.b32.xlu1 %v6213_v13, %s5830_s28 }
  0xed   : > { %1295 = vrot.lane.b32.xlu0 %v6222_v25, %s5830_s28 }
  0xee   : > { %v6735_v29 = vpop.permute.xlu1 %1122 }
  0xef   : > { %9260 = vst [vmem:[#allocation108_spill] sm:$0xff] %v6735_v29  ;;  %v6737_v39 = vpop.permute.xlu0 %1120 }
  0xf0   : > { %9261 = vst [vmem:[#allocation109_spill] sm:$0xff] %v6737_v39  ;;  %1301 = vrot.lane.b32.xlu1 %v6242_v45, %s5830_s28 }
  0xf1   : > { %1299 = vrot.lane.b32.xlu0 %v6256_v0, %s5830_s28 }
  0xf2   : > { %v6743_v55 = vpop.permute.xlu1 %1181 }
  0xf3   : > { %v6745_v41 = vpop.permute.xlu0 %1179 }
  0xf4   : > { %1305 = vrot.lane.b32.xlu1 %v6268_v59, %s5830_s28 }
  0xf5   : > { %1303 = vrot.lane.b32.xlu0 %v6270_v63, %s5830_s28 }
  0xf6   : > { %v6751_v16 = vpop.permute.xlu1 %1185 }
  0xf7   : > { %v6753_v29 = vpop.permute.xlu0 %1183 }
  0xf8   : > { %1309 = vrot.lane.b32.xlu1 %v6278_v46, %s5830_s28  ;;  %v591_v46 = vld [vmem:[#allocation2 + $0xe0] sm:$0x3] }
  0xf9   : > { %1307 = vrot.lane.b32.xlu0 %v6295_v34, %s5830_s28  ;;  %v589_v34 = vld [vmem:[#allocation2 + $0xd8] sm:$0xf] }
  0xfa   : > { %v6759_v39 = vpop.permute.xlu1 %1189 }
  0xfb   : > { %9262 = vst [vmem:[#allocation110_spill] sm:$0xff] %v6759_v39  ;;  %v6761_v49 = vpop.permute.xlu0 %1187 }
  0xfc   : > { %1313 = vrot.lane.b32.xlu1 %v6311_v7, %s5830_s28  ;;  %v9264_v7 = vmov 0  }
  0xfd   : > { %1311 = vrot.lane.b32.xlu0 %v6309_v43, %s5830_s28  ;;  %v651_v43 = vmax.bf16 %v9264_v7, %v591_v46 }
  0xfe   : > { %v6767_v48 = vpop.permute.xlu1 %1193 }
  0xff   : > { %v6769_v44 = vpop.permute.xlu0 %1191 }
 0x100   : > { %1317 = vrot.lane.b32.xlu1 %v6330_v26, %s5830_s28  ;;  %v649_v26 = vmax.bf16 %v9264_v7, %v589_v34 }
 0x101   : > { %1315 = vrot.lane.b32.xlu0 %v6322_v28, %s5830_s28  ;;  %v650_v28 = vmax.bf16 %v9264_v7, %v590_v20 }
 0x102   : > { %v6775_v59 = vpop.permute.xlu1 %1197 }
 0x103   : > { %9263 = vst [vmem:[#allocation111_spill] sm:$0xff] %v6775_v59  ;;  %v6777_v63 = vpop.permute.xlu0 %1195  ;;  %v6792_v59 = vcombine.low %v651_v43, %v651_v43 }
 0x104   : > { %1321 = vrot.lane.b32.xlu1 %v6352_v24, %s5830_s28  ;;  %v6798_v24 = vcombine.low %v649_v26, %v650_v28  ;;  %v9272_v26 = vshrl.u32 %v5995_v40, 16 }
 0x105   : > { %1319 = vrot.lane.b32.xlu0 %v6339_v33, %s5830_s28  ;;  %9265 = vst [vmem:[#allocation112_spill] sm:$0xff] %v6792_v59 }
 0x106   : > { %v6784_v45 = vpop.permute.xlu1 %1201  ;;  %9267 = vst [vmem:[#allocation114_spill] sm:$0xff] %v6798_v24 }
 0x107   : > { %v6788_v39 = vpop.permute.xlu0 %1199 }
 0x108   : > { %1325 = vrot.lane.b32.xlu1 %v6372_v62, %s5830_s28 }
 0x109   : > { %1323 = vrot.lane.b32.xlu0 %v6359_v38, %s5830_s28 }
 0x10a   : > { %v6796_v46 = vpop.permute.xlu1 %1205 }
 0x10b   : > { %9266 = vst [vmem:[#allocation113_spill] sm:$0xff] %v6796_v46  ;;  %v6800_v33 = vpop.permute.xlu0 %1203 }
 0x10c   : > { %1329 = vrot.lane.b32.xlu1 %v6792_v59, %s5830_s28 }
 0x10d   : > { %1327 = vrot.lane.b32.xlu0 %v6798_v24, %s5830_s28 }
 0x10e   : > { %v6806_v34 = vpop.permute.xlu1 %1209 }
 0x10f   : > { %9268 = vst [vmem:[#allocation115_spill] sm:$0xff] %v6806_v34  ;;  %v6808_v20 = vpop.permute.xlu0 %1207 }
 0x110   : > { %9269 = vst [vmem:[#allocation116_spill] sm:$0xff] %v6808_v20  ;;  %1349 = vrot.lane.b32.xlu1 %v6065_v35, %s5831_s30 }
 0x111   : > { %1345 = vrot.lane.b32.xlu0 %v6162_v14, %s5831_s30 }
 0x112   : > { %v6814_v43 = vpop.permute.xlu1 %1213 }
 0x113   : > { %9270 = vst [vmem:[#allocation117_spill] sm:$0xff] %v6814_v43  ;;  %v6816_v28 = vpop.permute.xlu0 %1211 }
 0x114   : > { %9271 = vst [vmem:[#allocation118_spill] sm:$0xff] %v6816_v28  ;;  %1347 = vrot.lane.b32.xlu1 %v9272_v26, %s5831_s30 }
 0x115   : > { %1420 = vrot.lane.b32.xlu0 %v6429_v18, %s5832_s8 }
 0x116   : > { %v6823_v7 = vpop.permute.xlu1 %1217 }
 0x117   : > { %9273 = vst [vmem:[#allocation119_spill] sm:$0xff] %v6823_v7  ;;  %v6825_v62 = vpop.permute.xlu0 %1215 }
 0x118   : > { %9274 = vst [vmem:[#allocation120_spill] sm:$0xff] %v6825_v62  ;;  %1500 = vrot.lane.b32.xlu1 %v6016_v56, %s5833_s11  ;;  %v9295_v62 = vld [vmem:[#allocation10_spill] sm:$0xff] }
 0x119   : > { %1424 = vrot.lane.b32.xlu0 %v6441_v36, %s5832_s8 }
 0x11a   : > { %v6831_v14 = vpop.permute.xlu1 %1221 }
 0x11b   : > { %9275 = vst [vmem:[#allocation121_spill] sm:$0xff] %v6831_v14  ;;  %v6833_v59 = vpop.permute.xlu0 %1219 }
 0x11c   : > { %9276 = vst [vmem:[#allocation122_spill] sm:$0xff] %v6833_v59  ;;  %1422 = vrot.lane.b32.xlu1 %v6416_v2, %s5832_s8  ;;  %v5661_v2 = vld [vmem:[%s9013_s2 + $0x10] ss:$0 sps:$4 sm:$0x33]  }
 0x11d   : > { %1351 = vrot.lane.b32.xlu0 %v6012_v53, %s5831_s30  ;;  %5590 = vmatprep.subr.msk.bf16.mxu0 %vm2579_vm4, %v5661_v2 }
 0x11e   : > { %v6839_v18 = vpop.permute.xlu1 %1225 }
 0x11f   : > { %9277 = vst [vmem:[#allocation123_spill] sm:$0xff] %v6839_v18  ;;  %v6841_v26 = vpop.permute.xlu0 %1223  ;;  %v2581_v18 = vsel %vm2579_vm4, %v5661_v2, 0  ;;  %v5663_v2 = vld [vmem:[%s9013_s2] sm:$0xff]   ;;  %vm2871_vm4 = vsmask.f32 7938 }
 0x120   : > { %9278 = vst [vmem:[#allocation124_spill] sm:$0xff] %v6841_v26  ;;  %1586 = vrot.lane.b32.xlu1 %v6065_v35, %s5834_s12  ;;  %5511 = vmatpush3.bf16.msra.mxu0 %v2581_v18 }
 0x121   : > { %1504 = vrot.lane.b32.xlu0 %v6034_v11, %s5833_s11 }
 0x122   : > { %v6847_v14 = vpop.permute.xlu1 %1229 }
 0x123   : > { %9279 = vst [vmem:[#allocation125_spill] sm:$0xff] %v6847_v14  ;;  %v6852_v59 = vpop.permute.xlu0 %1227  ;;  %v5662_v14 = vld [vmem:[%s9013_s2 + $0x8] sm:$0xff]  }
 0x124   : > { %9280 = vst [vmem:[#allocation126_spill] sm:$0xff] %v6852_v59  ;;  %1502 = vrot.lane.b32.xlu1 %v5999_v42, %s5833_s11  ;;  %5512 = vmatprep.subr.bf16.mxu0 %v5662_v14 }
 0x125   : > { %1426 = vrot.lane.b32.xlu0 %v6432_v22, %s5832_s8  ;;  %5513 = vmatpush3.bf16.msra.mxu0 %v5662_v14 }
 0x126   : > { %v6858_v35 = vpop.permute.xlu1 %1233  ;;  %5514 = vmatprep.subr.bf16.mxu0 %v5663_v2 }
 0x127   : > { %9281 = vst [vmem:[#allocation127_spill] sm:$0xff] %v6858_v35  ;;  %v6863_v26 = vpop.permute.xlu0 %1231 }
 0x128   : > { %9282 = vst [vmem:[#allocation128_spill] sm:$0xff] %v6863_v26  ;;  %1661 = vrot.lane.b32.xlu1 %v6441_v36, %s5835_s18 }
 0x129   : > { %1590 = vrot.lane.b32.xlu0 %v6102_v8, %s5834_s12  ;;  %5515 = vmatpush3.bf16.msra.mxu0 %v5663_v2 }
 0x12a   : > { %v6869_v18 = vpop.permute.xlu1 %1237 }
 0x12b   : > { %9283 = vst [vmem:[#allocation129_spill] sm:$0xff] %v6869_v18  ;;  %v6874_v35 = vpop.permute.xlu0 %1235 }
 0x12c   : > { %9284 = vst [vmem:[#allocation130_spill] sm:$0xff] %v6874_v35  ;;  %1588 = vrot.lane.b32.xlu1 %v6012_v53, %s5834_s12 }
 0x12d   : > { %1506 = vrot.lane.b32.xlu0 %v6009_v51, %s5833_s11 }
 0x12e   : > { %v6880_v36 = vpop.permute.xlu1 %1241 }
 0x12f   : > { %9285 = vst [vmem:[#allocation131_spill] sm:$0xff] %v6880_v36  ;;  %v6882_v14 = vpop.permute.xlu0 %1239 }
 0x130   : > { %9286 = vst [vmem:[#allocation132_spill] sm:$0xff] %v6882_v14  ;;  %1592 = vrot.lane.b32.xlu1 %v6030_v4, %s5834_s12 }
 0x131   : > { %1665 = vrot.lane.b32.xlu0 %v6453_v3, %s5835_s18 }
 0x132   : > { %v6888_v18 = vpop.permute.xlu1 %1245 }
 0x133   : > { %9287 = vst [vmem:[#allocation133_spill] sm:$0xff] %v6888_v18  ;;  %v6890_v35 = vpop.permute.xlu0 %1243 }
 0x134   : > { %9288 = vst [vmem:[#allocation134_spill] sm:$0xff] %v6890_v35  ;;  %1667 = vrot.lane.b32.xlu1 %v6444_v27, %s5835_s18 }
 0x135   : > { %1663 = vrot.lane.b32.xlu0 %v6432_v22, %s5835_s18 }
 0x136   : > { %v6896_v53 = vpop.permute.xlu1 %1249 }
 0x137   : > { %9289 = vst [vmem:[#allocation135_spill] sm:$0xff] %v6896_v53  ;;  %v6898_v2 = vpop.permute.xlu0 %1247 }
 0x138   : > { %9290 = vst [vmem:[#allocation136_spill] sm:$0xff] %v6898_v2  ;;  %1357 = vrot.lane.b32.xlu1 %v6129_v37, %s5831_s30 }
 0x139   : > { %1353 = vrot.lane.b32.xlu0 %v6102_v8, %s5831_s30 }
 0x13a   : > { %v6904_v14 = vpop.permute.xlu1 %1261 }
 0x13b   : > { %v6906_v18 = vpop.permute.xlu0 %1259 }
 0x13c   : > { %1355 = vrot.lane.b32.xlu1 %v6030_v4, %s5831_s30 }
 0x13d   : > { %1428 = vrot.lane.b32.xlu0 %v6453_v3, %s5832_s8 }
 0x13e   : > { %v6912_v22 = vpop.permute.xlu1 %1265 }
 0x13f   : > { %v6914_v53 = vpop.permute.xlu0 %1263 }
 0x140   : > { %1508 = vrot.lane.b32.xlu1 %v6056_v30, %s5833_s11 }
 0x141   : > { %1432 = vrot.lane.b32.xlu0 %v6465_v21, %s5832_s8 }
 0x142   : > { %v6920_v8 = vpop.permute.xlu1 %1269 }
 0x143   : > { %v6922_v2 = vpop.permute.xlu0 %1267 }
 0x144   : > { %1430 = vrot.lane.b32.xlu1 %v6444_v27, %s5832_s8 }
 0x145   : > { %1359 = vrot.lane.b32.xlu0 %v6040_v15, %s5831_s30 }
 0x146   : > { %v6928_v4 = vpop.permute.xlu1 %1273 }
 0x147   : > { %v6930_v3 = vpop.permute.xlu0 %1271 }
 0x148   : > { %1594 = vrot.lane.b32.xlu1 %v6129_v37, %s5834_s12  ;;  %v9291_v37 = vld [vmem:[#allocation16_spill] sm:$0xff] }
 0x149   : > { %1512 = vrot.lane.b32.xlu0 %v6083_v57, %s5833_s11 }
 0x14a   : > { %v6936_v35 = vpop.permute.xlu1 %1277 }
 0x14b   : > { %v6938_v36 = vpop.permute.xlu0 %1275 }
 0x14c   : > { %1510 = vrot.lane.b32.xlu1 %v6023_v60, %s5833_s11 }
 0x14d   : > { %1434 = vrot.lane.b32.xlu0 %v6456_v54, %s5832_s8 }
 0x14e   : > { %v6944_v27 = vpop.permute.xlu1 %1281 }
 0x14f   : > { %v6946_v26 = vpop.permute.xlu0 %1279 }
 0x150   : > { %1669 = vrot.lane.b32.xlu1 %v6465_v21, %s5835_s18 }
 0x151   : > { %1598 = vrot.lane.b32.xlu0 %v9291_v37, %s5834_s12 }
 0x152   : > { %v6952_v59 = vpop.permute.xlu1 %1285 }
 0x153   : > { %9292 = vst [vmem:[#allocation16_spill] sm:$0xff] %v6952_v59  ;;  %v6954_v7 = vpop.permute.xlu0 %1283  ;;  %v9300_v59 = vld [vmem:[#allocation19_spill] sm:$0xff] }
 0x154   : > { %1596 = vrot.lane.b32.xlu1 %v6040_v15, %s5834_s12 }
 0x155   : > { %1514 = vrot.lane.b32.xlu0 %v6042_v17, %s5833_s11 }
 0x156   : > { %v6960_v43 = vpop.permute.xlu1 %1289 }
 0x157   : > { %9293 = vst [vmem:[#allocation137_spill] sm:$0xff] %v6960_v43  ;;  %v6962_v24 = vpop.permute.xlu0 %1287 }
 0x158   : > { %9294 = vst [vmem:[#allocation138_spill] sm:$0xff] %v6962_v24  ;;  %1600 = vrot.lane.b32.xlu1 %v9295_v62, %s5834_s12 }
 0x159   : > { %1673 = vrot.lane.b32.xlu0 %v6477_v5, %s5835_s18 }
 0x15a   : > { %v6968_v21 = vpop.permute.xlu1 %1293 }
 0x15b   : > { %9296 = vst [vmem:[#allocation10_spill] sm:$0xff] %v6968_v21  ;;  %v6970_v38 = vpop.permute.xlu0 %1291 }
 0x15c   : > { %9297 = vst [vmem:[#allocation139_spill] sm:$0xff] %v6970_v38  ;;  %1675 = vrot.lane.b32.xlu1 %v6468_v6, %s5835_s18 }
 0x15d   : > { %1671 = vrot.lane.b32.xlu0 %v6456_v54, %s5835_s18 }
 0x15e   : > { %v6976_v15 = vpop.permute.xlu1 %1297 }
 0x15f   : > { %9298 = vst [vmem:[#allocation140_spill] sm:$0xff] %v6976_v15  ;;  %v6978_v28 = vpop.permute.xlu0 %1295 }
 0x160   : > { %9299 = vst [vmem:[#allocation141_spill] sm:$0xff] %v6978_v28  ;;  %1365 = vrot.lane.b32.xlu1 %v9300_v59, %s5831_s30 }
 0x161   : > { %1361 = vrot.lane.b32.xlu0 %v9291_v37, %s5831_s30 }
 0x162   : > { %v6984_v43 = vpop.permute.xlu1 %1301 }
 0x163   : > { %9301 = vst [vmem:[#allocation19_spill] sm:$0xff] %v6984_v43  ;;  %v6986_v21 = vpop.permute.xlu0 %1299 }
 0x164   : > { %9302 = vst [vmem:[#allocation142_spill] sm:$0xff] %v6986_v21  ;;  %1363 = vrot.lane.b32.xlu1 %v9295_v62, %s5831_s30  ;;  %v9307_v62 = vld [vmem:[#allocation12_spill] sm:$0xff] }
 0x165   : > { %1436 = vrot.lane.b32.xlu0 %v6477_v5, %s5832_s8 }
 0x166   : > { %v6992_v54 = vpop.permute.xlu1 %1305 }
 0x167   : > { %9303 = vst [vmem:[#allocation143_spill] sm:$0xff] %v6992_v54  ;;  %v6994_v15 = vpop.permute.xlu0 %1303 }
 0x168   : > { %9304 = vst [vmem:[#allocation144_spill] sm:$0xff] %v6994_v15  ;;  %1516 = vrot.lane.b32.xlu1 %v6123_v31, %s5833_s11 }
 0x169   : > { %1440 = vrot.lane.b32.xlu0 %v6489_v10, %s5832_s8 }
 0x16a   : > { %v7000_v37 = vpop.permute.xlu1 %1309 }
 0x16b   : > { %9305 = vst [vmem:[#allocation145_spill] sm:$0xff] %v7000_v37  ;;  %v7002_v43 = vpop.permute.xlu0 %1307 }
 0x16c   : > { %9306 = vst [vmem:[#allocation146_spill] sm:$0xff] %v7002_v43  ;;  %1438 = vrot.lane.b32.xlu1 %v6468_v6, %s5832_s8 }
 0x16d   : > { %1367 = vrot.lane.b32.xlu0 %v9307_v62, %s5831_s30 }
 0x16e   : > { %v7008_v5 = vpop.permute.xlu1 %1313 }
 0x16f   : > { %9308 = vst [vmem:[#allocation12_spill] sm:$0xff] %v7008_v5  ;;  %v7010_v54 = vpop.permute.xlu0 %1311 }
 0x170   : > { %9309 = vst [vmem:[#allocation147_spill] sm:$0xff] %v7010_v54  ;;  %1602 = vrot.lane.b32.xlu1 %v9300_v59, %s5834_s12  ;;  %v9314_v59 = vld [vmem:[#allocation21_spill] sm:$0xff] }
 0x171   : > { %1520 = vrot.lane.b32.xlu0 %v6140_v58, %s5833_s11 }
 0x172   : > { %v7016_v15 = vpop.permute.xlu1 %1317 }
 0x173   : > { %9310 = vst [vmem:[#allocation148_spill] sm:$0xff] %v7016_v15  ;;  %v7018_v37 = vpop.permute.xlu0 %1315 }
 0x174   : > { %9311 = vst [vmem:[#allocation149_spill] sm:$0xff] %v7018_v37  ;;  %1518 = vrot.lane.b32.xlu1 %v6077_v50, %s5833_s11 }
 0x175   : > { %1442 = vrot.lane.b32.xlu0 %v6480_v9, %s5832_s8 }
 0x176   : > { %v7024_v6 = vpop.permute.xlu1 %1321 }
 0x177   : > { %9312 = vst [vmem:[#allocation150_spill] sm:$0xff] %v7024_v6  ;;  %v7026_v5 = vpop.permute.xlu0 %1319 }
 0x178   : > { %9313 = vst [vmem:[#allocation151_spill] sm:$0xff] %v7026_v5  ;;  %1677 = vrot.lane.b32.xlu1 %v6489_v10, %s5835_s18  ;;  %v9319_v5 = vld [vmem:[#allocation17_spill] sm:$0xff] }
 0x179   : > { %1606 = vrot.lane.b32.xlu0 %v9314_v59, %s5834_s12 }
 0x17a   : > { %v7032_v54 = vpop.permute.xlu1 %1325 }
 0x17b   : > { %9315 = vst [vmem:[#allocation21_spill] sm:$0xff] %v7032_v54  ;;  %v7034_v15 = vpop.permute.xlu0 %1323 }
 0x17c   : > { %9316 = vst [vmem:[#allocation152_spill] sm:$0xff] %v7034_v15  ;;  %1604 = vrot.lane.b32.xlu1 %v9307_v62, %s5834_s12  ;;  %v9320_v15 = vld [vmem:[#allocation54_spill] sm:$0xff] }
 0x17d   : > { %1522 = vrot.lane.b32.xlu0 %v6136_v47, %s5833_s11 }
 0x17e   : > { %v7040_v37 = vpop.permute.xlu1 %1329 }
 0x17f   : > { %9317 = vst [vmem:[#allocation153_spill] sm:$0xff] %v7040_v37  ;;  %v7042_v6 = vpop.permute.xlu0 %1327  ;;  %v9321_v37 = vld [vmem:[#allocation23_spill] sm:$0xff] }
 0x180   : > { %9318 = vst [vmem:[#allocation154_spill] sm:$0xff] %v7042_v6  ;;  %1608 = vrot.lane.b32.xlu1 %v9319_v5, %s5834_s12 }
 0x181   : > { %1681 = vrot.lane.b32.xlu0 %v6501_v32, %s5835_s18 }
 0x182   : > { %v1350_v10 = vpop.permute.xlu1 %1349 }
 0x183   : > { %v1346_v54 = vpop.permute.xlu0 %1345 }
 0x184   : > { %1683 = vrot.lane.b32.xlu1 %v9320_v15, %s5835_s18 }
 0x185   : > { %1679 = vrot.lane.b32.xlu0 %v6480_v9, %s5835_s18  ;;  %v9322_v9 = vld [vmem:[#allocation56_spill] sm:$0xff] }
 0x186   : > { %v7052_v62 = vpop.permute.xlu1 %1347 }
 0x187   : > { %v1421_v43 = vpop.permute.xlu0 %1420 }
 0x188   : > { %1373 = vrot.lane.b32.xlu1 %v9321_v37, %s5831_s30 }
 0x189   : > { %1369 = vrot.lane.b32.xlu0 %v9314_v59, %s5831_s30  ;;  %v9323_v59 = vld [vmem:[#allocation20_spill] sm:$0xff] }
 0x18a   : > { %v1501_v6 = vpop.permute.xlu1 %1500 }
 0x18b   : > { %v1425_v21 = vpop.permute.xlu0 %1424 }
 0x18c   : > { %1371 = vrot.lane.b32.xlu1 %v9319_v5, %s5831_s30 }
 0x18d   : > { %1444 = vrot.lane.b32.xlu0 %v6501_v32, %s5832_s8  ;;  %v9324_v32 = vld [vmem:[#allocation69_spill] sm:$0xff] }
 0x18e   : > { %v1423_v28 = vpop.permute.xlu1 %1422 }
 0x18f   : > { %v1352_v38 = vpop.permute.xlu0 %1351 }
 0x190   : > { %1524 = vrot.lane.b32.xlu1 %v6167_v23, %s5833_s11  ;;  %v9325_v23 = vld [vmem:[#allocation9_spill] sm:$0xff] }
 0x191   : > { %1448 = vrot.lane.b32.xlu0 %v9322_v9, %s5832_s8  ;;  %v1735_v24 = vsel %vm1733_vm6, %v9325_v23, %v9324_v32  ;;  %v1739_v23 = vsel %vm1733_vm6, %v6106_v12, %v6643_v19 }
 0x192   : > { %v1587_v46 = vpop.permute.xlu1 %1586  ;;  %v1808_v47 = vsel %vm1806_vm5, %v1735_v24, %v6745_v41  ;;  %v9326_v41 = vld [vmem:[#allocation55_spill] sm:$0xff] }
 0x193   : > { %v1505_v34 = vpop.permute.xlu0 %1504  ;;  %v1881_v20 = vsel %vm1879_vm7, %v1808_v47, %v6906_v18  ;;  %v1812_v47 = vsel %vm1806_vm5, %v1739_v23, %v6753_v29  ;;  %v9329_v23 = vld [vmem:[#allocation8_spill] sm:$0xff] }
 0x194   : > { %1446 = vrot.lane.b32.xlu1 %v9320_v15, %s5832_s8  ;;  %v1954_v58 = vsel %vm1952_vm8, %v1881_v20, %v1346_v54  ;;  %v1885_v54 = vsel %vm1879_vm7, %v1812_v47, %v6914_v53  ;;  %v9330_v53 = vld [vmem:[#allocation28_spill] sm:$0xff] }
 0x195   : > { %1375 = vrot.lane.b32.xlu0 %v9323_v59, %s5831_s30  ;;  %v2027_v32 = vsel %vm2025_vm9, %v1954_v58, %v1421_v43  ;;  %v1958_v29 = vsel %vm1952_vm8, %v1885_v54, %v1350_v10 }
 0x196   : > { %v1503_v5 = vpop.permute.xlu1 %1502  ;;  %v2100_v18 = vsel %vm2098_vm10, %v2027_v32, %v1501_v6  ;;  %v9328_v6 = vld [vmem:[#allocation63_spill] sm:$0xff] }
 0x197   : > { %v1427_v50 = vpop.permute.xlu0 %1426  ;;  %v2173_v12 = vsel %vm9157_vm11, %v2100_v18, %v1587_v46  ;;  %v2031_v46 = vsel %vm2025_vm9, %v1958_v29, %v1425_v21 }
 0x198   : > { %1610 = vrot.lane.b32.xlu1 %v9321_v37, %s5834_s12 }
 0x199   : > { %1528 = vrot.lane.b32.xlu0 %v6201_v61, %s5833_s11 }
 0x19a   : > { %v1662_v15 = vpop.permute.xlu1 %1661 }
 0x19b   : > { %v1591_v37 = vpop.permute.xlu0 %1590  ;;  %v2246_v43 = vsel %vm9156_vm12, %v2173_v12, %v1662_v15  ;;  %v2104_v15 = vsel %vm2098_vm10, %v2031_v46, %v1505_v34  ;;  %v9332_v46 = vld [vmem:[#allocation58_spill] sm:$0xff] }
 0x19c   : > { %1526 = vrot.lane.b32.xlu1 %v6147_v1, %s5833_s11  ;;  %v9327_v1 = vld [vmem:[#allocation62_spill] sm:$0xff]  ;;  %v2319_v18 = vshll.u32 %v2246_v43, 16 }
 0x19d   : > { %1450 = vrot.lane.b32.xlu0 %v9326_v41, %s5832_s8  ;;  %v1741_v20 = vsel %vm1733_vm6, %v5995_v40, %v9327_v1  ;;  %v1737_v40 = vsel %vm1733_vm6, %v9329_v23, %v9328_v6  ;;  %v9331_v6 = vld [vmem:[#allocation24_spill] sm:$0xff] }
 0x19e   : > { %v1589_v24 = vpop.permute.xlu1 %1588  ;;  %v1814_v19 = vsel %vm1806_vm5, %v1741_v20, %v6751_v16  ;;  %v1810_v16 = vsel %vm1806_vm5, %v1737_v40, %v6743_v55  ;;  %v2321_v12 = vrot.slane %v2319_v18, 1  ;;  %v2317_v40 = vshrl.u32 %v2246_v43, 16 }
 0x19f   : > { %v1507_v58 = vpop.permute.xlu0 %1506  ;;  %v1887_v1 = vsel %vm1879_vm7, %v1814_v19, %v6912_v22  ;;  %v1883_v32 = vsel %vm1879_vm7, %v1810_v16, %v6904_v14  ;;  %v2177_v22 = vsel %vm9157_vm11, %v2104_v15, %v1591_v37 }
 0x1a0   : > { %1685 = vrot.lane.b32.xlu1 %v9322_v9, %s5835_s18  ;;  %v1960_v10 = vsel %vm1952_vm8, %v1887_v1, %v1352_v38  ;;  %v1956_v20 = vsel %vm1952_vm8, %v1883_v32, %v7052_v62  ;;  %v9333_v32 = vld [vmem:[#allocation57_spill] sm:$0xff] }
 0x1a1   : > { %1614 = vrot.lane.b32.xlu0 %v9330_v53, %s5834_s12  ;;  %v2033_v47 = vsel %vm2025_vm9, %v1960_v10, %v1427_v50  ;;  %v2029_v34 = vsel %vm2025_vm9, %v1956_v20, %v1423_v28  ;;  %v2322_v10 = vor.u32 %v2321_v12, %v2317_v40  ;;  %v9339_v40 = vld [vmem:[#allocation59_spill] sm:$0xff] }
 0x1a2   : > { %v1593_v9 = vpop.permute.xlu1 %1592  ;;  %v2106_v55 = vsel %vm2098_vm10, %v2033_v47, %v1507_v58  ;;  %v2102_v37 = vsel %vm2098_vm10, %v2029_v34, %v1503_v5  ;;  %v9335_v34 = vld [vmem:[#allocation60_spill] sm:$0xff] }
 0x1a3   : > { %v1666_v21 = vpop.permute.xlu0 %1665  ;;  %v2179_v14 = vsel %vm9157_vm11, %v2106_v55, %v1593_v9  ;;  %v2175_v62 = vsel %vm9157_vm11, %v2102_v37, %v1589_v24 }
 0x1a4   : > { %1612 = vrot.lane.b32.xlu1 %v9323_v59, %s5834_s12  ;;  %v2250_v38 = vsel %vm9156_vm12, %v2177_v22, %v1666_v21  ;;  %v9334_v21 = vld [vmem:[#allocation32_spill] sm:$0xff] }
 0x1a5   : > { %v2329_v54 = vshll.u32 %v2250_v38, 16  ;;  %1530 = vrot.lane.b32.xlu0 %v6187_v52, %s5833_s11  ;;  %v2327_v28 = vshrl.u32 %v2250_v38, 16 }
 0x1a6   : > { %v1668_v50 = vpop.permute.xlu1 %1667 }
 0x1a7   : > { %v2252_v59 = vsel %vm9156_vm12, %v2179_v14, %v1668_v50  ;;  %v2331_v19 = vrot.slane %v2329_v54, 1  ;;  %v1664_v29 = vpop.permute.xlu0 %1663 }
 0x1a8   : > { %v2333_v58 = vshll.u32 %v2252_v59, 16  ;;  %1616 = vrot.lane.b32.xlu1 %v9331_v6, %s5834_s12  ;;  %v2248_v23 = vsel %vm9156_vm12, %v2175_v62, %v1664_v29  ;;  %v9337_v59 = vld [vmem:[#allocation73_spill] sm:$0xff] }
 0x1a9   : > { %v2323_v1 = vshll.u32 %v2248_v23, 16  ;;  %1689 = vrot.lane.b32.xlu0 %v9332_v46, %s5835_s18  ;;  %v2332_v9 = vor.u32 %v2331_v19, %v2327_v28  ;;  %v1743_v12 = vsel %vm1733_vm6, %v6016_v56, %v9337_v59  ;;  %v9338_v28 = vld [vmem:[#allocation77_spill] sm:$0xff] }
 0x1aa   : > { %v1358_v5 = vpop.permute.xlu1 %1357  ;;  %v2335_v16 = vrot.slane %v2333_v58, 1  ;;  %v1816_v19 = vsel %vm1806_vm5, %v1743_v12, %v6761_v49  ;;  %v1747_v56 = vsel %vm1733_vm6, %v6034_v11, %v9338_v28 }
 0x1ab   : > { %v2325_v15 = vrot.slane %v2323_v1, 1  ;;  %v1354_v24 = vpop.permute.xlu0 %1353  ;;  %v1889_v58 = vsel %vm1879_vm7, %v1816_v19, %v6922_v2  ;;  %v1820_v49 = vsel %vm1806_vm5, %v1747_v56, %v6769_v44 }
 0x1ac   : > { %1691 = vrot.lane.b32.xlu1 %v9333_v32, %s5835_s18  ;;  %v2336_v18 = vsel %vm799_vm2, %v2332_v9, %v2335_v16  ;;  %v1893_v16 = vsel %vm1879_vm7, %v1820_v49, %v6930_v3 }
 0x1ad   : > { %1687 = vrot.lane.b32.xlu0 %v9326_v41, %s5835_s18  ;;  %v2326_v43 = vsel %vm799_vm2, %v2322_v10, %v2325_v15  ;;  %v1966_v44 = vsel %vm1952_vm8, %v1893_v16, %v1358_v5 }
 0x1ae   : > { %v1356_v47 = vpop.permute.xlu1 %1355  ;;  %5516 = vmatprep.mubr.msk.bf16.mxu0 %vm9155_vm13, %v2326_v43 }
 0x1af   : > { %5517 = vmatmul.mubr.msk.bf16.vlgmr.msra.gmra.mxu0 %vm9155_vm13, %v2336_v18  ;;  %v1429_v22 = vpop.permute.xlu0 %1428  ;;  %v9342_v18 = vld [vmem:[#allocation36_spill] sm:$0xff] }
 0x1b0   : > { %1381 = vrot.lane.b32.xlu1 %v9334_v21, %s5831_s30 }
 0x1b1   : > { %1377 = vrot.lane.b32.xlu0 %v9330_v53, %s5831_s30  ;;  %v9336_v53 = vld [vmem:[#allocation25_spill] sm:$0xff] }
 0x1b2   : > { %v1509_v20 = vpop.permute.xlu1 %1508 }
 0x1b3   : > { %v1433_v55 = vpop.permute.xlu0 %1432 }
 0x1b4   : > { %1379 = vrot.lane.b32.xlu1 %v9331_v6, %s5831_s30  ;;  %v1962_v6 = vsel %vm1952_vm8, %v1889_v58, %v1354_v24  ;;  %v2039_v43 = vsel %vm2025_vm9, %v1966_v44, %v1433_v55  ;;  %v9347_v44 = vld [vmem:[#allocation61_spill] sm:$0xff] }
 0x1b5   : > { %1452 = vrot.lane.b32.xlu0 %v9332_v46, %s5832_s8  ;;  %v2035_v23 = vsel %vm2025_vm9, %v1962_v6, %v1429_v22  ;;  %v9340_v46 = vld [vmem:[#allocation70_spill] sm:$0xff] }
 0x1b6   : > { %v1431_v41 = vpop.permute.xlu1 %1430  ;;  %v2108_v2 = vsel %vm2098_vm10, %v2035_v23, %v1509_v20  ;;  %v1749_v9 = vsel %vm1733_vm6, %v6009_v51, %v9340_v46 }
 0x1b7   : > { %v1360_v38 = vpop.permute.xlu0 %1359  ;;  %v1822_v15 = vsel %vm1806_vm5, %v1749_v9, %v6767_v48 }
 0x1b8   : > { %1532 = vrot.lane.b32.xlu1 %v6222_v25, %s5833_s11  ;;  %v1895_v3 = vsel %vm1879_vm7, %v1822_v15, %v6928_v4 }
 0x1b9   : > { %1456 = vrot.lane.b32.xlu0 %v9335_v34, %s5832_s8  ;;  %v1968_v5 = vsel %vm1952_vm8, %v1895_v3, %v1360_v38 }
 0x1ba   : > { %v1595_v14 = vpop.permute.xlu1 %1594 }
 0x1bb   : > { %v1513_v54 = vpop.permute.xlu0 %1512  ;;  %v2181_v11 = vsel %vm9157_vm11, %v2108_v2, %v1595_v14 }
 0x1bc   : > { %1454 = vrot.lane.b32.xlu1 %v9333_v32, %s5832_s8  ;;  %v9341_v32 = vld [vmem:[#allocation66_spill] sm:$0xff]  ;;  %v2112_v20 = vsel %vm2098_vm10, %v2039_v43, %v1513_v54 }
 0x1bd   : > { %1383 = vrot.lane.b32.xlu0 %v9336_v53, %s5831_s30  ;;  %v1745_v51 = vsel %vm1733_vm6, %v5999_v42, %v9341_v32  ;;  %v470_v32 = vld [vmem:[%s6197_s20 + $0x24] sm:$0xf] }
 0x1be   : > { %v1511_v50 = vpop.permute.xlu1 %1510  ;;  %483 = vst.msk [vmem:[#allocation2 + $0xe4] sm:$0xf] %vm411_vm1, %v470_v32 }
 0x1bf   : > { %v1435_v37 = vpop.permute.xlu0 %1434 }
 0x1c0   : > { %1618 = vrot.lane.b32.xlu1 %v9334_v21, %s5834_s12  ;;  %v9343_v21 = vld [vmem:[#allocation110_spill] sm:$0xff]  ;;  %v2041_v42 = vsel %vm2025_vm9, %v1968_v5, %v1435_v37 }
 0x1c1   : > { %1536 = vrot.lane.b32.xlu0 %v6256_v0, %s5833_s11  ;;  %v1818_v48 = vsel %vm1806_vm5, %v1745_v51, %v9343_v21  ;;  %v9344_v37 = vld [vmem:[#allocation22_spill] sm:$0xff]  ;;  %v471_v51 = vld [vmem:[%s6197_s20 + $0x28] sm:$0xf]  ;;  %v9348_v21 = vld [vmem:[#allocation39_spill] sm:$0xff] }
 0x1c2   : > { %v1670_v62 = vpop.permute.xlu1 %1669  ;;  %484 = vst.msk [vmem:[#allocation2 + $0xe8] sm:$0xf] %vm411_vm1, %v471_v51 }
 0x1c3   : > { %v1599_v29 = vpop.permute.xlu0 %1598  ;;  %v2254_v24 = vsel %vm9156_vm12, %v2181_v11, %v1670_v62 }
 0x1c4   : > { %1534 = vrot.lane.b32.xlu1 %v6213_v13, %s5833_s11  ;;  %v2339_v14 = vshll.u32 %v2254_v24, 16  ;;  %v2185_v4 = vsel %vm9157_vm11, %v2112_v20, %v1599_v29  ;;  %v2337_v2 = vshrl.u32 %v2254_v24, 16 }
 0x1c5   : > { %1458 = vrot.lane.b32.xlu0 %v9339_v40, %s5832_s8 }
 0x1c6   : > { %v1597_v1 = vpop.permute.xlu1 %1596 }
 0x1c7   : > { %v1515_v10 = vpop.permute.xlu0 %1514 }
 0x1c8   : > { %1693 = vrot.lane.b32.xlu1 %v9335_v34, %s5835_s18  ;;  %v1891_v34 = vsel %vm1879_vm7, %v1818_v48, %v6920_v8  ;;  %v2114_v12 = vsel %vm2098_vm10, %v2041_v42, %v1515_v10  ;;  %v472_v48 = vld [vmem:[%s6197_s20 + $0x2c] sm:$0x3]  ;;  %v9349_v42 = vld [vmem:[#allocation27_spill] sm:$0xff]  ;;  %s5753_s20 = sshll.u32 %s5837_s13, 4  ;;  %s5754_s20 = int_to_ptr.vmem [resolvable:$false] %s5753_s20 }
 0x1c9   : > { %1622 = vrot.lane.b32.xlu0 %v9342_v18, %s5834_s12  ;;  %v1964_v59 = vsel %vm1952_vm8, %v1891_v34, %v1356_v47  ;;  %485 = vst.msk [vmem:[#allocation2 + $0xec] sm:$0x3] %vm414_vm0, %v472_v48  ;;  %vm7314_vm0 = vmand %vm2814_vm14, %vm9153_vm15 }
 0x1ca   : > { %v1601_v22 = vpop.permute.xlu1 %1600  ;;  %v2037_v54 = vsel %vm2025_vm9, %v1964_v59, %v1431_v41  ;;  %v9345_v41 = vld [vmem:[#allocation30_spill] sm:$0xff]  ;;  %vm7338_vm15 = vmand %vm2814_vm14, %vm2871_vm4 }
 0x1cb   : > { %v1674_v55 = vpop.permute.xlu0 %1673  ;;  %v2187_v62 = vsel %vm9157_vm11, %v2114_v12, %v1601_v22  ;;  %v2110_v58 = vsel %vm2098_vm10, %v2037_v54, %v1511_v50  ;;  %v9346_v50 = vld [vmem:[#allocation64_spill] sm:$0xff]  ;;  %vm7707_vm14 = vmand %vm411_vm1, %vm2871_vm4  ;;  %vm9437_vm4 = vsmask.f32 256 }
 0x1cc   : > { %1620 = vrot.lane.b32.xlu1 %v9336_v53, %s5834_s12  ;;  %v2258_v38 = vsel %vm9156_vm12, %v2185_v4, %v1674_v55  ;;  %v2341_v53 = vrot.slane %v2339_v14, 1  ;;  %v2183_v47 = vsel %vm9157_vm11, %v2110_v58, %v1597_v1  ;;  %v9350_v14 = vld [vmem:[#allocation67_spill] sm:$0xff] }
 0x1cd   : > { %v2349_v8 = vshll.u32 %v2258_v38, 16  ;;  %1538 = vrot.lane.b32.xlu0 %v9344_v37, %s5833_s11  ;;  %v2347_v23 = vshrl.u32 %v2258_v38, 16  ;;  %v9352_v38 = vld [vmem:[#allocation81_spill] sm:$0xff] }
 0x1ce   : > { %v1676_v19 = vpop.permute.xlu1 %1675  ;;  %v2342_v1 = vor.u32 %v2341_v53, %v2337_v2  ;;  %v1751_v54 = vsel %vm1733_vm6, %v6056_v30, %v9352_v38 }
 0x1cf   : > { %v2260_v29 = vsel %vm9156_vm12, %v2187_v62, %v1676_v19  ;;  %v2351_v6 = vrot.slane %v2349_v8, 1  ;;  %v1672_v56 = vpop.permute.xlu0 %1671  ;;  %v1824_v62 = vsel %vm1806_vm5, %v1751_v54, %v6777_v63  ;;  %v9353_v8 = vld [vmem:[#allocation31_spill] sm:$0xff] }
 0x1d0   : > { %v2353_v28 = vshll.u32 %v2260_v29, 16  ;;  %1624 = vrot.lane.b32.xlu1 %v9345_v41, %s5834_s12  ;;  %v2256_v49 = vsel %vm9156_vm12, %v2183_v47, %v1672_v56  ;;  %v1897_v58 = vsel %vm1879_vm7, %v1824_v62, %v6938_v36  ;;  %v9354_v47 = vld [vmem:[#allocation26_spill] sm:$0xff]  ;;  %v9356_v56 = vld [vmem:[#allocation65_spill] sm:$0xff] }
 0x1d1   : > { %v2343_v46 = vshll.u32 %v2256_v49, 16  ;;  %1697 = vrot.lane.b32.xlu0 %v9346_v50, %s5835_s18  ;;  %v2352_v16 = vor.u32 %v2351_v6, %v2347_v23  ;;  %v9357_v49 = vld [vmem:[#allocation74_spill] sm:$0xff] }
 0x1d2   : > { %v1366_v9 = vpop.permute.xlu1 %1365  ;;  %v2355_v11 = vrot.slane %v2353_v28, 1  ;;  %v9355_v28 = vld [vmem:[#allocation85_spill] sm:$0xff]  ;;  %v1753_v2 = vsel %vm1733_vm6, %v6023_v60, %v9357_v49  ;;  %v9367_v49 = vld [vmem:[#allocation71_spill] sm:$0xff] }
 0x1d3   : > { %v2345_v10 = vrot.slane %v2343_v46, 1  ;;  %v1362_v15 = vpop.permute.xlu0 %1361  ;;  %v1755_v30 = vsel %vm1733_vm6, %v6083_v57, %v9355_v28  ;;  %v9358_v46 = vld [vmem:[#allocation78_spill] sm:$0xff]  ;;  %v9366_v28 = vld [vmem:[#allocation41_spill] sm:$0xff] }
 0x1d4   : > { %1699 = vrot.lane.b32.xlu1 %v9347_v44, %s5835_s18  ;;  %v2356_v43 = vsel %vm799_vm2, %v2352_v16, %v2355_v11  ;;  %v1970_v29 = vsel %vm1952_vm8, %v1897_v58, %v1362_v15  ;;  %v1828_v36 = vsel %vm1806_vm5, %v1755_v30, %v6788_v39  ;;  %v9359_v39 = vld [vmem:[#allocation111_spill] sm:$0xff] }
 0x1d5   : > { %1695 = vrot.lane.b32.xlu0 %v9339_v40, %s5835_s18  ;;  %v2346_v3 = vsel %vm799_vm2, %v2342_v1, %v2345_v10  ;;  %v1901_v57 = vsel %vm1879_vm7, %v1828_v36, %v6946_v26  ;;  %v1826_v1 = vsel %vm1806_vm5, %v1753_v2, %v9359_v39  ;;  %v9360_v26 = vld [vmem:[#allocation43_spill] sm:$0xff] }
 0x1d6   : > { %v7237_v24 = vpop.permute.xlu1 %1363  ;;  %5520 = vmatprep.mubr.msk.bf16.mxu0 %vm9155_vm13, %v2346_v3  ;;  %v1974_v60 = vsel %vm1952_vm8, %v1901_v57, %v1366_v9  ;;  %v1899_v32 = vsel %vm1879_vm7, %v1826_v1, %v6936_v35  ;;  %v2820_v9 = vld [vmem:[#allocation3 + $0xc] sm:$0x1] }
 0x1d7   : > { %5521 = vmatmul.mubr.msk.bf16.gmra.mxu0 %vm9155_vm13, %v2356_v43  ;;  %v1437_v22 = vpop.permute.xlu0 %1436  ;;  %v2821_v35 = vsel %vm7314_vm0, 0, %v2820_v9  ;;  %v1972_v48 = vsel %vm1952_vm8, %v1899_v32, %v7237_v24  ;;  %v9371_v9 = vld [vmem:[#allocation75_spill] sm:$0xff] }
 0x1d8   : > { %1389 = vrot.lane.b32.xlu1 %v9348_v21, %s5831_s30  ;;  %v2043_v6 = vsel %vm2025_vm9, %v1970_v29, %v1437_v22  ;;  %2822 = vst [vmem:[#allocation3 + $0xc] sm:$0x1] %v2821_v35 }
 0x1d9   : > { %1385 = vrot.lane.b32.xlu0 %v9342_v18, %s5831_s30  ;;  %v9351_v18 = vld [vmem:[#allocation33_spill] sm:$0xff] }
 0x1da   : > { %v1517_v40 = vpop.permute.xlu1 %1516 }
 0x1db   : > { %v1441_v5 = vpop.permute.xlu0 %1440  ;;  %v2116_v63 = vsel %vm2098_vm10, %v2043_v6, %v1517_v40 }
 0x1dc   : > { %1387 = vrot.lane.b32.xlu1 %v9345_v41, %s5831_s30  ;;  %v2047_v15 = vsel %vm2025_vm9, %v1974_v60, %v1441_v5 }
 0x1dd   : > { %1460 = vrot.lane.b32.xlu0 %v9346_v50, %s5832_s8  ;;  %v1757_v50 = vsel %vm1733_vm6, %v6042_v17, %v9358_v46 }
 0x1de   : > { %v1439_v20 = vpop.permute.xlu1 %1438  ;;  %v1830_v10 = vsel %vm1806_vm5, %v1757_v50, %v6784_v45 }
 0x1df   : > { %v1368_v34 = vpop.permute.xlu0 %1367  ;;  %v1903_v17 = vsel %vm1879_vm7, %v1830_v10, %v6944_v27  ;;  %v9368_v10 = vld [vmem:[#allocation68_spill] sm:$0xff] }
 0x1e0   : > { %1540 = vrot.lane.b32.xlu1 %v9349_v42, %s5833_s11  ;;  %v1976_v51 = vsel %vm1952_vm8, %v1903_v17, %v1368_v34  ;;  %v2817_v34 = vld [vmem:[#allocation3] sm:$0x1] }
 0x1e1   : > { %1464 = vrot.lane.b32.xlu0 %v9350_v14, %s5832_s8  ;;  %v2818_v38 = vsel %vm7314_vm0, 0, %v2817_v34 }
 0x1e2   : > { %v1603_v4 = vpop.permute.xlu1 %1602  ;;  %2819 = vst [vmem:[#allocation3] sm:$0x1] %v2818_v38 }
 0x1e3   : > { %v1521_v55 = vpop.permute.xlu0 %1520  ;;  %v2189_v23 = vsel %vm9157_vm11, %v2116_v63, %v1603_v4 }
 0x1e4   : > { %1462 = vrot.lane.b32.xlu1 %v9347_v44, %s5832_s8  ;;  %v2120_v45 = vsel %vm2098_vm10, %v2047_v15, %v1521_v55 }
 0x1e5   : > { %1391 = vrot.lane.b32.xlu0 %v9351_v18, %s5831_s30 }
 0x1e6   : > { %v1519_v59 = vpop.permute.xlu1 %1518 }
 0x1e7   : > { %v1443_v12 = vpop.permute.xlu0 %1442 }
 0x1e8   : > { %1626 = vrot.lane.b32.xlu1 %v9348_v21, %s5834_s12  ;;  %v2049_v43 = vsel %vm2025_vm9, %v1976_v51, %v1443_v12 }
 0x1e9   : > { %1544 = vrot.lane.b32.xlu0 %v9353_v8, %s5833_s11 }
 0x1ea   : > { %v1678_v19 = vpop.permute.xlu1 %1677 }
 0x1eb   : > { %v1607_v53 = vpop.permute.xlu0 %1606  ;;  %v2262_v16 = vsel %vm9156_vm12, %v2189_v23, %v1678_v19  ;;  %v2876_v19 = vld [vmem:[#allocation3 + $0x14] sm:$0x1] }
 0x1ec   : > { %1542 = vrot.lane.b32.xlu1 %v9354_v47, %s5833_s11  ;;  %v2359_v3 = vshll.u32 %v2262_v16, 16  ;;  %v2193_v22 = vsel %vm9157_vm11, %v2120_v45, %v1607_v53  ;;  %v2357_v36 = vshrl.u32 %v2262_v16, 16 }
 0x1ed   : > { %1466 = vrot.lane.b32.xlu0 %v9356_v56, %s5832_s8 }
 0x1ee   : > { %v1605_v41 = vpop.permute.xlu1 %1604  ;;  %v2361_v54 = vrot.slane %v2359_v3, 1  ;;  %v9370_v3 = vld [vmem:[#allocation34_spill] sm:$0xff] }
 0x1ef   : > { %v1523_v11 = vpop.permute.xlu0 %1522 }
 0x1f0   : > { %1701 = vrot.lane.b32.xlu1 %v9350_v14, %s5835_s18  ;;  %v2122_v40 = vsel %vm2098_vm10, %v2049_v43, %v1523_v11  ;;  %v2045_v14 = vsel %vm2025_vm9, %v1972_v48, %v1439_v20  ;;  %v2362_v11 = vor.u32 %v2361_v54, %v2357_v36  ;;  %v9373_v48 = vld [vmem:[#allocation87_spill] sm:$0xff]  ;;  %v9377_v54 = vld [vmem:[#allocation14_spill] sm:$0xff] }
 0x1f1   : > { %1630 = vrot.lane.b32.xlu0 %v9360_v26, %s5834_s12  ;;  %v2118_v24 = vsel %vm2098_vm10, %v2045_v14, %v1519_v59  ;;  %v2877_v59 = vsel %vm7338_vm15, 0, %v2876_v19  ;;  %v9378_v19 = vld [vmem:[#allocation72_spill] sm:$0xff] }
 0x1f2   : > { %v1609_v44 = vpop.permute.xlu1 %1608  ;;  %v2191_v58 = vsel %vm9157_vm11, %v2118_v24, %v1605_v41  ;;  %2878 = vst [vmem:[#allocation3 + $0x14] sm:$0x1] %v2877_v59  ;;  %v2873_v41 = vld [vmem:[#allocation3 + $0x8] sm:$0x1]  ;;  %v9376_v24 = vld [vmem:[#allocation89_spill] sm:$0xff] }
 0x1f3   : > { %v1682_v21 = vpop.permute.xlu0 %1681  ;;  %v2195_v4 = vsel %vm9157_vm11, %v2122_v40, %v1609_v44  ;;  %v2874_v57 = vsel %vm7338_vm15, 0, %v2873_v41  ;;  %v9369_v44 = vld [vmem:[#allocation46_spill] sm:$0xff]  ;;  %v1759_v40 = vsel %vm1733_vm6, %v6123_v31, %v9373_v48  ;;  %v1763_v31 = vsel %vm1733_vm6, %v9377_v54, %v9376_v24  ;;  %v2826_v48 = vld [vmem:[#allocation3 + $0x24] sm:$0x1] }
 0x1f4   : > { %1628 = vrot.lane.b32.xlu1 %v9351_v18, %s5834_s12  ;;  %v2266_v5 = vsel %vm9156_vm12, %v2193_v22, %v1682_v21  ;;  %v9363_v18 = vld [vmem:[#allocation29_spill] sm:$0xff]  ;;  %2875 = vst [vmem:[#allocation3 + $0x8] sm:$0x1] %v2874_v57  ;;  %v1832_v14 = vsel %vm1806_vm5, %v1759_v40, %v6800_v33  ;;  %v9379_v33 = vld [vmem:[#allocation116_spill] sm:$0xff]  ;;  %v9382_v59 = vld [vmem:[#allocation138_spill] sm:$0xff] }
 0x1f5   : > { %v2369_v55 = vshll.u32 %v2266_v5, 16  ;;  %1546 = vrot.lane.b32.xlu0 %v9363_v18, %s5833_s11  ;;  %v2367_v30 = vshrl.u32 %v2266_v5, 16  ;;  %v9374_v5 = vld [vmem:[#allocation37_spill] sm:$0xff] }
 0x1f6   : > { %v1684_v12 = vpop.permute.xlu1 %1683 }
 0x1f7   : > { %v2268_v62 = vsel %vm9156_vm12, %v2195_v4, %v1684_v12  ;;  %v2371_v29 = vrot.slane %v2369_v55, 1  ;;  %v1680_v6 = vpop.permute.xlu0 %1679  ;;  %v1905_v4 = vsel %vm1879_vm7, %v1832_v14, %v6954_v7  ;;  %v9375_v12 = vld [vmem:[#allocation35_spill] sm:$0xff] }
 0x1f8   : > { %v2373_v53 = vshll.u32 %v2268_v62, 16  ;;  %1632 = vrot.lane.b32.xlu1 %v9366_v28, %s5834_s12  ;;  %v2264_v63 = vsel %vm9156_vm12, %v2191_v58, %v1680_v6  ;;  %v9381_v6 = vld [vmem:[#allocation13_spill] sm:$0xff] }
 0x1f9   : > { %v2363_v23 = vshll.u32 %v2264_v63, 16  ;;  %1705 = vrot.lane.b32.xlu0 %v9367_v49, %s5835_s18  ;;  %v2372_v46 = vor.u32 %v2371_v29, %v2367_v30  ;;  %v1836_v29 = vsel %vm1806_vm5, %v1763_v31, %v9379_v33 }
 0x1fa   : > { %v1374_v2 = vpop.permute.xlu1 %1373  ;;  %v2375_v50 = vrot.slane %v2373_v53, 1  ;;  %v9380_v53 = vld [vmem:[#allocation88_spill] sm:$0xff]  ;;  %v1909_v30 = vsel %vm1879_vm7, %v1836_v29, %v9382_v59  ;;  %v2882_v59 = vld [vmem:[#allocation3 + $0x2c] sm:$0x1] }
 0x1fb   : > { %v2365_v39 = vrot.slane %v2363_v23, 1  ;;  %v1370_v1 = vpop.permute.xlu0 %1369  ;;  %v9383_v23 = vld [vmem:[#allocation82_spill] sm:$0xff]  ;;  %v1982_v57 = vsel %vm1952_vm8, %v1909_v30, %v1374_v2 }
 0x1fc   : > { %1707 = vrot.lane.b32.xlu1 %v9368_v10, %s5835_s18  ;;  %v2376_v17 = vsel %vm799_vm2, %v2372_v46, %v2375_v50  ;;  %v1978_v38 = vsel %vm1952_vm8, %v1905_v4, %v1370_v1  ;;  %v9385_v46 = vld [vmem:[#allocation115_spill] sm:$0xff] }
 0x1fd   : > { %1703 = vrot.lane.b32.xlu0 %v9356_v56, %s5835_s18  ;;  %v2366_v60 = vsel %vm799_vm2, %v2362_v11, %v2365_v39  ;;  %v9386_v39 = vld [vmem:[#allocation113_spill] sm:$0xff] }
 0x1fe   : > { %v1372_v16 = vpop.permute.xlu1 %1371  ;;  %5524 = vmatprep.mubr.msk.bf16.mxu0 %vm9155_vm13, %v2366_v60 }
 0x1ff   : > { %5525 = vmatmul.mubr.msk.bf16.gmra.mxu0 %vm9155_vm13, %v2376_v17  ;;  %v1445_v15 = vpop.permute.xlu0 %1444 }
 0x200   : > { %1397 = vrot.lane.b32.xlu1 %v9369_v44, %s5831_s30  ;;  %v2051_v62 = vsel %vm2025_vm9, %v1978_v38, %v1445_v15  ;;  %v9388_v15 = vld [vmem:[#allocation49_spill] sm:$0xff] }
 0x201   : > { %1393 = vrot.lane.b32.xlu0 %v9360_v26, %s5831_s30  ;;  %v9372_v26 = vld [vmem:[#allocation45_spill] sm:$0xff] }
 0x202   : > { %v1525_v32 = vpop.permute.xlu1 %1524 }
 0x203   : > { %v1449_v51 = vpop.permute.xlu0 %1448  ;;  %v2124_v7 = vsel %vm2098_vm10, %v2051_v62, %v1525_v32  ;;  %v9389_v32 = vld [vmem:[#allocation16_spill] sm:$0xff] }
 0x204   : > { %1395 = vrot.lane.b32.xlu1 %v9366_v28, %s5831_s30  ;;  %v1765_v28 = vsel %vm1733_vm6, %v9381_v6, %v9380_v53  ;;  %v2055_v17 = vsel %vm2025_vm9, %v1982_v57, %v1449_v51  ;;  %v2827_v51 = vsel %vm7314_vm0, 0, %v2826_v48 }
 0x205   : > { %1468 = vrot.lane.b32.xlu0 %v9367_v49, %s5832_s8  ;;  %v9384_v49 = vld [vmem:[#allocation11_spill] sm:$0xff]  ;;  %v1838_v50 = vsel %vm1806_vm5, %v1765_v28, %v9385_v46  ;;  %2828 = vst [vmem:[#allocation3 + $0x24] sm:$0x1] %v2827_v51  ;;  %v9391_v28 = vld [vmem:[#allocation48_spill] sm:$0xff] }
 0x206   : > { %v1447_v56 = vpop.permute.xlu1 %1446  ;;  %v1761_v41 = vsel %vm1733_vm6, %v9384_v49, %v9383_v23  ;;  %v9392_v49 = vld [vmem:[#allocation79_spill] sm:$0xff] }
 0x207   : > { %v1376_v45 = vpop.permute.xlu0 %1375  ;;  %v1834_v1 = vsel %vm1806_vm5, %v1761_v41, %v9386_v39  ;;  %v2879_v41 = vld [vmem:[#allocation3 + $0x20] sm:$0x1] }
 0x208   : > { %1548 = vrot.lane.b32.xlu1 %v9370_v3, %s5833_s11  ;;  %v2880_v57 = vsel %vm7338_vm15, 0, %v2879_v41 }
 0x209   : > { %1472 = vrot.lane.b32.xlu0 %v9371_v9, %s5832_s8  ;;  %2881 = vst [vmem:[#allocation3 + $0x20] sm:$0x1] %v2880_v57 }
 0x20a   : > { %v1611_v43 = vpop.permute.xlu1 %1610 }
 0x20b   : > { %v1529_v22 = vpop.permute.xlu0 %1528  ;;  %v2197_v63 = vsel %vm9157_vm11, %v2124_v7, %v1611_v43 }
 0x20c   : > { %1470 = vrot.lane.b32.xlu1 %v9368_v10, %s5832_s8  ;;  %v9387_v10 = vld [vmem:[#allocation137_spill] sm:$0xff]  ;;  %v2128_v2 = vsel %vm2098_vm10, %v2055_v17, %v1529_v22 }
 0x20d   : > { %1399 = vrot.lane.b32.xlu0 %v9372_v26, %s5831_s30  ;;  %v1911_v60 = vsel %vm1879_vm7, %v1838_v50, %v9387_v10 }
 0x20e   : > { %v1527_v21 = vpop.permute.xlu1 %1526  ;;  %v1984_v43 = vsel %vm1952_vm8, %v1911_v60, %v1376_v45  ;;  %v9393_v60 = vld [vmem:[#allocation76_spill] sm:$0xff] }
 0x20f   : > { %v1451_v35 = vpop.permute.xlu0 %1450 }
 0x210   : > { %1634 = vrot.lane.b32.xlu1 %v9369_v44, %s5834_s12  ;;  %v2057_v40 = vsel %vm2025_vm9, %v1984_v43, %v1451_v35 }
 0x211   : > { %1552 = vrot.lane.b32.xlu0 %v9374_v5, %s5833_s11 }
 0x212   : > { %v1686_v34 = vpop.permute.xlu1 %1685 }
 0x213   : > { %v1615_v55 = vpop.permute.xlu0 %1614  ;;  %v2270_v11 = vsel %vm9156_vm12, %v2197_v63, %v1686_v34 }
 0x214   : > { %1550 = vrot.lane.b32.xlu1 %v9375_v12, %s5833_s11  ;;  %v2379_v34 = vshll.u32 %v2270_v11, 16  ;;  %v2201_v14 = vsel %vm9157_vm11, %v2128_v2, %v1615_v55  ;;  %v9390_v55 = vld [vmem:[#allocation38_spill] sm:$0xff] }
 0x215   : > { %1474 = vrot.lane.b32.xlu0 %v9378_v19, %s5832_s8 }
 0x216   : > { %v1613_v58 = vpop.permute.xlu1 %1612  ;;  %v2381_v29 = vrot.slane %v2379_v34, 1  ;;  %v9396_v34 = vld [vmem:[#allocation83_spill] sm:$0xff] }
 0x217   : > { %v1531_v36 = vpop.permute.xlu0 %1530 }
 0x218   : > { %1709 = vrot.lane.b32.xlu1 %v9371_v9, %s5835_s18  ;;  %v1907_v9 = vsel %vm1879_vm7, %v1834_v1, %v9389_v32  ;;  %v2130_v24 = vsel %vm2098_vm10, %v2057_v40, %v1531_v36  ;;  %v2377_v36 = vshrl.u32 %v2270_v11, 16  ;;  %v9395_v40 = vld [vmem:[#allocation40_spill] sm:$0xff] }
 0x219   : > { %1638 = vrot.lane.b32.xlu0 %v9388_v15, %s5834_s12  ;;  %v1980_v38 = vsel %vm1952_vm8, %v1907_v9, %v1372_v16  ;;  %v9394_v9 = vld [vmem:[#allocation51_spill] sm:$0xff] }
 0x21a   : > { %v1617_v44 = vpop.permute.xlu1 %1616  ;;  %v2053_v22 = vsel %vm2025_vm9, %v1980_v38, %v1447_v56  ;;  %v2382_v39 = vor.u32 %v2381_v29, %v2377_v36 }
 0x21b   : > { %v1690_v4 = vpop.permute.xlu0 %1689  ;;  %v2203_v35 = vsel %vm9157_vm11, %v2130_v24, %v1617_v44  ;;  %v2126_v62 = vsel %vm2098_vm10, %v2053_v22, %v1527_v21  ;;  %v2883_v21 = vsel %vm7338_vm15, 0, %v2882_v59  ;;  %v9398_v24 = vld [vmem:[#allocation91_spill] sm:$0xff]  ;;  %v9405_v59 = vld [vmem:[#allocation80_spill] sm:$0xff] }
 0x21c   : > { %1636 = vrot.lane.b32.xlu1 %v9372_v26, %s5834_s12  ;;  %v2274_v45 = vsel %vm9156_vm12, %v2201_v14, %v1690_v4  ;;  %v2823_v26 = vld [vmem:[#allocation3 + $0x18] sm:$0x1]  ;;  %v2199_v7 = vsel %vm9157_vm11, %v2126_v62, %v1613_v58  ;;  %2884 = vst [vmem:[#allocation3 + $0x2c] sm:$0x1] %v2883_v21  ;;  %v9402_v62 = vld [vmem:[#allocation139_spill] sm:$0xff] }
 0x21d   : > { %v2389_v54 = vshll.u32 %v2274_v45, 16  ;;  %1554 = vrot.lane.b32.xlu0 %v9390_v55, %s5833_s11  ;;  %v2824_v16 = vsel %vm7314_vm0, 0, %v2823_v26  ;;  %v2387_v30 = vshrl.u32 %v2274_v45, 16  ;;  %v9399_v45 = vld [vmem:[#allocation18_spill] sm:$0xff]  ;;  %v9407_v21 = vld [vmem:[#allocation15_spill] sm:$0xff] }
 0x21e   : > { %v1692_v31 = vpop.permute.xlu1 %1691  ;;  %2825 = vst [vmem:[#allocation3 + $0x18] sm:$0x1] %v2824_v16  ;;  %v1767_v22 = vsel %vm1733_vm6, %v9399_v45, %v9398_v24  ;;  %v9415_v24 = vld [vmem:[#allocation140_spill] sm:$0xff] }
 0x21f   : > { %v2276_v33 = vsel %vm9156_vm12, %v2203_v35, %v1692_v31  ;;  %v2391_v53 = vrot.slane %v2389_v54, 1  ;;  %v1688_v6 = vpop.permute.xlu0 %1687  ;;  %v9400_v35 = vld [vmem:[#allocation118_spill] sm:$0xff]  ;;  %v9401_v31 = vld [vmem:[#allocation44_spill] sm:$0xff] }
 0x220   : > { %v2393_v56 = vshll.u32 %v2276_v33, 16  ;;  %1640 = vrot.lane.b32.xlu1 %v9391_v28, %s5834_s12  ;;  %v2272_v63 = vsel %vm9156_vm12, %v2199_v7, %v1688_v6  ;;  %v1840_v54 = vsel %vm1806_vm5, %v1767_v22, %v9400_v35  ;;  %v9403_v7 = vld [vmem:[#allocation42_spill] sm:$0xff] }
 0x221   : > { %v2383_v23 = vshll.u32 %v2272_v63, 16  ;;  %1713 = vrot.lane.b32.xlu0 %v9392_v49, %s5835_s18  ;;  %v2392_v46 = vor.u32 %v2391_v53, %v2387_v30  ;;  %v1913_v33 = vsel %vm1879_vm7, %v1840_v54, %v9402_v62  ;;  %v9406_v63 = vld [vmem:[#allocation90_spill] sm:$0xff] }
 0x222   : > { %v1382_v58 = vpop.permute.xlu1 %1381  ;;  %v2395_v50 = vrot.slane %v2393_v56, 1  ;;  %v9404_v56 = vld [vmem:[#allocation93_spill] sm:$0xff]  ;;  %v1769_v36 = vsel %vm1733_vm6, %v9407_v21, %v9406_v63  ;;  %v9417_v63 = vld [vmem:[#allocation112_spill] sm:$0xff] }
 0x223   : > { %v2385_v1 = vrot.slane %v2383_v23, 1  ;;  %v1378_v10 = vpop.permute.xlu0 %1377  ;;  %v1771_v6 = vsel %vm1733_vm6, %v6201_v61, %v9404_v56  ;;  %v9408_v23 = vld [vmem:[#allocation120_spill] sm:$0xff]  ;;  %v9410_v61 = vld [vmem:[#allocation141_spill] sm:$0xff]  ;;  %v1339_v21 = vshll.u32 %v9417_v63, 16 }
 0x224   : > { %1715 = vrot.lane.b32.xlu1 %v9393_v60, %s5835_s18  ;;  %v2396_v44 = vsel %vm799_vm2, %v2392_v46, %v2395_v50  ;;  %v1986_v16 = vsel %vm1952_vm8, %v1913_v33, %v1378_v10  ;;  %v9409_v46 = vld [vmem:[#allocation92_spill] sm:$0xff]  ;;  %v9411_v10 = vld [vmem:[#allocation114_spill] sm:$0xff] }
 0x225   : > { %1711 = vrot.lane.b32.xlu0 %v9378_v19, %s5835_s18  ;;  %v2386_v17 = vsel %vm799_vm2, %v2382_v39, %v2385_v1  ;;  %v1773_v50 = vsel %vm1733_vm6, %v6187_v52, %v9409_v46  ;;  %v9414_v52 = vld [vmem:[#allocation10_spill] sm:$0xff]  ;;  %v1332_v33 = vshrl.u32 %v9411_v10, 16  ;;  %v2829_v46 = vld [vmem:[#allocation3 + $0x30] sm:$0x1] }
 0x226   : > { %v7456_v11 = vpop.permute.xlu1 %1379  ;;  %5528 = vmatprep.mubr.msk.bf16.mxu0 %vm9155_vm13, %v2386_v17  ;;  %v9412_v17 = vld [vmem:[#allocation117_spill] sm:$0xff] }
 0x227   : > { %5529 = vmatmul.mubr.msk.bf16.gmra.mxu0 %vm9155_vm13, %v2396_v44  ;;  %v1453_v32 = vpop.permute.xlu0 %1452  ;;  %v1842_v44 = vsel %vm1806_vm5, %v1769_v36, %v9412_v17 }
 0x228   : > { %1405 = vrot.lane.b32.xlu1 %v9394_v9, %s5831_s30  ;;  %v2059_v53 = vsel %vm2025_vm9, %v1986_v16, %v1453_v32  ;;  %v9413_v32 = vld [vmem:[#allocation119_spill] sm:$0xff] }
 0x229   : > { %1401 = vrot.lane.b32.xlu0 %v9388_v15, %s5831_s30  ;;  %v9397_v15 = vld [vmem:[#allocation50_spill] sm:$0xff] }
 0x22a   : > { %v1533_v43 = vpop.permute.xlu1 %1532 }
 0x22b   : > { %v1457_v2 = vpop.permute.xlu0 %1456 }
 0x22c   : > { %1403 = vrot.lane.b32.xlu1 %v9391_v28, %s5831_s30  ;;  %v2132_v28 = vsel %vm2098_vm10, %v2059_v53, %v1533_v43 }
 0x22d   : > { %1476 = vrot.lane.b32.xlu0 %v9392_v49, %s5832_s8  ;;  %v1844_v49 = vsel %vm1806_vm5, %v1771_v6, %v9408_v23 }
 0x22e   : > { %v1455_v19 = vpop.permute.xlu1 %1454  ;;  %v1917_v57 = vsel %vm1879_vm7, %v1844_v49, %v9410_v61 }
 0x22f   : > { %v1384_v48 = vpop.permute.xlu0 %1383  ;;  %v1990_v43 = vsel %vm1952_vm8, %v1917_v57, %v1382_v58  ;;  %v2832_v58 = vld [vmem:[#allocation3 + $0x3c] sm:$0x1] }
 0x230   : > { %1556 = vrot.lane.b32.xlu1 %v9395_v40, %s5833_s11  ;;  %v2063_v22 = vsel %vm2025_vm9, %v1990_v43, %v1457_v2  ;;  %v2833_v6 = vsel %vm7314_vm0, 0, %v2832_v58 }
 0x231   : > { %1480 = vrot.lane.b32.xlu0 %v9396_v34, %s5832_s8  ;;  %2834 = vst [vmem:[#allocation3 + $0x3c] sm:$0x1] %v2833_v6  ;;  %v592_v6 = vld [vmem:[#allocation2 + $0xe4] sm:$0xf] }
 0x232   : > { %v1619_v14 = vpop.permute.xlu1 %1618 }
 0x233   : > { %v1537_v4 = vpop.permute.xlu0 %1536  ;;  %v2205_v41 = vsel %vm9157_vm11, %v2132_v28, %v1619_v14  ;;  %v1915_v14 = vsel %vm1879_vm7, %v1842_v44, %v9414_v52 }
 0x234   : > { %1478 = vrot.lane.b32.xlu1 %v9393_v60, %s5832_s8  ;;  %v1334_v60 = vshll.u32 %v9411_v10, 16 }
 0x235   : > { %1407 = vrot.lane.b32.xlu0 %v9397_v15, %s5831_s30 }
 0x236   : > { %v1535_v51 = vpop.permute.xlu1 %1534  ;;  %v1336_v2 = vrot.slane %v1334_v60, 1  ;;  %v2830_v60 = vsel %vm7314_vm0, 0, %v2829_v46 }
 0x237   : > { %v1459_v38 = vpop.permute.xlu0 %1458  ;;  %2831 = vst [vmem:[#allocation3 + $0x30] sm:$0x1] %v2830_v60 }
 0x238   : > { %1642 = vrot.lane.b32.xlu1 %v9394_v9, %s5834_s12  ;;  %v1846_v9 = vsel %vm1806_vm5, %v1773_v50, %v9413_v32  ;;  %v1337_v32 = vor.u32 %v1336_v2, %v1332_v33  ;;  %v9421_v33 = vld [vmem:[#allocation84_spill] sm:$0xff] }
 0x239   : > { %1560 = vrot.lane.b32.xlu0 %v9401_v31, %s5833_s11  ;;  %v1919_v45 = vsel %vm1879_vm7, %v1846_v9, %v9415_v24  ;;  %v2888_v9 = vld [vmem:[#allocation3 + $0x44] sm:$0x1] }
 0x23a   : > { %v1694_v26 = vpop.permute.xlu1 %1693  ;;  %v1992_v54 = vsel %vm1952_vm8, %v1919_v45, %v1384_v48  ;;  %v1988_v48 = vsel %vm1952_vm8, %v1915_v14, %v7456_v11  ;;  %v2889_v24 = vsel %vm7338_vm15, 0, %v2888_v9 }
 0x23b   : > { %v1623_v29 = vpop.permute.xlu0 %1622  ;;  %v2278_v39 = vsel %vm9156_vm12, %v2205_v41, %v1694_v26  ;;  %v2136_v26 = vsel %vm2098_vm10, %v2063_v22, %v1537_v4  ;;  %v2065_v16 = vsel %vm2025_vm9, %v1992_v54, %v1459_v38  ;;  %v2061_v38 = vsel %vm2025_vm9, %v1988_v48, %v1455_v19  ;;  %v9419_v19 = vld [vmem:[#allocation52_spill] sm:$0xff]  ;;  %2890 = vst [vmem:[#allocation3 + $0x44] sm:$0x1] %v2889_v24  ;;  %v9425_v24 = vld [vmem:[#allocation142_spill] sm:$0xff] }
 0x23c   : > { %1558 = vrot.lane.b32.xlu1 %v9403_v7, %s5833_s11  ;;  %v2399_v62 = vshll.u32 %v2278_v39, 16  ;;  %v2209_v53 = vsel %vm9157_vm11, %v2136_v26, %v1623_v29  ;;  %v2134_v49 = vsel %vm2098_vm10, %v2061_v38, %v1535_v51  ;;  %v1341_v51 = vrot.slane %v1339_v21, 1  ;;  %v593_v48 = vld [vmem:[#allocation2 + $0xe8] sm:$0xf] }
 0x23d   : > { %1482 = vrot.lane.b32.xlu0 %v9405_v59, %s5832_s8  ;;  %v2397_v43 = vshrl.u32 %v2278_v39, 16  ;;  %v9422_v21 = vmov 0  }
 0x23e   : > { %v1621_v30 = vpop.permute.xlu1 %1620  ;;  %v2401_v41 = vrot.slane %v2399_v62, 1  ;;  %v1342_v58 = vsel %vm799_vm2, %v1337_v32, %v1341_v51  ;;  %v652_v38 = vmax.bf16 %v9422_v21, %v592_v6  ;;  %v9423_v51 = vld [vmem:[#allocation95_spill] sm:$0xff] }
 0x23f   : > { %v1539_v1 = vpop.permute.xlu0 %1538  ;;  %v2207_v50 = vsel %vm9157_vm11, %v2134_v49, %v1621_v30  ;;  %v9420_v30 = vld [vmem:[#allocation86_spill] sm:$0xff]  ;;  %v1775_v9 = vsel %vm1733_vm6, %v6222_v25, %v9423_v51 }
 0x240   : > { %1717 = vrot.lane.b32.xlu1 %v9396_v34, %s5835_s18  ;;  %v9416_v34 = vld [vmem:[#allocation53_spill] sm:$0xff]  ;;  %v2138_v4 = vsel %vm2098_vm10, %v2065_v16, %v1539_v1  ;;  %v2402_v54 = vor.u32 %v2401_v41, %v2397_v43  ;;  %v9424_v43 = vld [vmem:[#allocation122_spill] sm:$0xff] }
 0x241   : > { %1646 = vrot.lane.b32.xlu0 %v9416_v34, %s5834_s12 }
 0x242   : > { %v1625_v35 = vpop.permute.xlu1 %1624 }
 0x243   : > { %v1698_v56 = vpop.permute.xlu0 %1697  ;;  %v2211_v29 = vsel %vm9157_vm11, %v2138_v4, %v1625_v35  ;;  %v2885_v35 = vld [vmem:[#allocation3 + $0x38] sm:$0x1] }
 0x244   : > { %1644 = vrot.lane.b32.xlu1 %v9397_v15, %s5834_s12  ;;  %v2282_v28 = vsel %vm9156_vm12, %v2209_v53, %v1698_v56  ;;  %v9418_v15 = vld [vmem:[#allocation47_spill] sm:$0xff]  ;;  %v2886_v39 = vsel %vm7338_vm15, 0, %v2885_v35 }
 0x245   : > { %v2409_v36 = vshll.u32 %v2282_v28, 16  ;;  %1562 = vrot.lane.b32.xlu0 %v9418_v15, %s5833_s11  ;;  %v2407_v17 = vshrl.u32 %v2282_v28, 16  ;;  %2887 = vst [vmem:[#allocation3 + $0x38] sm:$0x1] %v2886_v39  ;;  %v7576_v28 = vrot.slane %v9417_v63, 1 }
 0x246   : > { %v1700_v23 = vpop.permute.xlu1 %1699 }
 0x247   : > { %v2284_v11 = vsel %vm9156_vm12, %v2211_v29, %v1700_v23  ;;  %v2411_v61 = vrot.slane %v2409_v36, 1  ;;  %v1696_v1 = vpop.permute.xlu0 %1695  ;;  %v653_v29 = vmax.bf16 %v9422_v21, %v593_v48  ;;  %v594_v23 = vld [vmem:[#allocation2 + $0xec] sm:$0x3] }
 0x248   : > { %v2413_v57 = vshll.u32 %v2284_v11, 16  ;;  %1648 = vrot.lane.b32.xlu1 %v9419_v19, %s5834_s12  ;;  %v2280_v44 = vsel %vm9156_vm12, %v2207_v50, %v1696_v1  ;;  %v654_v11 = vmax.bf16 %v9422_v21, %v594_v23 }
 0x249   : > { %v2403_v52 = vshll.u32 %v2280_v44, 16  ;;  %1721 = vrot.lane.b32.xlu0 %v9420_v30, %s5835_s18  ;;  %v2412_v45 = vor.u32 %v2411_v61, %v2407_v17  ;;  %v7588_v41 = vcombine.low %v652_v38, %v653_v29  ;;  %v1343_v61 = vshrl.u32 %v9417_v63, 16 }
 0x24a   : > { %v7554_v14 = vpop.permute.xlu1 %1389  ;;  %v2415_v22 = vrot.slane %v2413_v57, 1  ;;  %v7595_v57 = vcombine.low %v654_v11, %v654_v11  ;;  %v9431_v11 = vld [vmem:[#allocation121_spill] sm:$0xff] }
 0x24b   : > { %v2405_v26 = vrot.slane %v2403_v52, 1  ;;  %v1386_v62 = vpop.permute.xlu0 %1385  ;;  %v1575_v1 = vshll.u32 %v7588_v41, 16  ;;  %v1573_v17 = vshrl.u32 %v7588_v41, 16  ;;  %v1848_v52 = vsel %vm1806_vm5, %v1775_v9, %v9424_v43 }
 0x24c   : > { %1723 = vrot.lane.b32.xlu1 %v9421_v33, %s5835_s18  ;;  %v2416_v56 = vsel %vm799_vm2, %v2412_v45, %v2415_v22  ;;  %v1921_v45 = vsel %vm1879_vm7, %v1848_v52, %v9425_v24  ;;  %v1658_v43 = vrot.slane %v7588_v41, 1 }
 0x24d   : > { %1719 = vrot.lane.b32.xlu0 %v9405_v59, %s5835_s18  ;;  %v2406_v53 = vsel %vm799_vm2, %v2402_v54, %v2405_v26  ;;  %v1417_v59 = vrot.slane %v9411_v10, 1  ;;  %v1577_v44 = vrot.slane %v1575_v1, 1  ;;  %v1994_v54 = vsel %vm1952_vm8, %v1921_v45, %v1386_v62  ;;  %v9432_v1 = vld [vmem:[#allocation123_spill] sm:$0xff] }
 0x24e   : > { %v7565_v16 = vpop.permute.xlu1 %1387  ;;  %5532 = vmatprep.mubr.msk.bf16.mxu0 %vm9155_vm13, %v2406_v53  ;;  %v2838_v45 = vld [vmem:[#allocation3 + $0x54] sm:$0x1] }
 0x24f   : > { %5533 = vmatmul.mubr.msk.bf16.gmra.mxu0 %vm9155_vm13, %v2416_v56  ;;  %v1461_v2 = vpop.permute.xlu0 %1460  ;;  %v1578_v22 = vor.u32 %v1577_v44, %v1573_v17  ;;  %v9427_v56 = vld [vmem:[#allocation124_spill] sm:$0xff]  ;;  %v9433_v44 = vld [vmem:[#allocation19_spill] sm:$0xff] }
 0x250   : > { %1413 = vrot.lane.b32.xlu1 %v1342_v58, %s5831_s30  ;;  %v2067_v25 = vsel %vm2025_vm9, %v1994_v54, %v1461_v2 }
 0x251   : > { %1409 = vrot.lane.b32.xlu0 %v9416_v34, %s5831_s30  ;;  %v1419_v34 = vsel %vm9154_vm3, %v1417_v59, %v7576_v28  ;;  %v9429_v59 = vld [vmem:[#allocation96_spill] sm:$0xff] }
 0x252   : > { %v1541_v4 = vpop.permute.xlu1 %1540 }
 0x253   : > { %v1465_v36 = vpop.permute.xlu0 %1464 }
 0x254   : > { %1411 = vrot.lane.b32.xlu1 %v9419_v19, %s5831_s30 }
 0x255   : > { %1484 = vrot.lane.b32.xlu0 %v9420_v30, %s5832_s8 }
 0x256   : > { %v7584_v49 = vpop.permute.xlu1 %1462 }
 0x257   : > { %v1392_v46 = vpop.permute.xlu0 %1391 }
 0x258   : > { %1564 = vrot.lane.b32.xlu1 %v9411_v10, %s5833_s11  ;;  %v1580_v10 = vshll.u32 %v7595_v57, 16 }
 0x259   : > { %1488 = vrot.lane.b32.xlu0 %v1419_v34, %s5832_s8 }
 0x25a   : > { %v1627_v50 = vpop.permute.xlu1 %1626  ;;  %v1582_v35 = vrot.slane %v1580_v10, 1  ;;  %v9434_v10 = vld [vmem:[#allocation143_spill] sm:$0xff] }
 0x25b   : > { %v1545_v19 = vpop.permute.xlu0 %1544 }
 0x25c   : > { %1486 = vrot.lane.b32.xlu1 %v9421_v33, %s5832_s8  ;;  %v9426_v33 = vld [vmem:[#allocation97_spill] sm:$0xff]  ;;  %v1583_v48 = vsel %vm799_vm2, %v1578_v22, %v1582_v35 }
 0x25d   : > { %1415 = vrot.lane.b32.xlu0 %v1343_v61, %s5831_s30  ;;  %v1779_v39 = vsel %vm1733_vm6, %v6256_v0, %v9426_v33  ;;  %v1781_v0 = vsel %vm1733_vm6, %v9344_v37, %v9429_v59 }
 0x25e   : > { %v1543_v60 = vpop.permute.xlu1 %1542  ;;  %v1852_v6 = vsel %vm1806_vm5, %v1779_v39, %v9427_v56  ;;  %v1854_v17 = vsel %vm1806_vm5, %v1781_v0, %v9432_v1  ;;  %v7671_v39 = vld [vmem:[%s9014_s3] ss:$0 sm:$0xff] }
 0x25f   : > { %v1467_v32 = vpop.permute.xlu0 %1466  ;;  %v1927_v51 = vsel %vm1879_vm7, %v1854_v17, %v9434_v10 }
 0x260   : > { %1650 = vrot.lane.b32.xlu1 %v1342_v58, %s5834_s12  ;;  %v2140_v58 = vsel %vm2098_vm10, %v2067_v25, %v1541_v4  ;;  %v9430_v4 = vld [vmem:[#allocation144_spill] sm:$0xff]  ;;  %v2000_v52 = vsel %vm1952_vm8, %v1927_v51, %v1392_v46 }
 0x261   : > { %1568 = vrot.lane.b32.xlu0 %v7588_v41, %s5833_s11  ;;  %v2213_v62 = vsel %vm9157_vm11, %v2140_v58, %v1627_v50  ;;  %v1925_v38 = vsel %vm1879_vm7, %v1852_v6, %v9430_v4  ;;  %v2073_v22 = vsel %vm2025_vm9, %v2000_v52, %v1467_v32  ;;  %v2839_v41 = vsel %vm7314_vm0, 0, %v2838_v45 }
 0x262   : > { %v1702_v30 = vpop.permute.xlu1 %1701  ;;  %2840 = vst [vmem:[#allocation3 + $0x54] sm:$0x1] %v2839_v41 }
 0x263   : > { %v1631_v26 = vpop.permute.xlu0 %1630  ;;  %v2286_v29 = vsel %vm9156_vm12, %v2213_v62, %v1702_v30 }
 0x264   : > { %1566 = vrot.lane.b32.xlu1 %v9417_v63, %s5833_s11  ;;  %v9428_v63 = vld [vmem:[#allocation94_spill] sm:$0xff]  ;;  %v2419_v24 = vshll.u32 %v2286_v29, 16  ;;  %v2417_v4 = vshrl.u32 %v2286_v29, 16  ;;  %v2894_v29 = vld [vmem:[#allocation3 + $0x5c] sm:$0x1] }
 0x265   : > { %1490 = vrot.lane.b32.xlu0 %v7576_v28, %s5832_s8  ;;  %v1777_v2 = vsel %vm1733_vm6, %v6213_v13, %v9428_v63  ;;  %v1998_v13 = vsel %vm1952_vm8, %v1925_v38, %v7554_v14  ;;  %v1659_v14 = vrot.slane %v7595_v57, 1  ;;  %v2895_v45 = vsel %vm7338_vm15, 0, %v2894_v29 }
 0x266   : > { %v1629_v53 = vpop.permute.xlu1 %1628  ;;  %v1850_v50 = vsel %vm1806_vm5, %v1777_v2, %v9431_v11  ;;  %v2071_v9 = vsel %vm2025_vm9, %v1998_v13, %v1465_v36  ;;  %v1584_v36 = vshrl.u32 %v7595_v57, 16  ;;  %v2421_v58 = vrot.slane %v2419_v24, 1  ;;  %2896 = vst [vmem:[#allocation3 + $0x5c] sm:$0x1] %v2895_v45 }
 0x267   : > { %v1547_v23 = vpop.permute.xlu0 %1546  ;;  %v1923_v37 = vsel %vm1879_vm7, %v1850_v50, %v9433_v44  ;;  %v2144_v30 = vsel %vm2098_vm10, %v2071_v9, %v1545_v19  ;;  %v1660_v6 = vsel %vm9154_vm3, %v1658_v43, %v1659_v14  ;;  %vm3017_vm3 = vsmask.f32 4368 }
 0x268   : > { %1725 = vrot.lane.b32.xlu1 %v1419_v34, %s5835_s18  ;;  %v2217_v35 = vsel %vm9157_vm11, %v2144_v30, %v1631_v26  ;;  %v1996_v46 = vsel %vm1952_vm8, %v1923_v37, %v7565_v16  ;;  %v2146_v19 = vsel %vm2098_vm10, %v2073_v22, %v1547_v23  ;;  %v2422_v44 = vor.u32 %v2421_v58, %v2417_v4  ;;  %v2891_v22 = vld [vmem:[#allocation3 + $0x50] sm:$0x1] }
 0x269   : > { %1654 = vrot.lane.b32.xlu0 %v1583_v48, %s5834_s12  ;;  %v2069_v32 = vsel %vm2025_vm9, %v1996_v46, %v7584_v49  ;;  %v2892_v46 = vsel %vm7338_vm15, 0, %v2891_v22 }
 0x26a   : > { %v1633_v34 = vpop.permute.xlu1 %1632  ;;  %v2142_v16 = vsel %vm2098_vm10, %v2069_v32, %v1543_v60  ;;  %2893 = vst [vmem:[#allocation3 + $0x50] sm:$0x1] %v2892_v46 }
 0x26b   : > { %v1706_v54 = vpop.permute.xlu0 %1705  ;;  %v2219_v26 = vsel %vm9157_vm11, %v2146_v19, %v1633_v34  ;;  %v2215_v49 = vsel %vm9157_vm11, %v2142_v16, %v1629_v53  ;;  %v2835_v53 = vld [vmem:[#allocation3 + $0x48] sm:$0x1] }
 0x26c   : > { %1652 = vrot.lane.b32.xlu1 %v1343_v61, %s5834_s12  ;;  %v2290_v25 = vsel %vm9156_vm12, %v2217_v35, %v1706_v54  ;;  %v2836_v13 = vsel %vm7314_vm0, 0, %v2835_v53 }
 0x26d   : > { %v2429_v33 = vshll.u32 %v2290_v25, 16  ;;  %1570 = vrot.lane.b32.xlu0 %v7595_v57, %s5833_s11  ;;  %v2427_v62 = vshrl.u32 %v2290_v25, 16  ;;  %2837 = vst [vmem:[#allocation3 + $0x48] sm:$0x1] %v2836_v13 }
 0x26e   : > { %v1708_v61 = vpop.permute.xlu1 %1707 }
 0x26f   : > { %v2292_v56 = vsel %vm9156_vm12, %v2219_v26, %v1708_v61  ;;  %v2431_v48 = vrot.slane %v2429_v33, 1  ;;  %v5518_v2 = vpop.f32.mrf.mxu0  ;;  %v1704_v57 = vpop.permute.xlu0 %1703  ;;  %v3388_v61 = vld [vmem:[#allocation3 + $0xc] sm:$0xf] }
 0x270   : > { %v2433_v63 = vshll.u32 %v2292_v56, 16  ;;  %1656 = vrot.lane.b32.xlu1 %v1584_v36, %s5834_s12  ;;  %v2626_v59 = vadd.f32 %v5518_v2, %v7671_v39  ;;  %v2288_v0 = vsel %vm9156_vm12, %v2215_v49, %v1704_v57 }
 0x271   : > { %v2432_v60 = vor.u32 %v2431_v48, %v2427_v62  ;;  %v2423_v38 = vshll.u32 %v2288_v0, 16  ;;  %v2617_v23 = vpop.f32.mrf.mxu0  ;;  %1729 = vrot.lane.b32.xlu0 %v1660_v6, %s5835_s18  ;;  %v3381_v48 = vld [vmem:[#allocation3] sm:$0xf] }
 0x272   : > { %v7681_v11 = vpop.permute.xlu1 %1397  ;;  %v2435_v50 = vrot.slane %v2433_v63, 1  ;;  %v2762_v1 = vmax.f32 %v2626_v59, 0.0  ;;  %v2618_v17 = vadd.f32 %v7671_v39, %v2617_v23 }
 0x273   : > { %v2425_v37 = vrot.slane %v2423_v38, 1  ;;  %v5519_v10 = vpop.f32.mrf.mxu0  ;;  %v7686_v51 = vpop.permute.xlu0 %1393  ;;  %v3392_v38 = vld [vmem:[#allocation3 + $0x14] sm:$0x1] }
 0x274   : > { %1731 = vrot.lane.b32.xlu1 %v1659_v14, %s5835_s18  ;;  %v5435_v9 = vpack.c.bf16 %v2762_v1, %v2762_v1  ;;  %v2760_v34 = vmax.f32 %v2618_v17, 0.0  ;;  %v2629_v43 = vadd.f32 %v5519_v10, %v7671_v39  ;;  %v2436_v36 = vsel %vm799_vm2, %v2432_v60, %v2435_v50 }
 0x275   : > { %v2620_v52 = vpop.f32.mrf.mxu0  ;;  %1727 = vrot.lane.b32.xlu0 %v7576_v28, %s5835_s18  ;;  %v2426_v24 = vsel %vm799_vm2, %v2422_v44, %v2425_v37 }
 0x276   : > { %v7692_v30 = vpop.permute.xlu1 %1395  ;;  %v3037_v35 = vshrl.u32 %v5435_v9, 16  ;;  %v5433_v14 = vpack.c.bf16 %v2760_v34, %v2760_v34  ;;  %v2763_v54 = vmax.f32 %v2629_v43, 0.0  ;;  %5536 = vmatprep.mubr.msk.bf16.mxu0 %vm9155_vm13, %v2426_v24  ;;  %v2621_v41 = vadd.f32 %v7671_v39, %v2620_v52  ;;  %v3385_v34 = vld [vmem:[#allocation3 + $0x8] sm:$0x1] }
 0x277   : > { %5537 = vmatmul.mubr.msk.bf16.gmra.mxu0 %vm9155_vm13, %v2436_v36  ;;  %v7701_v28 = vpop.permute.xlu0 %1468  ;;  %v3040_v25 = vshll.u32 %v5435_v9, 16  ;;  %vm7719_vm13 = vmor %vm9437_vm4, %vm3017_vm3  ;;  %vm9452_vm3 = vcmask 1046528  }
 0x278   : > { %v3039_v19 = vrot.slane %v3037_v35, 7  ;;  %v3020_v32 = vshrl.u32 %v5433_v14, 16  ;;  %v5436_v26 = vpack.c.bf16 %v2763_v54, %v2763_v54  ;;  %v2761_v16 = vmax.f32 %v2621_v41, 0.0  ;;  %vm9453_vm4 = vmmov %vm9452_vm3 }
 0x279   : > { %v3023_v49 = vshll.u32 %v5433_v14, 16 }
 0x27a   : > { %v7711_v58 = vpop.permute.xlu1 %1548  ;;  %v3042_v56 = vor.u32 %v3040_v25, %v3039_v19  ;;  %v3022_v6 = vrot.slane %v3020_v32, 7  ;;  %v3045_v62 = vshrl.u32 %v5436_v26, 16  ;;  %v5434_v63 = vpack.c.bf16 %v2761_v16, %v2761_v16 }
 0x27b   : > { %v7713_v2 = vpop.permute.xlu0 %1472  ;;  %v3048_v4 = vshll.u32 %v5436_v26, 16  ;;  %v3043_v50 = vrot.slane %v3039_v19, 4  ;;  %v9440_v19 = vld [vmem:[#allocation99_spill] sm:$0xff]  ;;  %v9441_v26 = vld [vmem:[#allocation126_spill] sm:$0xff] }
 0x27c   : > { %v3389_v57 = vsel %vm7707_vm14, %v3042_v56, %v3388_v61  ;;  %v3025_v59 = vor.u32 %v3023_v49, %v3022_v6  ;;  %v3047_v0 = vrot.slane %v3045_v62, 7  ;;  %v3028_v23 = vshrl.u32 %v5434_v63, 16 }
 0x27d   : > { %3390 = vst [vmem:[#allocation3 + $0xc] sm:$0xf] %v3389_v57  ;;  %v3031_v37 = vshll.u32 %v5434_v63, 16  ;;  %v3026_v43 = vrot.slane %v3022_v6, 4  ;;  %v1783_v25 = vsel %vm1733_vm6, %v9349_v42, %v9440_v19  ;;  %v9442_v6 = vld [vmem:[#allocation146_spill] sm:$0xff] }
 0x27e   : > { %v7723_v53 = vpop.permute.xlu1 %1470  ;;  %v3382_v1 = vsel %vm7707_vm14, %v3025_v59, %v3381_v48  ;;  %v3050_v17 = vor.u32 %v3048_v4, %v3047_v0  ;;  %v3052_v13 = vrot.slane %v3047_v0, 4  ;;  %v3030_v44 = vrot.slane %v3028_v23, 7  ;;  %v9443_v23 = vld [vmem:[#allocation98_spill] sm:$0xff] }
 0x27f   : > { %3383 = vst [vmem:[#allocation3] sm:$0xf] %v3382_v1  ;;  %v7727_v10 = vpop.permute.xlu0 %1399  ;;  %v1856_v61 = vsel %vm1806_vm5, %v1783_v25, %v9441_v26  ;;  %v9444_v1 = vld [vmem:[#allocation100_spill] sm:$0xff]  ;;  %v9450_v26 = vld [vmem:[#allocation145_spill] sm:$0xff] }
 0x280   : > { %v3051_v29 = vsel %vm7719_vm13, %v3043_v50, %v3050_v17  ;;  %v3393_v9 = vsel %vm7314_vm0, %v3052_v13, %v3392_v38  ;;  %v3033_v52 = vor.u32 %v3031_v37, %v3030_v44  ;;  %v3035_v24 = vrot.slane %v3030_v44, 4  ;;  %v9445_v17 = vld [vmem:[#allocation101_spill] sm:$0xff]  ;;  %v9446_v37 = vld [vmem:[#allocation128_spill] sm:$0xff] }
 0x281   : > { %3391 = vst.msk [vmem:[#allocation3 + $0x10] sm:$0xf] %vm411_vm1, %v3051_v29  ;;  %3394 = vst [vmem:[#allocation3 + $0x14] sm:$0x1] %v3393_v9  ;;  %v1929_v49 = vsel %vm1879_vm7, %v1856_v61, %v9442_v6  ;;  %v1785_v50 = vsel %vm1733_vm6, %v9354_v47, %v9443_v23  ;;  %v1787_v13 = vsel %vm1733_vm6, %v9353_v8, %v9445_v17  ;;  %v9451_v6 = vld [vmem:[#allocation12_spill] sm:$0xff] }
 0x282   : > { %v1635_v45 = vpop.permute.xlu1 %1634  ;;  %v3034_v22 = vsel %vm7719_vm13, %v3026_v43, %v3033_v52  ;;  %v3386_v35 = vsel %vm7314_vm0, %v3035_v24, %v3385_v34  ;;  %v2002_v48 = vsel %vm1952_vm8, %v1929_v49, %v7686_v51  ;;  %v1789_v51 = vsel %vm1733_vm6, %v9363_v18, %v9444_v1  ;;  %v9447_v43 = vld [vmem:[#allocation125_spill] sm:$0xff]  ;;  %v9448_v18 = vld [vmem:[#allocation127_spill] sm:$0xff] }
 0x283   : > { %v1553_v14 = vpop.permute.xlu0 %1552  ;;  %3384 = vst.msk [vmem:[#allocation3 + $0x4] sm:$0xf] %vm411_vm1, %v3034_v22  ;;  %3387 = vst [vmem:[#allocation3 + $0x8] sm:$0x1] %v3386_v35  ;;  %v2075_v0 = vsel %vm2025_vm9, %v2002_v48, %v7701_v28  ;;  %v1860_v29 = vsel %vm1806_vm5, %v1787_v13, %v9446_v37  ;;  %v1858_v52 = vsel %vm1806_vm5, %v1785_v50, %v9447_v43  ;;  %v9449_v22 = vld [vmem:[#allocation147_spill] sm:$0xff] }
 0x284   : > { %3514 = vst.msk [vmem:[#allocation3 + $0x4] sm:$0xf] %vm411_vm1, %v9422_v21  ;;  %v2148_v44 = vsel %vm2098_vm10, %v2075_v0, %v7711_v58  ;;  %v1862_v24 = vsel %vm1806_vm5, %v1789_v51, %v9448_v18  ;;  %v1933_v8 = vsel %vm1879_vm7, %v1860_v29, %v9449_v22  ;;  %v1931_v61 = vsel %vm1879_vm7, %v1858_v52, %v9450_v26 }
 0x285   : > { %v2221_v9 = vsel %vm9157_vm11, %v2148_v44, %v1635_v45  ;;  %v1935_v49 = vsel %vm1879_vm7, %v1862_v24, %v9451_v6  ;;  %v2004_v48 = vsel %vm1952_vm8, %v1931_v61, %v7692_v30  ;;  %v2841_v61 = vld [vmem:[#allocation3 + $0x60] sm:$0x1] }
 0x286   : > { %v7741_v54 = vpop.permute.xlu1 %1550  ;;  %v3511_v36 = vld [vmem:[#allocation3] sm:$0xf]  ;;  %v2077_v0 = vsel %vm2025_vm9, %v2004_v48, %v7723_v53 }
 0x287   : > { %v3512_v41 = vsel %vm7707_vm14, 0, %v3511_v36  ;;  %v1475_v46 = vpop.permute.xlu0 %1474  ;;  %v2150_v53 = vsel %vm2098_vm10, %v2077_v0, %v7741_v54 }
 0x288   : > { %3513 = vst [vmem:[#allocation3] sm:$0xf] %v3512_v41  ;;  %v7748_v32 = vld [vmem:[#allocation3 + $0xc] sm:$0xff]   ;;  %v5665_v56 = vld [vmem:[#allocation3 + $0x14] ss:$0 sps:$4 sm:$0x11]   ;;  %v2006_v41 = vsel %vm1952_vm8, %v1933_v8, %v7681_v11 }
 0x289   : > { %v3723_v62 = vshll.u32 %v7748_v32, 16  ;;  %v3728_v59 = vshll.u32 %v5665_v56, 16  ;;  %v3721_v4 = vshrl.u32 %v7748_v32, 16  ;;  %v3935_v19 = vrot.slane %v7748_v32, 1 }
 0x28a   : > { %v1710_v16 = vpop.permute.xlu1 %1709  ;;  %v3515_v63 = vld [vmem:[#allocation3 + $0x8] sm:$0x1]  ;;  %v3936_v25 = vrot.slane %v5665_v56, 1  ;;  %v2008_v56 = vsel %vm1952_vm8, %v1935_v49, %v7727_v10 }
 0x28b   : > { %v1639_v57 = vpop.permute.xlu0 %1638  ;;  %v3516_v42 = vsel %vm7314_vm0, 0, %v3515_v63  ;;  %v3725_v38 = vrot.slane %v3723_v62, 1  ;;  %v3730_v47 = vrot.slane %v3728_v59, 1  ;;  %v2294_v35 = vsel %vm9156_vm12, %v2221_v9, %v1710_v16 }
 0x28c   : > { %3517 = vst [vmem:[#allocation3 + $0x8] sm:$0x1] %v3516_v42  ;;  %v2079_v16 = vsel %vm2025_vm9, %v2006_v41, %v7713_v2  ;;  %v2439_v59 = vshll.u32 %v2294_v35, 16  ;;  %v2844_v42 = vld [vmem:[#allocation3 + $0x6c] sm:$0x1]  ;;  %v2081_v2 = vsel %vm2025_vm9, %v2008_v56, %v1475_v46  ;;  %v7814_v10 = vsel %vm9452_vm3, %v3935_v19, %v3936_v25 }
 0x28d   : > { %v3726_v34 = vor.u32 %v3725_v38, %v3721_v4  ;;  %v2152_v63 = vsel %vm2098_vm10, %v2079_v16, %v1553_v14  ;;  %v2845_v23 = vsel %vm7314_vm0, 0, %v2844_v42  ;;  %v2437_v8 = vshrl.u32 %v2294_v35, 16 }
 0x28e   : > { %v1637_v28 = vpop.permute.xlu1 %1636  ;;  %v2225_v4 = vsel %vm9157_vm11, %v2152_v63, %v1639_v57  ;;  %2846 = vst [vmem:[#allocation3 + $0x6c] sm:$0x1] %v2845_v23  ;;  %v2441_v17 = vrot.slane %v2439_v59, 1  ;;  %v2842_v63 = vsel %vm7314_vm0, 0, %v2841_v61  ;;  %v2900_v59 = vld [vmem:[#allocation3 + $0x74] sm:$0x1] }
 0x28f   : > { %v1555_v58 = vpop.permute.xlu0 %1554  ;;  %v7783_v36 = vld [vmem:[#allocation3] sm:$0xff]   ;;  %v7788_v45 = vsel %vm799_vm2, %v3726_v34, %v3730_v47  ;;  %v2223_v29 = vsel %vm9157_vm11, %v2150_v53, %v1637_v28  ;;  %2843 = vst [vmem:[#allocation3 + $0x60] sm:$0x1] %v2842_v63  ;;  %vm9454_vm3 = vcmask 293888   ;;  %v3406_v61 = vld [vmem:[#allocation3 + $0x2c] sm:$0x1] }
 0x290   : > { %3902 = vrot.lane.b32.xlu1 %v7788_v45, %s5828_s16  ;;  %v3711_v11 = vshll.u32 %v7783_v36, 16  ;;  %v2154_v30 = vsel %vm2098_vm10, %v2081_v2, %v1555_v58  ;;  %v3709_v44 = vshrl.u32 %v7783_v36, 16  ;;  %v3932_v35 = vrot.slane %v7783_v36, 1  ;;  %v2897_v36 = vld [vmem:[#allocation3 + $0x68] sm:$0x1] }
 0x292   : > { %v1641_v62 = vpop.permute.xlu1 %1640  ;;  %v3713_v1 = vrot.slane %v3711_v11, 1 }
 0x293   : > { %v1714_v38 = vpop.permute.xlu0 %1713  ;;  %v5667_v14 = vld [vmem:[#allocation3 + $0x8] ss:$0 sps:$4 sm:$0x11]   ;;  %v2227_v46 = vsel %vm9157_vm11, %v2154_v30, %v1641_v62  ;;  %v2442_v62 = vor.u32 %v2441_v17, %v2437_v8  ;;  %v2898_v17 = vsel %vm7338_vm15, 0, %v2897_v36 }
 0x294   : > { %v2298_v50 = vsel %vm9156_vm12, %v2225_v4, %v1714_v38  ;;  %3982 = vrot.lane.b32.xlu1 %v7814_v10, %s5829_s27  ;;  %v3716_v37 = vshll.u32 %v5667_v14, 16  ;;  %v3714_v24 = vor.u32 %v3713_v1, %v3709_v44  ;;  %v3933_v26 = vrot.slane %v5667_v14, 1  ;;  %2899 = vst [vmem:[#allocation3 + $0x68] sm:$0x1] %v2898_v17 }
 0x295   : > { %v2449_v57 = vshll.u32 %v2298_v50, 16  ;;  %v2447_v9 = vshrl.u32 %v2298_v50, 16  ;;  %v2901_v50 = vsel %vm7338_vm15, 0, %v2900_v59 }
 0x296   : > { %v1716_v51 = vpop.permute.xlu1 %1715  ;;  %v3718_v22 = vrot.slane %v3716_v37, 1  ;;  %v3934_v30 = vsel %vm9453_vm4, %v3932_v35, %v3933_v26  ;;  %2902 = vst [vmem:[#allocation3 + $0x74] sm:$0x1] %v2901_v50 }
 0x297   : > { %v2300_v13 = vsel %vm9156_vm12, %v2227_v46, %v1716_v51  ;;  %v2451_v34 = vrot.slane %v2449_v57, 1  ;;  %v5522_v43 = vpop.f32.mrf.mxu0  ;;  %v1712_v54 = vpop.permute.xlu0 %1711 }
 0x298   : > { %v2453_v47 = vshll.u32 %v2300_v13, 16  ;;  %v2642_v52 = vadd.f32 %v5522_v43, %v7671_v39  ;;  %v2296_v18 = vsel %vm9156_vm12, %v2223_v29, %v1712_v54  ;;  %v3719_v16 = vsel %vm799_vm2, %v3714_v24, %v3718_v22  ;;  %vm9455_vm12 = vmmov %vm9454_vm3  ;;  %v3395_v24 = vld [vmem:[#allocation3 + $0x18] sm:$0xf] }
 0x299   : > { %v2452_v58 = vor.u32 %v2451_v34, %v2447_v9  ;;  %v2443_v41 = vshll.u32 %v2296_v18, 16  ;;  %v2633_v19 = vpop.f32.mrf.mxu0  ;;  %3900 = vrot.lane.b32.xlu0 %v3719_v16, %s5828_s16  ;;  %v3402_v9 = vld [vmem:[#allocation3 + $0x24] sm:$0xf] }
 0x29a   : > { %v7826_v25 = vpop.permute.xlu1 %1405  ;;  %v2455_v28 = vrot.slane %v2453_v47, 1  ;;  %v2766_v6 = vmax.f32 %v2642_v52, 0.0  ;;  %v2634_v49 = vadd.f32 %v7671_v39, %v2633_v19 }
 0x29b   : > { %v2445_v11 = vrot.slane %v2443_v41, 1  ;;  %v5523_v48 = vpop.f32.mrf.mxu0  ;;  %v7831_v56 = vpop.permute.xlu0 %1401 }
 0x29c   : > { %v5439_v42 = vpack.c.bf16 %v2766_v6, %v2766_v6  ;;  %v2764_v0 = vmax.f32 %v2634_v49, 0.0  ;;  %v2645_v2 = vadd.f32 %v5523_v48, %v7671_v39  ;;  %v2456_v46 = vsel %vm799_vm2, %v2452_v58, %v2455_v28 }
 0x29d   : > { %v2636_v4 = vpop.f32.mrf.mxu0  ;;  %v2446_v23 = vsel %vm799_vm2, %v2442_v62, %v2445_v11  ;;  %3980 = vrot.lane.b32.xlu0 %v3934_v30, %s5829_s27 }
 0x29e   : > { %v7837_v38 = vpop.permute.xlu1 %1403  ;;  %v3071_v14 = vshrl.u32 %v5439_v42, 16  ;;  %v5437_v1 = vpack.c.bf16 %v2764_v0, %v2764_v0  ;;  %v2767_v53 = vmax.f32 %v2645_v2, 0.0  ;;  %5540 = vmatprep.mubr.msk.bf16.mxu0 %vm9454_vm3, %v2446_v23  ;;  %v2637_v57 = vadd.f32 %v7671_v39, %v2636_v4 }
 0x29f   : > { %5541 = vmatmul.mubr.msk.bf16.gmra.mxu0 %vm9455_vm12, %v2456_v46  ;;  %v7848_v51 = vpop.permute.xlu0 %1476  ;;  %v3074_v44 = vshll.u32 %v5439_v42, 16  ;;  %v3399_v42 = vld [vmem:[#allocation3 + $0x20] sm:$0x1]  ;;  %v9457_v46 = vld [vmem:[#allocation130_spill] sm:$0xff]  ;;  %vm9468_vm12 = vcmask 261120   ;;  %vm4806_vm3 = vcmask 1043456  }
 0x2a0   : > { %v3073_v13 = vrot.slane %v3071_v14, 7  ;;  %v3054_v37 = vshrl.u32 %v5437_v1, 16  ;;  %v5440_v29 = vpack.c.bf16 %v2767_v53, %v2767_v53  ;;  %v2765_v34 = vmax.f32 %v2637_v57, 0.0  ;;  %vm9469_vm4 = vmmov %vm9468_vm12 }
 0x2a1   : > { %v3057_v52 = vshll.u32 %v5437_v1, 16  ;;  %4017 = vrot.lane.b32.xlu0 %v7748_v32, %s5830_s28  ;;  %v9456_v1 = vld [vmem:[#allocation103_spill] sm:$0xff] }
 0x2a2   : > { %v1557_v47 = vpop.permute.xlu1 %1556  ;;  %v3076_v43 = vor.u32 %v3074_v44, %v3073_v13  ;;  %v3056_v54 = vrot.slane %v3054_v37, 7  ;;  %v3079_v18 = vshrl.u32 %v5440_v29, 16  ;;  %v5438_v22 = vpack.c.bf16 %v2765_v34, %v2765_v34  ;;  %v9459_v37 = vld [vmem:[#allocation102_spill] sm:$0xff]  ;;  %v9461_v34 = vld [vmem:[#allocation105_spill] sm:$0xff] }
 0x2a3   : > { %v7854_v8 = vpop.permute.xlu0 %1480  ;;  %v3082_v26 = vshll.u32 %v5440_v29, 16  ;;  %v3077_v49 = vrot.slane %v3073_v13, 4  ;;  %v1791_v53 = vsel %vm1733_vm6, %v9370_v3, %v9456_v1  ;;  %v9458_v13 = vld [vmem:[#allocation149_spill] sm:$0xff]  ;;  %v9460_v29 = vld [vmem:[#allocation104_spill] sm:$0xff] }
 0x2a4   : > { %v3403_v58 = vsel %vm7707_vm14, %v3076_v43, %v3402_v9  ;;  %v3059_v41 = vor.u32 %v3057_v52, %v3056_v54  ;;  %v3081_v19 = vrot.slane %v3079_v18, 7  ;;  %v3062_v28 = vshrl.u32 %v5438_v22, 16  ;;  %v9462_v18 = vld [vmem:[#allocation129_spill] sm:$0xff] }
 0x2a5   : > { %3404 = vst [vmem:[#allocation3 + $0x24] sm:$0xf] %v3403_v58  ;;  %v3065_v48 = vshll.u32 %v5438_v22, 16  ;;  %4064 = vrot.lane.b32.xlu0 %v7788_v45, %s5831_s30  ;;  %v3060_v0 = vrot.slane %v3056_v54, 4  ;;  %v1864_v57 = vsel %vm1806_vm5, %v1791_v53, %v9457_v46  ;;  %v1797_v9 = vsel %vm1733_vm6, %v9390_v55, %v9460_v29  ;;  %v9463_v22 = vld [vmem:[#allocation131_spill] sm:$0xff]  ;;  %v9464_v58 = vld [vmem:[#allocation132_spill] sm:$0xff] }
 0x2a6   : > { %v1479_v6 = vpop.permute.xlu1 %1478  ;;  %v3396_v16 = vsel %vm7707_vm14, %v3059_v41, %v3395_v24  ;;  %v3084_v62 = vor.u32 %v3082_v26, %v3081_v19  ;;  %v3086_v11 = vrot.slane %v3081_v19, 4  ;;  %v3064_v32 = vrot.slane %v3062_v28, 7  ;;  %v9466_v26 = vld [vmem:[#allocation151_spill] sm:$0xff] }
 0x2a7   : > { %3397 = vst [vmem:[#allocation3 + $0x18] sm:$0xf] %v3396_v16  ;;  %v1408_v35 = vpop.permute.xlu0 %1407  ;;  %v1937_v44 = vsel %vm1879_vm7, %v1864_v57, %v9458_v13  ;;  %v1795_v43 = vsel %vm1733_vm6, %v9374_v5, %v9461_v34  ;;  %v9465_v5 = vld [vmem:[#allocation148_spill] sm:$0xff] }
 0x2a8   : > { %v3085_v63 = vsel %vm7719_vm13, %v3077_v49, %v3084_v62  ;;  %v3407_v59 = vsel %vm7314_vm0, %v3086_v11, %v3406_v61  ;;  %v3067_v2 = vor.u32 %v3065_v48, %v3064_v32  ;;  %v3069_v4 = vrot.slane %v3064_v32, 4  ;;  %v7957_v34 = vld [vmem:[#allocation2 + $0x24] sm:$0xfe]  }
 0x2a9   : > { %3405 = vst.msk [vmem:[#allocation3 + $0x28] sm:$0xf] %vm411_vm1, %v3085_v63  ;;  %3408 = vst [vmem:[#allocation3 + $0x2c] sm:$0x1] %v3407_v59  ;;  %4099 = vrot.lane.b32.xlu0 %v7814_v10, %s5832_s8  ;;  %v1793_v10 = vsel %vm1733_vm6, %v9375_v12, %v9459_v37  ;;  %v2010_v3 = vsel %vm1952_vm8, %v1937_v44, %v7831_v56  ;;  %v1870_v12 = vsel %vm1806_vm5, %v1797_v9, %v9463_v22 }
 0x2aa   : > { %v1643_v23 = vpop.permute.xlu1 %1642  ;;  %v3068_v30 = vsel %vm7719_vm13, %v3060_v0, %v3067_v2  ;;  %v3400_v45 = vsel %vm7314_vm0, %v3069_v4, %v3399_v42  ;;  %v1866_v24 = vsel %vm1806_vm5, %v1793_v10, %v9462_v18  ;;  %v1868_v41 = vsel %vm1806_vm5, %v1795_v43, %v9464_v58 }
 0x2ab   : > { %v1561_v50 = vpop.permute.xlu0 %1560  ;;  %3398 = vst.msk [vmem:[#allocation3 + $0x1c] sm:$0xf] %vm411_vm1, %v3068_v30  ;;  %3401 = vst [vmem:[#allocation3 + $0x20] sm:$0x1] %v3400_v45  ;;  %v2083_v55 = vsel %vm2025_vm9, %v2010_v3, %v7848_v51  ;;  %v1939_v56 = vsel %vm1879_vm7, %v1866_v24, %v9465_v5  ;;  %v1941_v61 = vsel %vm1879_vm7, %v1868_v41, %v9466_v26  ;;  %v9467_v51 = vld [vmem:[#allocation150_spill] sm:$0xff] }
 0x2ac   : > { %v2156_v28 = vsel %vm2098_vm10, %v2083_v55, %v1557_v47  ;;  %v1943_v62 = vsel %vm1879_vm7, %v1870_v12, %v9467_v51  ;;  %v2014_v11 = vsel %vm1952_vm8, %v1941_v61, %v7826_v25  ;;  %v2012_v63 = vsel %vm1952_vm8, %v1939_v56, %v7837_v38  ;;  %v5697_v61 = vld [vmem:[%s9015_s4 + $0x8] sm:$0xff]  }
 0x2ad   : > { %v2229_v32 = vsel %vm9157_vm11, %v2156_v28, %v1643_v23  ;;  %v2087_v4 = vsel %vm2025_vm9, %v2014_v11, %v7854_v8  ;;  %v2085_v25 = vsel %vm2025_vm9, %v2012_v63, %v1479_v6  ;;  %v2016_v23 = vsel %vm1952_vm8, %v1943_v62, %v1408_v35  ;;  %v2850_v6 = vld [vmem:[#allocation3 + $0x84] sm:$0x1]  ;;  %v7976_v51 = vld [vmem:[#allocation2 + $0x2c] ss:$0 sps:$4 sm:$0x11]  }
 0x2ae   : > { %v1559_v36 = vpop.permute.xlu1 %1558  ;;  %v2160_v30 = vsel %vm2098_vm10, %v2087_v4, %v1561_v50  ;;  %v2851_v37 = vsel %vm7314_vm0, 0, %v2850_v6  ;;  %v4381_v62 = vrot.slane %v7957_v34, 1  ;;  %v2903_v34 = vld [vmem:[#allocation3 + $0x80] sm:$0x1] }
 0x2af   : > { %v1483_v14 = vpop.permute.xlu0 %1482  ;;  %v2158_v45 = vsel %vm2098_vm10, %v2085_v25, %v1559_v36  ;;  %2852 = vst [vmem:[#allocation3 + $0x84] sm:$0x1] %v2851_v37 }
 0x2b0   : > { %v7920_v47 = vld [vmem:[#allocation3 + $0x24] sm:$0xff]   ;;  %v7934_v46 = vld [vmem:[#allocation3 + $0x2c] ss:$0 sps:$4 sm:$0x11]   ;;  %v2089_v57 = vsel %vm2025_vm9, %v2016_v23, %v1483_v14  ;;  %v5694_v14 = vld [vmem:[%s9015_s4 + $0x10] ss:$0 sps:$4 sm:$0xff]  }
 0x2b1   : > { %v3747_v8 = vshll.u32 %v7920_v47, 16  ;;  %v3941_v9 = vrot.slane %v7920_v47, 1  ;;  %5591 = vmatprep.subr.msk.bf16.mxu1 %vm4806_vm3, %v5694_v14  ;;  %v4808_v18 = vsel %vm4806_vm3, %v5694_v14, 0 }
 0x2b2   : > { %v1718_v17 = vpop.permute.xlu1 %1717  ;;  %v7892_v52 = vld [vmem:[#allocation3 + $0x18] sm:$0xff]   ;;  %v7902_v19 = vld [vmem:[#allocation3 + $0x20] ss:$0 sps:$4 sm:$0x11]   ;;  %5553 = vmatpush3.bf16.msra.mxu1 %v4808_v18 }
 0x2b3   : > { %v1647_v54 = vpop.permute.xlu0 %1646  ;;  %4019 = vrot.lane.b32.xlu1 %v7892_v52, %s5830_s28  ;;  %4136 = vrot.lane.b32.xlu0 %v7892_v52, %s5833_s11  ;;  %v3735_v16 = vshll.u32 %v7892_v52, 16  ;;  %v3740_v48 = vshll.u32 %v7902_v19, 16  ;;  %v7925_v59 = vsel %vm9468_vm12, %v2229_v32, %v1718_v17  ;;  %v3733_v0 = vshrl.u32 %v7892_v52, 16  ;;  %vm9470_vm12 = vmmov %vm9469_vm4 }
 0x2b4   : > { %v2459_v17 = vshll.u32 %v7925_v59, 16  ;;  %v2233_v13 = vsel %vm9157_vm11, %v2160_v30, %v1647_v54  ;;  %v3938_v50 = vrot.slane %v7892_v52, 1  ;;  %v3939_v36 = vrot.slane %v7902_v19, 1  ;;  %vm9472_vm3 = vmmov %vm9470_vm12  ;;  %5554 = vmatprep.subr.bf16.mxu1 %v5697_v61 }
 0x2b5   : > { %v3737_v2 = vrot.slane %v3735_v16, 1  ;;  %v3742_v53 = vrot.slane %v3740_v48, 1  ;;  %v3942_v52 = vrot.slane %v7934_v46, 1  ;;  %v3749_v58 = vrot.slane %v3747_v8, 1 }
 0x2b6   : > { %v1645_v49 = vpop.permute.xlu1 %1644  ;;  %v2461_v24 = vrot.slane %v2459_v17, 1  ;;  %v3745_v16 = vshrl.u32 %v7920_v47, 16  ;;  %v2457_v11 = vshrl.u32 %v7925_v59, 16  ;;  %5555 = vmatpush3.bf16.msra.mxu1 %v5697_v61  ;;  %v5698_v17 = vld [vmem:[%s9015_s4] sm:$0xff]  }
 0x2b7   : > { %v1563_v42 = vpop.permute.xlu0 %1562  ;;  %v3738_v38 = vor.u32 %v3737_v2, %v3733_v0  ;;  %v2231_v22 = vsel %vm9157_vm11, %v2158_v45, %v1645_v49  ;;  %v3752_v0 = vshll.u32 %v7934_v46, 16  ;;  %v2847_v2 = vld [vmem:[#allocation3 + $0x78] sm:$0x1]  ;;  %v2906_v46 = vld [vmem:[#allocation3 + $0x8c] sm:$0x1]  ;;  %5556 = vmatprep.subr.bf16.mxu1 %v5698_v17 }
 0x2b8   : > { %v2162_v10 = vsel %vm2098_vm10, %v2089_v57, %v1563_v42  ;;  %v2848_v30 = vsel %vm7314_vm0, 0, %v2847_v2  ;;  %v2462_v45 = vor.u32 %v2461_v24, %v2457_v11  ;;  %v3750_v57 = vor.u32 %v3749_v58, %v3745_v16 }
 0x2b9   : > { %v7941_v35 = vsel %vm799_vm2, %v3738_v38, %v3742_v53  ;;  %2849 = vst [vmem:[#allocation3 + $0x78] sm:$0x1] %v2848_v30 }
 0x2ba   : > { %v1649_v1 = vpop.permute.xlu1 %1648  ;;  %4066 = vrot.lane.b32.xlu1 %v7941_v35, %s5831_s30  ;;  %4183 = vrot.lane.b32.xlu0 %v7941_v35, %s5834_s12 }
 0x2bb   : > { %v1722_v44 = vpop.permute.xlu0 %1721  ;;  %v2235_v43 = vsel %vm9157_vm11, %v2162_v10, %v1649_v1  ;;  %v3754_v10 = vrot.slane %v3752_v0, 1  ;;  %5557 = vmatpush3.bf16.msra.mxu1 %v5698_v17 }
 0x2bc   : > { %v2306_v29 = vsel %vm9469_vm4, %v2233_v13, %v1722_v44  ;;  %vm9471_vm4 = vcmask 1046528   ;;  %v4382_v44 = vrot.slane %v7976_v51, 1 }
 0x2bd   : > { %v2469_v3 = vshll.u32 %v2306_v29, 16  ;;  %v2467_v41 = vshrl.u32 %v2306_v29, 16  ;;  %v7964_v26 = vsel %vm9471_vm4, %v3938_v50, %v3939_v36  ;;  %v5675_v50 = vld [vmem:[#allocation2 + $0x20] ss:$0 sps:$4 sm:$0x11]  }
 0x2be   : > { %v1724_v54 = vpop.permute.xlu1 %1723  ;;  %4101 = vrot.lane.b32.xlu1 %v7964_v26, %s5832_s8  ;;  %4218 = vrot.lane.b32.xlu0 %v7964_v26, %s5835_s18  ;;  %v5674_v29 = vld [vmem:[#allocation2 + $0x18] sm:$0xfe]  }
 0x2bf   : > { %v2308_v12 = vsel %vm9470_vm12, %v2235_v43, %v1724_v54  ;;  %v2471_v55 = vrot.slane %v2469_v3, 1  ;;  %v5526_v5 = vpop.f32.mrf.mxu0  ;;  %v1720_v56 = vpop.permute.xlu0 %1719  ;;  %vm9473_vm12 = vmmov %vm9471_vm4  ;;  %vm9474_vm4 = vcmask 293888  }
 0x2c0   : > { %v2473_v19 = vshll.u32 %v2308_v12, 16  ;;  %v2658_v28 = vadd.f32 %v5526_v5, %v7671_v39  ;;  %v2304_v49 = vsel %vm9472_vm3, %v2231_v22, %v1720_v56  ;;  %v7989_v53 = vsel %vm9473_vm12, %v3941_v9, %v3942_v52  ;;  %vm9475_vm3 = vmmov %vm9474_vm4  ;;  %v3416_v5 = vld [vmem:[#allocation3 + $0x3c] sm:$0xf] }
 0x2c1   : > { %v2472_v32 = vor.u32 %v2471_v55, %v2467_v41  ;;  %v2463_v48 = vshll.u32 %v2304_v49, 16  ;;  %v2649_v63 = vpop.f32.mrf.mxu0  ;;  %v2907_v9 = vsel %vm7338_vm15, 0, %v2906_v46  ;;  %v3755_v22 = vsel %vm799_vm2, %v3750_v57, %v3754_v10 }
 0x2c2   : > { %v7980_v42 = vpop.permute.xlu1 %1413  ;;  %v2475_v4 = vrot.slane %v2473_v19, 1  ;;  %v2770_v25 = vmax.f32 %v2658_v28, 0.0  ;;  %v2650_v23 = vadd.f32 %v7671_v39, %v2649_v63  ;;  %4138 = vrot.lane.b32.xlu1 %v7920_v47, %s5833_s11  ;;  %4220 = vrot.lane.b32.xlu0 %v7989_v53, %s5835_s18  ;;  %2908 = vst [vmem:[#allocation3 + $0x8c] sm:$0x1] %v2907_v9  ;;  %v2904_v12 = vsel %vm7338_vm15, 0, %v2903_v34 }
 0x2c3   : > { %v2465_v1 = vrot.slane %v2463_v48, 1  ;;  %v5527_v59 = vpop.f32.mrf.mxu0  ;;  %v7986_v38 = vpop.permute.xlu0 %1409  ;;  %2905 = vst [vmem:[#allocation3 + $0x80] sm:$0x1] %v2904_v12  ;;  %v4383_v61 = vsel %vm9473_vm12, %v4381_v62, %v4382_v44  ;;  %v4378_v28 = vrot.slane %v5674_v29, 1  ;;  %v4379_v49 = vrot.slane %v5675_v50, 1 }
 0x2c4   : > { %v5443_v13 = vpack.c.bf16 %v2770_v25, %v2770_v25  ;;  %v2768_v8 = vmax.f32 %v2650_v23, 0.0  ;;  %v2661_v6 = vadd.f32 %v5527_v59, %v7671_v39  ;;  %v2476_v52 = vsel %vm799_vm2, %v2472_v32, %v2475_v4  ;;  %v3409_v48 = vld [vmem:[#allocation3 + $0x30] sm:$0xf]  ;;  %v3420_v62 = vld [vmem:[#allocation3 + $0x44] sm:$0x1] }
 0x2c5   : > { %v2652_v36 = vpop.f32.mrf.mxu0  ;;  %v2466_v14 = vsel %vm799_vm2, %v2462_v45, %v2465_v1  ;;  %v3413_v50 = vld [vmem:[#allocation3 + $0x38] sm:$0x1] }
 0x2c6   : > { %v8000_v37 = vpop.permute.xlu1 %1411  ;;  %v3105_v43 = vshrl.u32 %v5443_v13, 16  ;;  %v5441_v3 = vpack.c.bf16 %v2768_v8, %v2768_v8  ;;  %v2771_v54 = vmax.f32 %v2661_v6, 0.0  ;;  %5544 = vmatprep.mubr.msk.bf16.mxu0 %vm9474_vm4, %v2466_v14  ;;  %v2653_v18 = vadd.f32 %v7671_v39, %v2652_v36  ;;  %4185 = vrot.lane.b32.xlu1 %v3755_v22, %s5834_s12  ;;  %vm9476_vm4 = vmmov %vm9473_vm12 }
 0x2c7   : > { %5545 = vmatmul.mubr.msk.bf16.gmra.mxu0 %vm9475_vm3, %v2476_v52  ;;  %v8009_v24 = vpop.permute.xlu0 %1484  ;;  %v3108_v41 = vshll.u32 %v5443_v13, 16  ;;  %3906 = vrot.lane.b32.xlu0 %v3755_v22, %s5828_s16  ;;  %v4380_v1 = vsel %vm9476_vm4, %v4378_v28, %v4379_v49  ;;  %v9483_v49 = vld [vmem:[#allocation133_spill] sm:$0xff]  ;;  %vm9488_vm3 = vcmask 261120  }
 0x2c8   : > { %v3107_v58 = vrot.slane %v3105_v43, 7  ;;  %v3088_v55 = vshrl.u32 %v5441_v3, 16  ;;  %v5444_v19 = vpack.c.bf16 %v2771_v54, %v2771_v54  ;;  %v2769_v39 = vmax.f32 %v2653_v18, 0.0  ;;  %v9477_v54 = vld [vmem:[#allocation107_spill] sm:$0xff]  ;;  %v9478_v18 = vld [vmem:[#allocation134_spill] sm:$0xff]  ;;  %vm9490_vm12 = vmmov %vm9488_vm3 }
 0x2c9   : > { %v3091_v11 = vshll.u32 %v5441_v3, 16  ;;  %v1799_v52 = vsel %vm1733_vm6, %v9395_v40, %v9477_v54  ;;  %v2856_v54 = vld [vmem:[#allocation3 + $0x9c] sm:$0x1]  ;;  %vm9491_vm4 = vmmov %vm9488_vm3 }
 0x2ca   : > { %v8016_v56 = vpop.permute.xlu1 %1564  ;;  %v3110_v16 = vor.u32 %v3108_v41, %v3107_v58  ;;  %v3090_v51 = vrot.slane %v3088_v55, 7  ;;  %v3113_v32 = vshrl.u32 %v5444_v19, 16  ;;  %v5442_v63 = vpack.c.bf16 %v2769_v39, %v2769_v39  ;;  %3904 = vrot.lane.b32.xlu1 %v7941_v35, %s5828_s16  ;;  %v9479_v41 = vld [vmem:[#allocation152_spill] sm:$0xff] }
 0x2cb   : > { %v8019_v0 = vpop.permute.xlu0 %1488  ;;  %v3116_v23 = vshll.u32 %v5444_v19, 16  ;;  %4428 = vrot.lane.b32.xlu0 %v4383_v61, %s5836_s15  ;;  %v3111_v59 = vrot.slane %v3107_v58, 4  ;;  %v1872_v12 = vsel %vm1806_vm5, %v1799_v52, %v9478_v18  ;;  %v9481_v19 = vld [vmem:[#allocation109_spill] sm:$0xff]  ;;  %v9482_v61 = vld [vmem:[#allocation108_spill] sm:$0xff]  ;;  %v2857_v18 = vsel %vm7314_vm0, 0, %v2856_v54 }
 0x2cc   : > { %v3417_v2 = vsel %vm7707_vm14, %v3110_v16, %v3416_v5  ;;  %v3093_v4 = vor.u32 %v3091_v11, %v3090_v51  ;;  %v3115_v25 = vrot.slane %v3113_v32, 7  ;;  %v3096_v30 = vshrl.u32 %v5442_v63, 16  ;;  %v9485_v32 = vld [vmem:[#allocation135_spill] sm:$0xff]  ;;  %2858 = vst [vmem:[#allocation3 + $0x9c] sm:$0x1] %v2857_v18 }
 0x2cd   : > { %3418 = vst [vmem:[#allocation3 + $0x3c] sm:$0xf] %v3417_v2  ;;  %v3099_v8 = vshll.u32 %v5442_v63, 16  ;;  %v3094_v36 = vrot.slane %v3090_v51, 4  ;;  %v1803_v40 = vsel %vm1733_vm6, %v9401_v31, %v9481_v19  ;;  %v1805_v28 = vsel %vm1733_vm6, %v9418_v15, %v9482_v61  ;;  %v9484_v51 = vld [vmem:[#allocation136_spill] sm:$0xff] }
 0x2ce   : > { %v8026_v45 = vpop.permute.xlu1 %1486  ;;  %v3410_v57 = vsel %vm7707_vm14, %v3093_v4, %v3409_v48  ;;  %v3118_v46 = vor.u32 %v3116_v23, %v3115_v25  ;;  %v3120_v17 = vrot.slane %v3115_v25, 4  ;;  %v3098_v13 = vrot.slane %v3096_v30, 7  ;;  %4426 = vrot.lane.b32.xlu1 %v4380_v1, %s5836_s15  ;;  %v9486_v48 = vld [vmem:[#allocation154_spill] sm:$0xff] }
 0x2cf   : > { %3411 = vst [vmem:[#allocation3 + $0x30] sm:$0xf] %v3410_v57  ;;  %v1416_v35 = vpop.permute.xlu0 %1415  ;;  %4021 = vrot.lane.b32.xlu0 %v7920_v47, %s5830_s28 }
 0x2d0   : > { %v3119_v6 = vsel %vm7719_vm13, %v3111_v59, %v3118_v46  ;;  %v3421_v44 = vsel %vm7314_vm0, %v3120_v17, %v3420_v62  ;;  %v3101_v14 = vor.u32 %v3099_v8, %v3098_v13  ;;  %v3103_v10 = vrot.slane %v3098_v13, 4  ;;  %v9489_v13 = vld [vmem:[#allocation153_spill] sm:$0xff] }
 0x2d1   : > { %3419 = vst.msk [vmem:[#allocation3 + $0x40] sm:$0xf] %vm411_vm1, %v3119_v6  ;;  %3422 = vst [vmem:[#allocation3 + $0x44] sm:$0x1] %v3421_v44 }
 0x2d2   : > { %v1651_v29 = vpop.permute.xlu1 %1650  ;;  %v3102_v9 = vsel %vm7719_vm13, %v3094_v36, %v3101_v14  ;;  %v3414_v34 = vsel %vm7314_vm0, %v3103_v10, %v3413_v50  ;;  %3984 = vrot.lane.b32.xlu1 %v7964_v26, %s5829_s27  ;;  %v1945_v26 = vsel %vm1879_vm7, %v1872_v12, %v9479_v41  ;;  %v8128_v41 = vld [vmem:[#allocation2 + $0x3c] sm:$0xfe]  }
 0x2d3   : > { %v1569_v43 = vpop.permute.xlu0 %1568  ;;  %3412 = vst.msk [vmem:[#allocation3 + $0x34] sm:$0xf] %vm411_vm1, %v3102_v9  ;;  %3415 = vst [vmem:[#allocation3 + $0x38] sm:$0x1] %v3414_v34  ;;  %4068 = vrot.lane.b32.xlu0 %v3755_v22, %s5831_s30  ;;  %v9480_v22 = vld [vmem:[#allocation106_spill] sm:$0xff]  ;;  %v2018_v5 = vsel %vm1952_vm8, %v1945_v26, %v7986_v38  ;;  %v1878_v38 = vsel %vm1806_vm5, %v1805_v28, %v9485_v32 }
 0x2d4   : > { %v1801_v55 = vsel %vm1733_vm6, %v9403_v7, %v9480_v22  ;;  %v1876_v7 = vsel %vm1806_vm5, %v1803_v40, %v9484_v51  ;;  %v2091_v11 = vsel %vm2025_vm9, %v2018_v5, %v8009_v24  ;;  %v9487_v24 = vld [vmem:[#allocation21_spill] sm:$0xff]  ;;  %v1951_v8 = vsel %vm1879_vm7, %v1878_v38, %v9489_v13 }
 0x2d5   : > { %v1874_v16 = vsel %vm1806_vm5, %v1801_v55, %v9483_v49  ;;  %v1949_v63 = vsel %vm1879_vm7, %v1876_v7, %v9486_v48  ;;  %v2164_v2 = vsel %vm2098_vm10, %v2091_v11, %v8016_v56  ;;  %v2024_v44 = vsel %vm1952_vm8, %v1951_v8, %v1416_v35  ;;  %v8141_v11 = vld [vmem:[%s9014_s3] ss:$0 sm:$0xff]  ;;  %v5681_v48 = vld [vmem:[#allocation2 + $0x44] ss:$0 sps:$4 sm:$0x11]  }
 0x2d6   : > { %v1567_v47 = vpop.permute.xlu1 %1566  ;;  %3986 = vrot.lane.b32.xlu1 %v7989_v53, %s5829_s27  ;;  %v1947_v25 = vsel %vm1879_vm7, %v1874_v16, %v9487_v24  ;;  %v2022_v23 = vsel %vm1952_vm8, %v1949_v63, %v7980_v42  ;;  %v2237_v62 = vsel %vm9157_vm11, %v2164_v2, %v1651_v29  ;;  %v4387_v63 = vrot.slane %v8128_v41, 1 }
 0x2d7   : > { %v1491_v3 = vpop.permute.xlu0 %1490  ;;  %4103 = vrot.lane.b32.xlu0 %v7989_v53, %s5832_s8  ;;  %v2020_v56 = vsel %vm1952_vm8, %v1947_v25, %v8000_v37  ;;  %v2095_v42 = vsel %vm2025_vm9, %v2022_v23, %v8019_v0  ;;  %v2853_v23 = vld [vmem:[#allocation3 + $0x90] sm:$0x1] }
 0x2d8   : > { %v8093_v1 = vld [vmem:[#allocation3 + $0x3c] sm:$0xff]   ;;  %v2093_v6 = vsel %vm2025_vm9, %v2020_v56, %v8026_v45  ;;  %v2168_v37 = vsel %vm2098_vm10, %v2095_v42, %v1569_v43  ;;  %v8109_v10 = vld [vmem:[#allocation3 + $0x44] ss:$0 sps:$4 sm:$0x11]   ;;  %v2097_v29 = vsel %vm2025_vm9, %v2024_v44, %v1491_v3 }
 0x2d9   : > { %v3771_v0 = vshll.u32 %v8093_v1, 16  ;;  %v2166_v12 = vsel %vm2098_vm10, %v2093_v6, %v1567_v47  ;;  %v3947_v19 = vrot.slane %v8093_v1, 1  ;;  %v3948_v47 = vrot.slane %v8109_v10, 1  ;;  %v2912_v42 = vld [vmem:[#allocation3 + $0xa4] sm:$0x1] }
 0x2da   : > { %v1726_v58 = vpop.permute.xlu1 %1725  ;;  %v8066_v53 = vld [vmem:[#allocation3 + $0x30] sm:$0xff]   ;;  %v5677_v31 = vld [vmem:[#allocation3 + $0x38] ss:$0 sps:$4 sm:$0x11]   ;;  %v3769_v38 = vshrl.u32 %v8093_v1, 16  ;;  %v3776_v25 = vshll.u32 %v8109_v10, 16 }
 0x2db   : > { %v1655_v39 = vpop.permute.xlu0 %1654  ;;  %4023 = vrot.lane.b32.xlu1 %v8066_v53, %s5830_s28  ;;  %4140 = vrot.lane.b32.xlu0 %v8066_v53, %s5833_s11  ;;  %v3759_v4 = vshll.u32 %v8066_v53, 16  ;;  %v3764_v30 = vshll.u32 %v5677_v31, 16  ;;  %v8098_v59 = vsel %vm9488_vm3, %v2237_v62, %v1726_v58  ;;  %v3757_v46 = vshrl.u32 %v8066_v53, 16 }
 0x2dc   : > { %v2479_v9 = vshll.u32 %v8098_v59, 16  ;;  %v2241_v34 = vsel %vm9157_vm11, %v2168_v37, %v1655_v39  ;;  %v3944_v35 = vrot.slane %v8066_v53, 1  ;;  %v3945_v43 = vrot.slane %v5677_v31, 1 }
 0x2dd   : > { %v3761_v17 = vrot.slane %v3759_v4, 1  ;;  %v3766_v14 = vrot.slane %v3764_v30, 1  ;;  %v3773_v53 = vrot.slane %v3771_v0, 1  ;;  %vm9492_vm3 = vcmask 1046528   ;;  %v2909_v0 = vld [vmem:[#allocation3 + $0x98] sm:$0x1] }
 0x2de   : > { %v1653_v15 = vpop.permute.xlu1 %1652  ;;  %v2481_v40 = vrot.slane %v2479_v9, 1  ;;  %v8136_v7 = vsel %vm9492_vm3, %v3944_v35, %v3945_v43  ;;  %v2477_v2 = vshrl.u32 %v8098_v59, 16  ;;  %v4388_v9 = vrot.slane %v5681_v48, 1  ;;  %v3434_v48 = vld [vmem:[#allocation3 + $0x5c] sm:$0x1] }
 0x2df   : > { %v1571_v57 = vpop.permute.xlu0 %1570  ;;  %v3762_v36 = vor.u32 %v3761_v17, %v3757_v46  ;;  %v2239_v5 = vsel %vm9157_vm11, %v2166_v12, %v1653_v15  ;;  %v3774_v59 = vor.u32 %v3773_v53, %v3769_v38 }
 0x2e0   : > { %v2170_v3 = vsel %vm2098_vm10, %v2097_v29, %v1571_v57  ;;  %v2854_v57 = vsel %vm7314_vm0, 0, %v2853_v23  ;;  %v2482_v46 = vor.u32 %v2481_v40, %v2477_v2  ;;  %v3778_v29 = vrot.slane %v3776_v25, 1 }
 0x2e1   : > { %v8116_v45 = vsel %vm799_vm2, %v3762_v36, %v3766_v14  ;;  %2855 = vst [vmem:[#allocation3 + $0x90] sm:$0x1] %v2854_v57  ;;  %v2913_v36 = vsel %vm7338_vm15, 0, %v2912_v42 }
 0x2e2   : > { %v1657_v50 = vpop.permute.xlu1 %1656  ;;  %4070 = vrot.lane.b32.xlu1 %v8116_v45, %s5831_s30  ;;  %4187 = vrot.lane.b32.xlu0 %v8116_v45, %s5834_s12  ;;  %2914 = vst [vmem:[#allocation3 + $0xa4] sm:$0x1] %v2913_v36  ;;  %v3779_v12 = vsel %vm799_vm2, %v3774_v59, %v3778_v29  ;;  %v2862_v29 = vld [vmem:[#allocation3 + $0xb4] sm:$0x1] }
 0x2e3   : > { %v1730_v52 = vpop.permute.xlu0 %1729  ;;  %v2243_v26 = vsel %vm9157_vm11, %v2170_v3, %v1657_v50  ;;  %v5683_v50 = vld [vmem:[#allocation2 + $0x38] ss:$0 sps:$4 sm:$0x11]   ;;  %v2910_v3 = vsel %vm7338_vm15, 0, %v2909_v0 }
 0x2e4   : > { %v2314_v58 = vsel %vm9490_vm12, %v2241_v34, %v1730_v52  ;;  %vm9493_vm12 = vmmov %vm9491_vm4  ;;  %v5682_v34 = vld [vmem:[#allocation2 + $0x30] sm:$0xfe]   ;;  %2911 = vst [vmem:[#allocation3 + $0x98] sm:$0x1] %v2910_v3 }
 0x2e5   : > { %v2489_v22 = vshll.u32 %v2314_v58, 16  ;;  %v2487_v61 = vshrl.u32 %v2314_v58, 16  ;;  %v4384_v40 = vrot.slane %v5682_v34, 1 }
 0x2e6   : > { %v1732_v55 = vpop.permute.xlu1 %1731  ;;  %4105 = vrot.lane.b32.xlu1 %v8136_v7, %s5832_s8  ;;  %4222 = vrot.lane.b32.xlu0 %v8136_v7, %s5835_s18 }
 0x2e7   : > { %v2316_v39 = vsel %vm9491_vm4, %v2243_v26, %v1732_v55  ;;  %v2491_v28 = vrot.slane %v2489_v22, 1  ;;  %v5530_v16 = vpop.f32.mrf.mxu0  ;;  %v1728_v51 = vpop.permute.xlu0 %1727  ;;  %vm9494_vm4 = vmmov %vm9492_vm3  ;;  %vm9495_vm3 = vcmask 293888   ;;  %v3430_v55 = vld [vmem:[#allocation3 + $0x54] sm:$0xf] }
 0x2e8   : > { %v2493_v49 = vshll.u32 %v2316_v39, 16  ;;  %v2674_v31 = vadd.f32 %v8141_v11, %v5530_v16  ;;  %v2312_v32 = vsel %vm9493_vm12, %v2239_v5, %v1728_v51  ;;  %v8157_v8 = vsel %vm9494_vm4, %v3947_v19, %v3948_v47  ;;  %vm9496_vm12 = vmmov %vm9495_vm3 }
 0x2e9   : > { %v2492_v15 = vor.u32 %v2491_v28, %v2487_v61  ;;  %v2483_v4 = vshll.u32 %v2312_v32, 16  ;;  %v2665_v24 = vpop.f32.mrf.mxu0  ;;  %v4389_v47 = vsel %vm9494_vm4, %v4387_v63, %v4388_v9  ;;  %v4385_v5 = vrot.slane %v5683_v50, 1 }
 0x2ea   : > { %v2495_v62 = vrot.slane %v2493_v49, 1  ;;  %v2774_v30 = vmax.f32 %v2674_v31, 0.0  ;;  %v2666_v56 = vadd.f32 %v8141_v11, %v2665_v24  ;;  %4142 = vrot.lane.b32.xlu1 %v8093_v1, %s5833_s11  ;;  %4224 = vrot.lane.b32.xlu0 %v8157_v8, %s5835_s18  ;;  %v3423_v49 = vld [vmem:[#allocation3 + $0x48] sm:$0xf] }
 0x2eb   : > { %v2485_v17 = vrot.slane %v2483_v4, 1  ;;  %v5531_v13 = vpop.f32.mrf.mxu0 }
 0x2ec   : > { %v5447_v6 = vpack.c.bf16 %v2774_v30, %v2774_v30  ;;  %v2772_v44 = vmax.f32 %v2666_v56, 0.0  ;;  %v2677_v37 = vadd.f32 %v8141_v11, %v5531_v13  ;;  %v2496_v43 = vsel %vm799_vm2, %v2492_v15, %v2495_v62  ;;  %v3427_v56 = vld [vmem:[#allocation3 + $0x50] sm:$0x1] }
 0x2ed   : > { %v2668_v14 = vpop.f32.mrf.mxu0  ;;  %v2486_v10 = vsel %vm799_vm2, %v2482_v46, %v2485_v17 }
 0x2ee   : > { %v3139_v54 = vshrl.u32 %v5447_v6, 16  ;;  %v5445_v52 = vpack.c.bf16 %v2772_v44, %v2772_v44  ;;  %v2775_v35 = vmax.f32 %v2677_v37, 0.0  ;;  %5548 = vmatprep.mubr.msk.bf16.mxu0 %vm9495_vm3, %v2486_v10  ;;  %v2669_v18 = vadd.f32 %v8141_v11, %v2668_v14  ;;  %4189 = vrot.lane.b32.xlu1 %v3779_v12, %s5834_s12  ;;  %vm9497_vm3 = vmmov %vm9494_vm4 }
 0x2ef   : > { %5549 = vmatmul.mubr.msk.bf16.gmra.mxu0 %vm9496_vm12, %v2496_v43  ;;  %v3142_v41 = vshll.u32 %v5447_v6, 16  ;;  %3910 = vrot.lane.b32.xlu0 %v3779_v12, %s5828_s16  ;;  %v4386_v2 = vsel %vm9497_vm3, %v4384_v40, %v4385_v5  ;;  %vm9498_vm12 = vmmov %vm9497_vm3 }
 0x2f0   : > { %v3141_v58 = vrot.slane %v3139_v54, 7  ;;  %v3122_v26 = vshrl.u32 %v5445_v52, 16  ;;  %v5448_v22 = vpack.c.bf16 %v2775_v35, %v2775_v35  ;;  %v2773_v19 = vmax.f32 %v2669_v18, 0.0  ;;  %vm9499_vm4 = vmmov %vm9497_vm3 }
 0x2f1   : > { %v3125_v61 = vshll.u32 %v5445_v52, 16  ;;  %v2863_v54 = vsel %vm7314_vm0, 0, %v2862_v29 }
 0x2f2   : > { %v3144_v39 = vor.u32 %v3142_v41, %v3141_v58  ;;  %v3124_v53 = vrot.slane %v3122_v26, 7  ;;  %v3147_v28 = vshrl.u32 %v5448_v22, 16  ;;  %v5446_v16 = vpack.c.bf16 %v2773_v19, %v2773_v19  ;;  %3908 = vrot.lane.b32.xlu1 %v8116_v45, %s5828_s16  ;;  %2864 = vst [vmem:[#allocation3 + $0xb4] sm:$0x1] %v2863_v54 }
 0x2f3   : > { %v3150_v38 = vshll.u32 %v5448_v22, 16  ;;  %4432 = vrot.lane.b32.xlu0 %v4389_v47, %s5836_s15  ;;  %v3145_v15 = vrot.slane %v3141_v58, 4  ;;  %v5688_v58 = vld [vmem:[#allocation2 + $0x54] sm:$0xfe]  }
 0x2f4   : > { %v3431_v51 = vsel %vm7707_vm14, %v3144_v39, %v3430_v55  ;;  %v3127_v31 = vor.u32 %v3125_v61, %v3124_v53  ;;  %v3149_v32 = vrot.slane %v3147_v28, 7  ;;  %v3130_v63 = vshrl.u32 %v5446_v16, 16  ;;  %v5689_v26 = vld [vmem:[#allocation2 + $0x5c] ss:$0 sps:$4 sm:$0x11]  }
 0x2f5   : > { %3432 = vst [vmem:[#allocation3 + $0x54] sm:$0xf] %v3431_v51  ;;  %v3133_v62 = vshll.u32 %v5446_v16, 16  ;;  %v3128_v57 = vrot.slane %v3124_v53, 4  ;;  %v2859_v47 = vld [vmem:[#allocation3 + $0xa8] sm:$0x1] }
 0x2f6   : > { %v3424_v4 = vsel %vm7707_vm14, %v3127_v31, %v3423_v49  ;;  %v3152_v24 = vor.u32 %v3150_v38, %v3149_v32  ;;  %v3154_v25 = vrot.slane %v3149_v32, 4  ;;  %v3132_v23 = vrot.slane %v3130_v63, 7  ;;  %4430 = vrot.lane.b32.xlu1 %v4386_v2, %s5836_s15  ;;  %v2918_v16 = vld [vmem:[#allocation3 + $0xbc] sm:$0x1] }
 0x2f7   : > { %3425 = vst [vmem:[#allocation3 + $0x48] sm:$0xf] %v3424_v4  ;;  %4025 = vrot.lane.b32.xlu0 %v8093_v1, %s5830_s28  ;;  %v2860_v39 = vsel %vm7314_vm0, 0, %v2859_v47  ;;  %v4393_v49 = vrot.slane %v5688_v58, 1  ;;  %v2919_v63 = vsel %vm7338_vm15, 0, %v2918_v16  ;;  %v4394_v4 = vrot.slane %v5689_v26, 1 }
 0x2f8   : > { %v3153_v30 = vsel %vm7719_vm13, %v3145_v15, %v3152_v24  ;;  %v3435_v45 = vsel %vm7314_vm0, %v3154_v25, %v3434_v48  ;;  %v3135_v46 = vor.u32 %v3133_v62, %v3132_v23  ;;  %v3137_v17 = vrot.slane %v3132_v23, 4  ;;  %2861 = vst [vmem:[#allocation3 + $0xa8] sm:$0x1] %v2860_v39  ;;  %v5691_v48 = vld [vmem:[#allocation2 + $0x50] ss:$0 sps:$4 sm:$0x11]  }
 0x2f9   : > { %3433 = vst.msk [vmem:[#allocation3 + $0x58] sm:$0xf] %vm411_vm1, %v3153_v30  ;;  %3436 = vst [vmem:[#allocation3 + $0x5c] sm:$0x1] %v3435_v45  ;;  %v5690_v24 = vld [vmem:[#allocation2 + $0x48] sm:$0xfe]  }
 0x2fa   : > { %v3136_v13 = vsel %vm7719_vm13, %v3128_v57, %v3135_v46  ;;  %v3428_v59 = vsel %vm7314_vm0, %v3137_v17, %v3427_v56  ;;  %3988 = vrot.lane.b32.xlu1 %v8136_v7, %s5829_s27  ;;  %2920 = vst [vmem:[#allocation3 + $0xbc] sm:$0x1] %v2919_v63  ;;  %v2915_v25 = vld [vmem:[#allocation3 + $0xb0] sm:$0x1]  ;;  %v3441_v39 = vld [vmem:[#allocation3 + $0x68] sm:$0x1] }
 0x2fb   : > { %3426 = vst.msk [vmem:[#allocation3 + $0x4c] sm:$0xf] %vm411_vm1, %v3136_v13  ;;  %3429 = vst [vmem:[#allocation3 + $0x50] sm:$0x1] %v3428_v59  ;;  %4072 = vrot.lane.b32.xlu0 %v3779_v12, %s5831_s30  ;;  %v2916_v57 = vsel %vm7338_vm15, 0, %v2915_v25 }
 0x2fc   : > { %2917 = vst [vmem:[#allocation3 + $0xb0] sm:$0x1] %v2916_v57 }
 0x2fe   : > { %3990 = vrot.lane.b32.xlu1 %v8157_v8, %s5829_s27 }
 0x2ff   : > { %4107 = vrot.lane.b32.xlu0 %v8157_v8, %s5832_s8 }
 0x300   : > { %v8207_v37 = vld [vmem:[#allocation3 + $0x54] sm:$0xff]   ;;  %v5687_v0 = vld [vmem:[#allocation3 + $0x5c] ss:$0 sps:$4 sm:$0x11]  }
 0x301   : > { %v3795_v10 = vshll.u32 %v8207_v37, 16  ;;  %v3953_v18 = vrot.slane %v8207_v37, 1  ;;  %v3954_v12 = vrot.slane %v5687_v0, 1  ;;  %v3793_v55 = vshrl.u32 %v8207_v37, 16 }
 0x302   : > { %v5684_v1 = vld [vmem:[#allocation3 + $0x48] sm:$0xff]   ;;  %v5685_v42 = vld [vmem:[#allocation3 + $0x50] ss:$0 sps:$4 sm:$0x11]   ;;  %v3800_v19 = vshll.u32 %v5687_v0, 16 }
 0x303   : > { %4027 = vrot.lane.b32.xlu1 %v5684_v1, %s5830_s28  ;;  %4144 = vrot.lane.b32.xlu0 %v5684_v1, %s5833_s11  ;;  %v3783_v6 = vshll.u32 %v5684_v1, 16  ;;  %v3788_v44 = vshll.u32 %v5685_v42, 16  ;;  %v3781_v50 = vshrl.u32 %v5684_v1, 16  ;;  %v3950_v8 = vrot.slane %v5684_v1, 1  ;;  %v3444_v1 = vld [vmem:[#allocation3 + $0x6c] sm:$0xf] }
 0x304   : > { %v3951_v34 = vrot.slane %v5685_v42, 1  ;;  %v3797_v3 = vrot.slane %v3795_v10, 1  ;;  %v8235_v61 = vsel %vm9499_vm4, %v3953_v18, %v3954_v12  ;;  %v3802_v15 = vrot.slane %v3800_v19, 1  ;;  %v3448_v12 = vld [vmem:[#allocation3 + $0x74] sm:$0x1]  ;;  %vm9501_vm4 = vmmov %vm9497_vm3 }
 0x305   : > { %v3785_v7 = vrot.slane %v3783_v6, 1  ;;  %v3790_v14 = vrot.slane %v3788_v44, 1  ;;  %v4395_v6 = vsel %vm9497_vm3, %v4393_v49, %v4394_v4  ;;  %v4390_v44 = vrot.slane %v5690_v24, 1 }
 0x306   : > { %v8222_v43 = vsel %vm9498_vm12, %v3950_v8, %v3951_v34  ;;  %v3798_v28 = vor.u32 %v3797_v3, %v3793_v55  ;;  %v3437_v8 = vld [vmem:[#allocation3 + $0x60] sm:$0xf]  ;;  %vm9500_vm12 = vmmov %vm9497_vm3 }
 0x307   : > { %v3786_v36 = vor.u32 %v3785_v7, %v3781_v50  ;;  %v4391_v50 = vrot.slane %v5691_v48, 1 }
 0x308   : > { %v3803_v56 = vsel %vm799_vm2, %v3798_v28, %v3802_v15 }
 0x309   : > { %v8211_v9 = vsel %vm799_vm2, %v3786_v36, %v3790_v14  ;;  %v4392_v58 = vsel %vm9500_vm12, %v4390_v44, %v4391_v50  ;;  %vm4773_vm12 = vcmask 326656  }
 0x30a   : > { %4074 = vrot.lane.b32.xlu1 %v8211_v9, %s5831_s30  ;;  %4191 = vrot.lane.b32.xlu0 %v8211_v9, %s5834_s12 }
 0x30b   : > { %v8219_v52 = vpop.permute.xlu0 %3900 }
 0x30e   : > { %4109 = vrot.lane.b32.xlu1 %v8222_v43, %s5832_s8  ;;  %4226 = vrot.lane.b32.xlu0 %v8222_v43, %s5835_s18 }
 0x30f   : > { %v5534_v35 = vpop.f32.mrf.mxu0  ;;  %v8237_v32 = vpop.permute.xlu0 %3980 }
 0x310   : > { %v2690_v41 = vadd.f32 %v8141_v11, %v5534_v35 }
 0x311   : > { %v2681_v22 = vpop.f32.mrf.mxu0 }
 0x312   : > { %v2778_v40 = vmax.f32 %v2690_v41, 0.0  ;;  %v2682_v5 = vadd.f32 %v8141_v11, %v2681_v22  ;;  %4146 = vrot.lane.b32.xlu1 %v8207_v37, %s5833_s11  ;;  %4228 = vrot.lane.b32.xlu0 %v8235_v61, %s5835_s18 }
 0x313   : > { %v5535_v53 = vpop.f32.mrf.mxu0  ;;  %v8253_v29 = vpop.permute.xlu0 %4017 }
 0x314   : > { %v5451_v51 = vpack.c.bf16 %v2778_v40, %v2778_v40  ;;  %v2776_v31 = vmax.f32 %v2682_v5, 0.0  ;;  %v2693_v38 = vadd.f32 %v8141_v11, %v5535_v53  ;;  %v8263_v40 = vpop.permute.xlu1 %3902 }
 0x315   : > { %v2684_v2 = vpop.f32.mrf.mxu0 }
 0x316   : > { %v3173_v23 = vshrl.u32 %v5451_v51, 16  ;;  %v5449_v62 = vpack.c.bf16 %v2776_v31, %v2776_v31  ;;  %v2779_v30 = vmax.f32 %v2693_v38, 0.0  ;;  %v2685_v45 = vadd.f32 %v8141_v11, %v2684_v2  ;;  %4193 = vrot.lane.b32.xlu1 %v3803_v56, %s5834_s12  ;;  %3914 = vrot.lane.b32.xlu0 %v3803_v56, %s5828_s16 }
 0x317   : > { %v3176_v17 = vshll.u32 %v5451_v51, 16  ;;  %v8269_v53 = vpop.permute.xlu0 %4064 }
 0x318   : > { %v3175_v46 = vrot.slane %v3173_v23, 7  ;;  %v3156_v13 = vshrl.u32 %v5449_v62, 16  ;;  %v5452_v59 = vpack.c.bf16 %v2779_v30, %v2779_v30  ;;  %v2777_v42 = vmax.f32 %v2685_v45, 0.0  ;;  %v5700_v30 = vld [vmem:[#allocation2 + $0x74] ss:$0 sps:$4 sm:$0x11]  }
 0x319   : > { %v3159_v14 = vshll.u32 %v5449_v62, 16 }
 0x31a   : > { %v3178_v7 = vor.u32 %v3176_v17, %v3175_v46  ;;  %v3158_v36 = vrot.slane %v3156_v13, 7  ;;  %v3181_v10 = vshrl.u32 %v5452_v59, 16  ;;  %v5450_v34 = vpack.c.bf16 %v2777_v42, %v2777_v42  ;;  %3912 = vrot.lane.b32.xlu1 %v8211_v9, %s5828_s16  ;;  %4436 = vrot.lane.b32.xlu0 %v4395_v6, %s5836_s15  ;;  %v2868_v42 = vld [vmem:[#allocation3 + $0xcc] sm:$0x1] }
 0x31b   : > { %v3184_v18 = vshll.u32 %v5452_v59, 16  ;;  %v3179_v41 = vrot.slane %v3175_v46, 4  ;;  %v4100_v38 = vpop.permute.xlu0 %4099 }
 0x31c   : > { %v3445_v0 = vsel %vm7707_vm14, %v3178_v7, %v3444_v1  ;;  %v3161_v54 = vor.u32 %v3159_v14, %v3158_v36  ;;  %v3183_v35 = vrot.slane %v3181_v10, 7  ;;  %v3164_v3 = vshrl.u32 %v5450_v34, 16  ;;  %v5736_v14 = vld [vmem:[#allocation3] sm:$0xff]  }
 0x31d   : > { %3446 = vst [vmem:[#allocation3 + $0x6c] sm:$0xf] %v3445_v0  ;;  %v3167_v47 = vshll.u32 %v5450_v34, 16  ;;  %v3162_v28 = vrot.slane %v3158_v36, 4  ;;  %v4400_v1 = vrot.slane %v5700_v30, 1  ;;  %v2869_v36 = vsel %vm7314_vm0, 0, %v2868_v42 }
 0x31e   : > { %v3438_v26 = vsel %vm7707_vm14, %v3161_v54, %v3437_v8  ;;  %v3186_v22 = vor.u32 %v3184_v18, %v3183_v35  ;;  %v3188_v55 = vrot.slane %v3183_v35, 4  ;;  %v3166_v19 = vrot.slane %v3164_v3, 7  ;;  %4434 = vrot.lane.b32.xlu1 %v4392_v58, %s5836_s15  ;;  %4029 = vrot.lane.b32.xlu0 %v8207_v37, %s5830_s28  ;;  %v3983_v37 = vpop.permute.xlu1 %3982  ;;  %2870 = vst [vmem:[#allocation3 + $0xcc] sm:$0x1] %v2869_v36 }
 0x31f   : > { %3439 = vst [vmem:[#allocation3 + $0x60] sm:$0xf] %v3438_v26  ;;  %v4459_v10 = vsel %vm1733_vm6, %v5736_v14, %v8219_v52 }
 0x320   : > { %v3187_v9 = vsel %vm7719_vm13, %v3179_v41, %v3186_v22  ;;  %v3449_v5 = vsel %vm7314_vm0, %v3188_v55, %v3448_v12  ;;  %v3169_v49 = vor.u32 %v3167_v47, %v3166_v19  ;;  %v3171_v16 = vrot.slane %v3166_v19, 4  ;;  %v5737_v41 = vld [vmem:[#allocation3 + $0xc] sm:$0xff]  }
 0x321   : > { %3447 = vst.msk [vmem:[#allocation3 + $0x70] sm:$0xf] %vm411_vm1, %v3187_v9  ;;  %3450 = vst [vmem:[#allocation3 + $0x74] sm:$0x1] %v3449_v5  ;;  %v4491_v8 = vsel %vm1806_vm5, %v4459_v10, %v8237_v32  ;;  %v4461_v52 = vsel %vm1733_vm6, %v5737_v41, %v8263_v40  ;;  %v2865_v9 = vld [vmem:[#allocation3 + $0xc0] sm:$0x1] }
 0x322   : > { %v3170_v51 = vsel %vm7719_vm13, %v3162_v28, %v3169_v49  ;;  %v3442_v31 = vsel %vm7314_vm0, %v3171_v16, %v3441_v39  ;;  %3992 = vrot.lane.b32.xlu1 %v8222_v43, %s5829_s27  ;;  %4076 = vrot.lane.b32.xlu0 %v3803_v56, %s5831_s30  ;;  %v5699_v43 = vld [vmem:[#allocation2 + $0x6c] sm:$0xfe]   ;;  %v4523_v32 = vsel %vm1879_vm7, %v4491_v8, %v8253_v29  ;;  %v2866_v16 = vsel %vm7314_vm0, 0, %v2865_v9 }
 0x323   : > { %3440 = vst.msk [vmem:[#allocation3 + $0x64] sm:$0xf] %vm411_vm1, %v3170_v51  ;;  %3443 = vst [vmem:[#allocation3 + $0x68] sm:$0x1] %v3442_v31  ;;  %v4399_v59 = vrot.slane %v5699_v43, 1  ;;  %v4493_v22 = vsel %vm1806_vm5, %v4461_v52, %v3983_v37  ;;  %v4555_v55 = vsel %vm1952_vm8, %v4523_v32, %v8269_v53 }
 0x324   : > { %v4587_v29 = vsel %vm2025_vm9, %v4555_v55, %v4100_v38  ;;  %2867 = vst [vmem:[#allocation3 + $0xc0] sm:$0x1] %v2866_v16  ;;  %v2924_v38 = vld [vmem:[#allocation3 + $0xd4] sm:$0x1] }
 0x325   : > { %v4020_v48 = vpop.permute.xlu1 %4019  ;;  %v4137_v63 = vpop.permute.xlu0 %4136  ;;  %v8312_v54 = vsel %vm9501_vm4, %v4399_v59, %v4400_v1  ;;  %vm9502_vm4 = vmmov %vm9497_vm3 }
 0x326   : > { %3994 = vrot.lane.b32.xlu1 %v8235_v61, %s5829_s27  ;;  %4111 = vrot.lane.b32.xlu0 %v8235_v61, %s5832_s8  ;;  %v4525_v51 = vsel %vm1879_vm7, %v4493_v22, %v4020_v48  ;;  %v4619_v53 = vsel %vm2098_vm10, %v4587_v29, %v4137_v63  ;;  %v5702_v48 = vld [vmem:[#allocation2 + $0x68] ss:$0 sps:$4 sm:$0x11]  }
 0x327   : > { %v4397_v41 = vrot.slane %v5702_v48, 1  ;;  %v3455_v48 = vld [vmem:[#allocation3 + $0x80] sm:$0x1] }
 0x328   : > { %v8291_v62 = vld [vmem:[#allocation3 + $0x6c] sm:$0xff]   ;;  %v5696_v7 = vld [vmem:[#allocation3 + $0x74] ss:$0 sps:$4 sm:$0x11]  }
 0x329   : > { %v3819_v13 = vshll.u32 %v8291_v62, 16  ;;  %v3959_v12 = vrot.slane %v8291_v62, 1  ;;  %v3960_v3 = vrot.slane %v5696_v7, 1  ;;  %v3817_v47 = vshrl.u32 %v8291_v62, 16 }
 0x32a   : > { %v5692_v2 = vld [vmem:[#allocation3 + $0x60] sm:$0xff]   ;;  %v5693_v15 = vld [vmem:[#allocation3 + $0x68] ss:$0 sps:$4 sm:$0x11]   ;;  %v3824_v40 = vshll.u32 %v5696_v7, 16 }
 0x32b   : > { %4031 = vrot.lane.b32.xlu1 %v5692_v2, %s5830_s28  ;;  %4148 = vrot.lane.b32.xlu0 %v5692_v2, %s5833_s11  ;;  %v3807_v4 = vshll.u32 %v5692_v2, 16  ;;  %v3812_v23 = vshll.u32 %v5693_v15, 16  ;;  %v3805_v45 = vshrl.u32 %v5692_v2, 16  ;;  %v3956_v44 = vrot.slane %v5692_v2, 1 }
 0x32c   : > { %v4067_v24 = vpop.permute.xlu1 %4066  ;;  %v8289_v25 = vpop.permute.xlu0 %4183  ;;  %v3957_v50 = vrot.slane %v5693_v15, 1  ;;  %v3821_v58 = vrot.slane %v3819_v13, 1  ;;  %v8340_v37 = vsel %vm9502_vm4, %v3959_v12, %v3960_v3  ;;  %v3458_v12 = vld [vmem:[#allocation3 + $0x84] sm:$0xf]  ;;  %vm9505_vm4 = vcmask 293888  }
 0x32d   : > { %v3809_v56 = vrot.slane %v3807_v4, 1  ;;  %v3814_v57 = vrot.slane %v3812_v23, 1  ;;  %v4557_v15 = vsel %vm1952_vm8, %v4525_v51, %v4067_v24  ;;  %v4651_v63 = vsel %vm9157_vm11, %v4619_v53, %v8289_v25 }
 0x32e   : > { %v8315_v18 = vsel %vm9497_vm3, %v3956_v44, %v3957_v50  ;;  %v3822_v2 = vor.u32 %v3821_v58, %v3817_v47  ;;  %v2925_v24 = vsel %vm7338_vm15, 0, %v2924_v38  ;;  %vm9503_vm3 = vcmask 261120  }
 0x32f   : > { %v3810_v61 = vor.u32 %v3809_v56, %v3805_v45  ;;  %v3826_v56 = vrot.slane %v3824_v40, 1  ;;  %2926 = vst [vmem:[#allocation3 + $0xd4] sm:$0x1] %v2925_v24 }
 0x330   : > { %v4102_v46 = vpop.permute.xlu1 %4101  ;;  %v8293_v17 = vpop.permute.xlu0 %4218 }
 0x331   : > { %v8297_v6 = vsel %vm799_vm2, %v3810_v61, %v3814_v57  ;;  %v4589_v30 = vsel %vm2025_vm9, %v4557_v15, %v4102_v46  ;;  %v5701_v61 = vld [vmem:[#allocation2 + $0x60] sm:$0xfe]   ;;  %v2921_v57 = vld [vmem:[#allocation3 + $0xc8] sm:$0x1]  ;;  %v3827_v7 = vsel %vm799_vm2, %v3822_v2, %v3826_v56 }
 0x332   : > { %4078 = vrot.lane.b32.xlu1 %v8297_v6, %s5831_s30  ;;  %4195 = vrot.lane.b32.xlu0 %v8297_v6, %s5834_s12  ;;  %v2922_v36 = vsel %vm7338_vm15, 0, %v2921_v57  ;;  %v4396_v58 = vrot.slane %v5701_v61, 1  ;;  %vm9504_vm15 = vmmov %vm9503_vm3 }
 0x333   : > { %2923 = vst [vmem:[#allocation3 + $0xc8] sm:$0x1] %v2922_v36 }
 0x334   : > { %v4139_v34 = vpop.permute.xlu1 %4138  ;;  %v8309_v0 = vpop.permute.xlu0 %4220 }
 0x335   : > { %v4621_v13 = vsel %vm2098_vm10, %v4589_v30, %v4139_v34 }
 0x336   : > { %4113 = vrot.lane.b32.xlu1 %v8315_v18, %s5832_s8  ;;  %4230 = vrot.lane.b32.xlu0 %v8315_v18, %s5835_s18 }
 0x337   : > { %v5538_v35 = vpop.f32.mrf.mxu0 }
 0x338   : > { %v2706_v26 = vadd.f32 %v8141_v11, %v5538_v35  ;;  %v4186_v28 = vpop.permute.xlu1 %4185  ;;  %v4683_v35 = vsel %vm9503_vm3, %v4651_v63, %v8293_v17  ;;  %vm9506_vm3 = vmmov %vm9505_vm4 }
 0x339   : > { %v2697_v19 = vpop.f32.mrf.mxu0  ;;  %v8333_v49 = vpop.permute.xlu0 %3906  ;;  %v4653_v25 = vsel %vm9157_vm11, %v4621_v13, %v4186_v28  ;;  %v3462_v28 = vld [vmem:[#allocation3 + $0x8c] sm:$0x1] }
 0x33a   : > { %v2782_v5 = vmax.f32 %v2706_v26, 0.0  ;;  %v2698_v39 = vadd.f32 %v8141_v11, %v2697_v19  ;;  %4150 = vrot.lane.b32.xlu1 %v8291_v62, %s5833_s11  ;;  %4232 = vrot.lane.b32.xlu0 %v8340_v37, %s5835_s18  ;;  %v3451_v19 = vld [vmem:[#allocation3 + $0x78] sm:$0xf]  ;;  %v4685_v40 = vsel %vm9504_vm15, %v4653_v25, %v8309_v0  ;;  %vm9507_vm15 = vcmask 1046528  }
 0x33b   : > { %v5539_v31 = vpop.f32.mrf.mxu0  ;;  %v4398_v0 = vsel %vm9507_vm15, %v4396_v58, %v4397_v41 }
 0x33c   : > { %v5455_v4 = vpack.c.bf16 %v2782_v5, %v2782_v5  ;;  %v2780_v43 = vmax.f32 %v2698_v39, 0.0  ;;  %v2709_v23 = vadd.f32 %v8141_v11, %v5539_v31  ;;  %v8354_v44 = vpop.permute.xlu1 %3904 }
 0x33d   : > { %v2700_v45 = vpop.f32.mrf.mxu0  ;;  %v4429_v50 = vpop.permute.xlu0 %4428 }
 0x33e   : > { %v3207_v59 = vshrl.u32 %v5455_v4, 16  ;;  %v5453_v1 = vpack.c.bf16 %v2780_v43, %v2780_v43  ;;  %v2783_v42 = vmax.f32 %v2709_v23, 0.0  ;;  %v2701_v46 = vadd.f32 %v8141_v11, %v2700_v45  ;;  %4197 = vrot.lane.b32.xlu1 %v3827_v7, %s5834_s12  ;;  %3918 = vrot.lane.b32.xlu0 %v3827_v7, %s5828_s16 }
 0x33f   : > { %v3210_v10 = vshll.u32 %v5455_v4, 16  ;;  %v4717_v51 = vsel %vm9506_vm3, %v4685_v40, %v4429_v50 }
 0x340   : > { %v3209_v14 = vrot.slane %v3207_v59, 7  ;;  %v3190_v8 = vshrl.u32 %v5453_v1, 16  ;;  %v5456_v34 = vpack.c.bf16 %v2783_v42, %v2783_v42  ;;  %v2781_v3 = vmax.f32 %v2701_v46, 0.0  ;;  %v4427_v22 = vpop.permute.xlu1 %4426 }
 0x341   : > { %v3193_v20 = vshll.u32 %v5453_v1, 16  ;;  %v8365_v55 = vpop.permute.xlu0 %4021  ;;  %v4715_v9 = vsel %vm9505_vm4, %v4683_v35, %v4427_v22  ;;  %vm9508_vm4 = vmmov %vm9507_vm15 }
 0x342   : > { %v3212_v52 = vor.u32 %v3210_v10, %v3209_v14  ;;  %v3192_v32 = vrot.slane %v3190_v8, 7  ;;  %v3215_v26 = vshrl.u32 %v5456_v34, 16  ;;  %v5454_v47 = vpack.c.bf16 %v2781_v3, %v2781_v3  ;;  %3916 = vrot.lane.b32.xlu1 %v8297_v6, %s5828_s16  ;;  %4440 = vrot.lane.b32.xlu0 %v8312_v54, %s5836_s15  ;;  %vm9509_vm3 = vmmov %vm9508_vm4 }
 0x343   : > { %v3218_v39 = vshll.u32 %v5456_v34, 16  ;;  %5558 = vmatprep.mubr.msk.bf16.mxu1 %vm4773_vm12, %v4715_v9  ;;  %v3213_v53 = vrot.slane %v3209_v14, 4  ;;  %v5738_v14 = vld [vmem:[#allocation3 + $0x18] sm:$0xff]   ;;  %vm9510_vm15 = vmmov %vm9509_vm3 }
 0x344   : > { %v3459_v17 = vsel %vm7707_vm14, %v3212_v52, %v3458_v12  ;;  %v3195_v29 = vor.u32 %v3193_v20, %v3192_v32  ;;  %v3217_v5 = vrot.slane %v3215_v26, 7  ;;  %v3198_v16 = vshrl.u32 %v5454_v47, 16  ;;  %5559 = vmatmul.mubr.msk.bf16.vlgmr.msra.gmra.mxu1 %vm4773_vm12, %v4717_v51  ;;  %v3985_v6 = vpop.permute.xlu1 %3984  ;;  %v5708_v26 = vld [vmem:[#allocation2 + $0x8c] ss:$0 sps:$4 sm:$0x11]  }
 0x345   : > { %3460 = vst [vmem:[#allocation3 + $0x84] sm:$0xf] %v3459_v17  ;;  %v4069_v15 = vpop.permute.xlu0 %4068  ;;  %v3201_v4 = vshll.u32 %v5454_v47, 16  ;;  %v3196_v63 = vrot.slane %v3192_v32, 4 }
 0x346   : > { %v3452_v31 = vsel %vm7707_vm14, %v3195_v29, %v3451_v19  ;;  %v3220_v2 = vor.u32 %v3218_v39, %v3217_v5  ;;  %v3222_v38 = vrot.slane %v3217_v5, 4  ;;  %v3200_v54 = vrot.slane %v3198_v16, 7  ;;  %4438 = vrot.lane.b32.xlu1 %v4398_v0, %s5836_s15  ;;  %4033 = vrot.lane.b32.xlu0 %v8291_v62, %s5830_s28 }
 0x347   : > { %3453 = vst [vmem:[#allocation3 + $0x78] sm:$0xf] %v3452_v31  ;;  %v4406_v31 = vrot.slane %v5708_v26, 1 }
 0x348   : > { %v3221_v43 = vsel %vm7719_vm13, %v3213_v53, %v3220_v2  ;;  %v3463_v23 = vsel %vm7314_vm0, %v3222_v38, %v3462_v28  ;;  %v3203_v30 = vor.u32 %v3201_v4, %v3200_v54  ;;  %v3205_v45 = vrot.slane %v3200_v54, 4  ;;  %v3987_v24 = vpop.permute.xlu1 %3986  ;;  %v5739_v28 = vld [vmem:[#allocation3 + $0x24] sm:$0xff]  }
 0x349   : > { %3461 = vst.msk [vmem:[#allocation3 + $0x88] sm:$0xf] %vm411_vm1, %v3221_v43  ;;  %3464 = vst [vmem:[#allocation3 + $0x8c] sm:$0x1] %v3463_v23  ;;  %v4104_v57 = vpop.permute.xlu0 %4103  ;;  %v4465_v16 = vsel %vm1733_vm6, %v5739_v28, %v8333_v49 }
 0x34a   : > { %v3204_v56 = vsel %vm7719_vm13, %v3196_v63, %v3203_v30  ;;  %v3456_v61 = vsel %vm7314_vm0, %v3205_v45, %v3455_v48  ;;  %3996 = vrot.lane.b32.xlu1 %v8315_v18, %s5829_s27  ;;  %4080 = vrot.lane.b32.xlu0 %v3827_v7, %s5831_s30  ;;  %v4497_v2 = vsel %vm1806_vm5, %v4465_v16, %v3987_v24 }
 0x34b   : > { %3454 = vst.msk [vmem:[#allocation3 + $0x7c] sm:$0xf] %vm411_vm1, %v3204_v56  ;;  %3457 = vst [vmem:[#allocation3 + $0x80] sm:$0x1] %v3456_v61 }
 0x34d   : > { %v4024_v62 = vpop.permute.xlu1 %4023  ;;  %v8402_v13 = vpop.permute.xlu0 %4140 }
 0x34e   : > { %3998 = vrot.lane.b32.xlu1 %v8340_v37, %s5829_s27  ;;  %4115 = vrot.lane.b32.xlu0 %v8340_v37, %s5832_s8  ;;  %v4463_v37 = vsel %vm1733_vm6, %v5738_v14, %v8354_v44  ;;  %v5707_v44 = vld [vmem:[#allocation2 + $0x84] sm:$0xfe]   ;;  %v4529_v43 = vsel %vm1879_vm7, %v4497_v2, %v4024_v62 }
 0x34f   : > { %v4495_v34 = vsel %vm1806_vm5, %v4463_v37, %v3985_v6 }
 0x350   : > { %v8408_v36 = vld [vmem:[#allocation3 + $0x84] sm:$0xff]   ;;  %v5706_v52 = vld [vmem:[#allocation3 + $0x8c] ss:$0 sps:$4 sm:$0x11]   ;;  %v4527_v20 = vsel %vm1879_vm7, %v4495_v34, %v8365_v55  ;;  %v4405_v55 = vrot.slane %v5707_v44, 1 }
 0x351   : > { %v3843_v32 = vshll.u32 %v8408_v36, 16  ;;  %v3965_v9 = vrot.slane %v8408_v36, 1  ;;  %v3966_v17 = vrot.slane %v5706_v52, 1  ;;  %v4559_v5 = vsel %vm1952_vm8, %v4527_v20, %v4069_v15  ;;  %v3472_v44 = vld [vmem:[#allocation3 + $0x9c] sm:$0xf] }
 0x352   : > { %v5703_v59 = vld [vmem:[#allocation3 + $0x78] sm:$0xff]   ;;  %v5704_v1 = vld [vmem:[#allocation3 + $0x80] ss:$0 sps:$4 sm:$0x11]   ;;  %v3841_v0 = vshrl.u32 %v8408_v36, 16  ;;  %v3848_v53 = vshll.u32 %v5706_v52, 16  ;;  %v4591_v4 = vsel %vm2025_vm9, %v4559_v5, %v4104_v57 }
 0x353   : > { %4035 = vrot.lane.b32.xlu1 %v5703_v59, %s5830_s28  ;;  %4152 = vrot.lane.b32.xlu0 %v5703_v59, %s5833_s11  ;;  %v3831_v42 = vshll.u32 %v5703_v59, 16  ;;  %v3836_v25 = vshll.u32 %v5704_v1, 16  ;;  %v3829_v46 = vshrl.u32 %v5703_v59, 16  ;;  %v3962_v58 = vrot.slane %v5703_v59, 1  ;;  %v3465_v5 = vld [vmem:[#allocation3 + $0x90] sm:$0xf] }
 0x354   : > { %v4071_v50 = vpop.permute.xlu1 %4070  ;;  %v8406_v18 = vpop.permute.xlu0 %4187  ;;  %v3963_v41 = vrot.slane %v5704_v1, 1  ;;  %v3845_v29 = vrot.slane %v3843_v32, 1  ;;  %v8447_v49 = vsel %vm9509_vm3, %v3965_v9, %v3966_v17  ;;  %v4623_v61 = vsel %vm2098_vm10, %v4591_v4, %v8402_v13  ;;  %v5709_v1 = vld [vmem:[#allocation2 + $0x78] sm:$0xfe]  }
 0x355   : > { %v3833_v7 = vrot.slane %v3831_v42, 1  ;;  %v3838_v8 = vrot.slane %v3836_v25, 1  ;;  %v4561_v63 = vsel %vm1952_vm8, %v4529_v43, %v4071_v50  ;;  %v3850_v62 = vrot.slane %v3848_v53, 1  ;;  %v5710_v42 = vld [vmem:[#allocation2 + $0x80] ss:$0 sps:$4 sm:$0x11]  }
 0x356   : > { %v8428_v40 = vsel %vm9508_vm4, %v3962_v58, %v3963_v41  ;;  %v3846_v48 = vor.u32 %v3845_v29, %v3841_v0  ;;  %v4407_v59 = vsel %vm9510_vm15, %v4405_v55, %v4406_v31  ;;  %vm9511_vm4 = vcmask 261120   ;;  %v3476_v53 = vld [vmem:[#allocation3 + $0xa4] sm:$0x1] }
 0x357   : > { %v3834_v10 = vor.u32 %v3833_v7, %v3829_v46  ;;  %v4403_v26 = vrot.slane %v5710_v42, 1  ;;  %vm9512_vm3 = vmmov %vm9511_vm4  ;;  %vm9513_vm15 = vcmask 293888  }
 0x358   : > { %v4106_v35 = vpop.permute.xlu1 %4105  ;;  %v8413_v12 = vpop.permute.xlu0 %4222  ;;  %v3851_v34 = vsel %vm799_vm2, %v3846_v48, %v3850_v62 }
 0x359   : > { %v8416_v3 = vsel %vm799_vm2, %v3834_v10, %v3838_v8  ;;  %v4593_v24 = vsel %vm2025_vm9, %v4561_v63, %v4106_v35  ;;  %v4655_v10 = vsel %vm9157_vm11, %v4623_v61, %v8406_v18  ;;  %v4402_v18 = vrot.slane %v5709_v1, 1 }
 0x35a   : > { %4082 = vrot.lane.b32.xlu1 %v8416_v3, %s5831_s30  ;;  %4199 = vrot.lane.b32.xlu0 %v8416_v3, %s5834_s12  ;;  %v4687_v32 = vsel %vm9511_vm4, %v4655_v10, %v8413_v12  ;;  %vm9514_vm4 = vmmov %vm9513_vm15 }
 0x35c   : > { %v4143_v22 = vpop.permute.xlu1 %4142  ;;  %v8425_v19 = vpop.permute.xlu0 %4224 }
 0x35d   : > { %v4625_v50 = vsel %vm2098_vm10, %v4593_v24, %v4143_v22 }
 0x35e   : > { %4117 = vrot.lane.b32.xlu1 %v8428_v40, %s5832_s8  ;;  %4234 = vrot.lane.b32.xlu0 %v8428_v40, %s5835_s18 }
 0x35f   : > { %v5542_v47 = vpop.f32.mrf.mxu0 }
 0x360   : > { %v2722_v39 = vadd.f32 %v8141_v11, %v5542_v47  ;;  %v4190_v15 = vpop.permute.xlu1 %4189 }
 0x361   : > { %v2713_v51 = vpop.f32.mrf.mxu0  ;;  %v8442_v54 = vpop.permute.xlu0 %3910  ;;  %v4657_v13 = vsel %vm9157_vm11, %v4625_v50, %v4190_v15 }
 0x362   : > { %v2786_v38 = vmax.f32 %v2722_v39, 0.0  ;;  %v2714_v6 = vadd.f32 %v8141_v11, %v2713_v51  ;;  %4154 = vrot.lane.b32.xlu1 %v8408_v36, %s5833_s11  ;;  %4236 = vrot.lane.b32.xlu0 %v8447_v49, %s5835_s18  ;;  %v4689_v55 = vsel %vm9512_vm3, %v4657_v13, %v8425_v19  ;;  %vm9515_vm3 = vcmask 1046528  }
 0x363   : > { %v5543_v23 = vpop.f32.mrf.mxu0  ;;  %v4404_v19 = vsel %vm9515_vm3, %v4402_v18, %v4403_v26 }
 0x364   : > { %v5459_v30 = vpack.c.bf16 %v2786_v38, %v2786_v38  ;;  %v2784_v45 = vmax.f32 %v2714_v6, 0.0  ;;  %v2725_v56 = vadd.f32 %v8141_v11, %v5543_v23  ;;  %v8460_v14 = vpop.permute.xlu1 %3908 }
 0x365   : > { %v2716_v57 = vpop.f32.mrf.mxu0  ;;  %v4433_v37 = vpop.permute.xlu0 %4432 }
 0x366   : > { %v3241_v25 = vshrl.u32 %v5459_v30, 16  ;;  %v5457_v46 = vpack.c.bf16 %v2784_v45, %v2784_v45  ;;  %v2787_v7 = vmax.f32 %v2725_v56, 0.0  ;;  %v2717_v8 = vadd.f32 %v8141_v11, %v2716_v57  ;;  %4201 = vrot.lane.b32.xlu1 %v3851_v34, %s5834_s12  ;;  %3922 = vrot.lane.b32.xlu0 %v3851_v34, %s5828_s16  ;;  %v3469_v45 = vld [vmem:[#allocation3 + $0x98] sm:$0x1] }
 0x367   : > { %v3244_v58 = vshll.u32 %v5459_v30, 16  ;;  %v4721_v2 = vsel %vm9514_vm4, %v4689_v55, %v4433_v37  ;;  %vm9517_vm4 = vmmov %vm9515_vm3 }
 0x368   : > { %v3243_v35 = vrot.slane %v3241_v25, 7  ;;  %v3224_v41 = vshrl.u32 %v5457_v46, 16  ;;  %v5460_v52 = vpack.c.bf16 %v2787_v7, %v2787_v7  ;;  %v2785_v20 = vmax.f32 %v2717_v8, 0.0  ;;  %v4431_v17 = vpop.permute.xlu1 %4430  ;;  %v5740_v8 = vld [vmem:[#allocation3 + $0x30] sm:$0xff]  }
 0x369   : > { %v3227_v11 = vshll.u32 %v5457_v46, 16  ;;  %v8471_v29 = vpop.permute.xlu0 %4025  ;;  %v4719_v28 = vsel %vm9513_vm15, %v4687_v32, %v4431_v17  ;;  %vm9516_vm15 = vmmov %vm9515_vm3 }
 0x36a   : > { %v3246_v22 = vor.u32 %v3244_v58, %v3243_v35  ;;  %v3226_v47 = vrot.slane %v3224_v41, 7  ;;  %v3249_v9 = vshrl.u32 %v5460_v52, 16  ;;  %v5458_v39 = vpack.c.bf16 %v2785_v20, %v2785_v20  ;;  %3920 = vrot.lane.b32.xlu1 %v8416_v3, %s5828_s16  ;;  %4444 = vrot.lane.b32.xlu0 %v4407_v59, %s5836_s15 }
 0x36b   : > { %v3252_v0 = vshll.u32 %v5460_v52, 16  ;;  %5562 = vmatprep.mubr.msk.bf16.mxu1 %vm4773_vm12, %v4719_v28  ;;  %v3247_v38 = vrot.slane %v3243_v35, 4 }
 0x36c   : > { %v3473_v12 = vsel %vm7707_vm14, %v3246_v22, %v3472_v44  ;;  %v3229_v16 = vor.u32 %v3227_v11, %v3226_v47  ;;  %v3251_v51 = vrot.slane %v3249_v9, 7  ;;  %v3232_v31 = vshrl.u32 %v5458_v39, 16  ;;  %5563 = vmatmul.mubr.msk.bf16.gmra.mxu1 %vm4773_vm12, %v4721_v2  ;;  %v3989_v3 = vpop.permute.xlu1 %3988  ;;  %v5716_v11 = vld [vmem:[#allocation2 + $0xa4] ss:$0 sps:$4 sm:$0x11]  }
 0x36d   : > { %3474 = vst [vmem:[#allocation3 + $0x9c] sm:$0xf] %v3473_v12  ;;  %v4073_v43 = vpop.permute.xlu0 %4072  ;;  %v3235_v48 = vshll.u32 %v5458_v39, 16  ;;  %v3230_v56 = vrot.slane %v3226_v47, 4 }
 0x36e   : > { %v3466_v6 = vsel %vm7707_vm14, %v3229_v16, %v3465_v5  ;;  %v3254_v15 = vor.u32 %v3252_v0, %v3251_v51  ;;  %v3256_v4 = vrot.slane %v3251_v51, 4  ;;  %v3234_v23 = vrot.slane %v3232_v31, 7  ;;  %4442 = vrot.lane.b32.xlu1 %v4404_v19, %s5836_s15  ;;  %4037 = vrot.lane.b32.xlu0 %v8408_v36, %s5830_s28  ;;  %v8547_v51 = vld [vmem:[%s9014_s3] ss:$0 sm:$0xff] }
 0x36f   : > { %3467 = vst [vmem:[#allocation3 + $0x90] sm:$0xf] %v3466_v6  ;;  %v4412_v6 = vrot.slane %v5716_v11, 1 }
 0x370   : > { %v3255_v63 = vsel %vm7719_vm13, %v3247_v38, %v3254_v15  ;;  %v3477_v30 = vsel %vm7314_vm0, %v3256_v4, %v3476_v53  ;;  %v3237_v61 = vor.u32 %v3235_v48, %v3234_v23  ;;  %v3239_v24 = vrot.slane %v3234_v23, 4  ;;  %v3991_v59 = vpop.permute.xlu1 %3990  ;;  %v5742_v53 = vld [vmem:[#allocation3 + $0x3c] sm:$0xff]  }
 0x371   : > { %3475 = vst.msk [vmem:[#allocation3 + $0xa0] sm:$0xf] %vm411_vm1, %v3255_v63  ;;  %3478 = vst [vmem:[#allocation3 + $0xa4] sm:$0x1] %v3477_v30  ;;  %v4108_v1 = vpop.permute.xlu0 %4107  ;;  %v4469_v31 = vsel %vm1733_vm6, %v5742_v53, %v8442_v54 }
 0x372   : > { %v3238_v57 = vsel %vm7719_vm13, %v3230_v56, %v3237_v61  ;;  %v3470_v62 = vsel %vm7314_vm0, %v3239_v24, %v3469_v45  ;;  %4000 = vrot.lane.b32.xlu1 %v8428_v40, %s5829_s27  ;;  %4084 = vrot.lane.b32.xlu0 %v3851_v34, %s5831_s30  ;;  %v4467_v34 = vsel %vm1733_vm6, %v5740_v8, %v8460_v14  ;;  %v5715_v14 = vld [vmem:[#allocation2 + $0x9c] sm:$0xfe]  }
 0x373   : > { %3468 = vst.msk [vmem:[#allocation3 + $0x94] sm:$0xf] %vm411_vm1, %v3238_v57  ;;  %3471 = vst [vmem:[#allocation3 + $0x98] sm:$0x1] %v3470_v62  ;;  %v4499_v41 = vsel %vm1806_vm5, %v4467_v34, %v3989_v3  ;;  %v4411_v0 = vrot.slane %v5715_v14, 1  ;;  %v4501_v15 = vsel %vm1806_vm5, %v4469_v31, %v3991_v59 }
 0x374   : > { %v4531_v47 = vsel %vm1879_vm7, %v4499_v41, %v8471_v29 }
 0x375   : > { %v4028_v36 = vpop.permute.xlu1 %4027  ;;  %v8507_v42 = vpop.permute.xlu0 %4144  ;;  %v4563_v16 = vsel %vm1952_vm8, %v4531_v47, %v4073_v43  ;;  %v3486_v47 = vld [vmem:[#allocation3 + $0xb4] sm:$0xf] }
 0x376   : > { %4002 = vrot.lane.b32.xlu1 %v8447_v49, %s5829_s27  ;;  %4119 = vrot.lane.b32.xlu0 %v8447_v49, %s5832_s8  ;;  %v4595_v48 = vsel %vm2025_vm9, %v4563_v16, %v4108_v1  ;;  %v4533_v63 = vsel %vm1879_vm7, %v4501_v15, %v4028_v36  ;;  %v3490_v15 = vld [vmem:[#allocation3 + $0xbc] sm:$0x1] }
 0x377   : > { %v4627_v62 = vsel %vm2098_vm10, %v4595_v48, %v8507_v42 }
 0x378   : > { %v8519_v13 = vld [vmem:[#allocation3 + $0x9c] sm:$0xff]   ;;  %v5714_v26 = vld [vmem:[#allocation3 + $0xa4] ss:$0 sps:$4 sm:$0x11]  }
 0x379   : > { %v3867_v22 = vshll.u32 %v8519_v13, 16  ;;  %v3971_v55 = vrot.slane %v8519_v13, 1  ;;  %v3972_v28 = vrot.slane %v5714_v26, 1  ;;  %v3865_v19 = vshrl.u32 %v8519_v13, 16 }
 0x37a   : > { %v8509_v50 = vld [vmem:[#allocation3 + $0x90] sm:$0xff]   ;;  %v5712_v25 = vld [vmem:[#allocation3 + $0x98] ss:$0 sps:$4 sm:$0x11]   ;;  %v3872_v38 = vshll.u32 %v5714_v26, 16 }
 0x37b   : > { %4039 = vrot.lane.b32.xlu1 %v8509_v50, %s5830_s28  ;;  %4156 = vrot.lane.b32.xlu0 %v8509_v50, %s5833_s11  ;;  %v3855_v40 = vshll.u32 %v8509_v50, 16  ;;  %v3860_v37 = vshll.u32 %v5712_v25, 16  ;;  %v3853_v49 = vshrl.u32 %v8509_v50, 16  ;;  %v3968_v20 = vrot.slane %v8509_v50, 1 }
 0x37c   : > { %v4075_v46 = vpop.permute.xlu1 %4074  ;;  %v8516_v7 = vpop.permute.xlu0 %4191  ;;  %v3969_v18 = vrot.slane %v5712_v25, 1  ;;  %v3869_v12 = vrot.slane %v3867_v22, 1  ;;  %v8564_v54 = vsel %vm9517_vm4, %v3971_v55, %v3972_v28  ;;  %v3874_v36 = vrot.slane %v3872_v38, 1 }
 0x37d   : > { %v3857_v10 = vrot.slane %v3855_v40, 1  ;;  %v3862_v58 = vrot.slane %v3860_v37, 1  ;;  %v4565_v56 = vsel %vm1952_vm8, %v4533_v63, %v4075_v46  ;;  %v4413_v25 = vsel %vm9515_vm3, %v4411_v0, %v4412_v6  ;;  %v5717_v40 = vld [vmem:[#allocation2 + $0x90] sm:$0xfe]   ;;  %v3479_v0 = vld [vmem:[#allocation3 + $0xa8] sm:$0xf] }
 0x37e   : > { %v8540_v39 = vsel %vm9516_vm15, %v3968_v20, %v3969_v18  ;;  %v3870_v45 = vor.u32 %v3869_v12, %v3865_v19  ;;  %v5718_v46 = vld [vmem:[#allocation2 + $0x98] ss:$0 sps:$4 sm:$0x11]   ;;  %vm9518_vm15 = vcmask 261120   ;;  %vm9520_vm3 = vcmask 293888  }
 0x37f   : > { %v3858_v35 = vor.u32 %v3857_v10, %v3853_v49  ;;  %vm9519_vm4 = vmmov %vm9518_vm15 }
 0x380   : > { %v4110_v52 = vpop.permute.xlu1 %4109  ;;  %v8524_v32 = vpop.permute.xlu0 %4226 }
 0x381   : > { %v8527_v44 = vsel %vm799_vm2, %v3858_v35, %v3862_v58  ;;  %v4597_v59 = vsel %vm2025_vm9, %v4565_v56, %v4110_v52  ;;  %v4659_v58 = vsel %vm9157_vm11, %v4627_v62, %v8516_v7  ;;  %v3875_v52 = vsel %vm799_vm2, %v3870_v45, %v3874_v36  ;;  %v3483_v62 = vld [vmem:[#allocation3 + $0xb0] sm:$0x1] }
 0x382   : > { %4086 = vrot.lane.b32.xlu1 %v8527_v44, %s5831_s30  ;;  %4203 = vrot.lane.b32.xlu0 %v8527_v44, %s5834_s12  ;;  %v4691_v14 = vsel %vm9518_vm15, %v4659_v58, %v8524_v32  ;;  %v4408_v7 = vrot.slane %v5717_v40, 1  ;;  %vm9521_vm15 = vmmov %vm9520_vm3 }
 0x384   : > { %v4147_v9 = vpop.permute.xlu1 %4146  ;;  %v8537_v17 = vpop.permute.xlu0 %4228 }
 0x385   : > { %v4629_v37 = vsel %vm2098_vm10, %v4597_v59, %v4147_v9  ;;  %v4409_v9 = vrot.slane %v5718_v46, 1 }
 0x386   : > { %4121 = vrot.lane.b32.xlu1 %v8540_v39, %s5832_s8  ;;  %4238 = vrot.lane.b32.xlu0 %v8540_v39, %s5835_s18 }
 0x387   : > { %v5546_v5 = vpop.f32.mrf.mxu0 }
 0x388   : > { %v2738_v29 = vadd.f32 %v8547_v51, %v5546_v5  ;;  %v4194_v43 = vpop.permute.xlu1 %4193  ;;  %v8559_v23 = vpop.permute.xlu0 %3914 }
 0x389   : > { %v2729_v2 = vpop.f32.mrf.mxu0  ;;  %v4661_v42 = vsel %vm9157_vm11, %v4629_v37, %v4194_v43 }
 0x38a   : > { %v2790_v4 = vmax.f32 %v2738_v29, 0.0  ;;  %v2730_v3 = vadd.f32 %v8547_v51, %v2729_v2  ;;  %4158 = vrot.lane.b32.xlu1 %v8519_v13, %s5833_s11  ;;  %4240 = vrot.lane.b32.xlu0 %v8564_v54, %s5835_s18  ;;  %v4693_v31 = vsel %vm9519_vm4, %v4661_v42, %v8537_v17  ;;  %vm9522_vm4 = vcmask 1046528  }
 0x38b   : > { %v5547_v30 = vpop.f32.mrf.mxu0  ;;  %v4410_v17 = vsel %vm9522_vm4, %v4408_v7, %v4409_v9 }
 0x38c   : > { %v5463_v61 = vpack.c.bf16 %v2790_v4, %v2790_v4  ;;  %v2788_v24 = vmax.f32 %v2730_v3, 0.0  ;;  %v2741_v57 = vadd.f32 %v8547_v51, %v5547_v30  ;;  %v8577_v34 = vpop.permute.xlu1 %3912  ;;  %v4437_v35 = vpop.permute.xlu0 %4436 }
 0x38d   : > { %v2732_v1 = vpop.f32.mrf.mxu0  ;;  %v4725_v3 = vsel %vm9521_vm15, %v4693_v31, %v4437_v35  ;;  %v5724_v31 = vld [vmem:[#allocation2 + $0xbc] ss:$0 sps:$4 sm:$0x11]  }
 0x38e   : > { %v3275_v49 = vshrl.u32 %v5463_v61, 16  ;;  %v5461_v10 = vpack.c.bf16 %v2788_v24, %v2788_v24  ;;  %v2791_v8 = vmax.f32 %v2741_v57, 0.0  ;;  %v2733_v41 = vadd.f32 %v8547_v51, %v2732_v1  ;;  %4205 = vrot.lane.b32.xlu1 %v3875_v52, %s5834_s12  ;;  %3926 = vrot.lane.b32.xlu0 %v3875_v52, %s5828_s16 }
 0x38f   : > { %v3278_v18 = vshll.u32 %v5463_v61, 16 }
 0x390   : > { %v3277_v20 = vrot.slane %v3275_v49, 7  ;;  %v3258_v26 = vshrl.u32 %v5461_v10, 16  ;;  %v5464_v22 = vpack.c.bf16 %v2791_v8, %v2791_v8  ;;  %v2789_v11 = vmax.f32 %v2733_v41, 0.0  ;;  %v4435_v16 = vpop.permute.xlu1 %4434  ;;  %v8588_v29 = vpop.permute.xlu0 %4029 }
 0x391   : > { %v3261_v28 = vshll.u32 %v5461_v10, 16  ;;  %v4723_v2 = vsel %vm9520_vm3, %v4691_v14, %v4435_v16  ;;  %v8654_v16 = vld [vmem:[#allocation2 + $0xb4] sm:$0xfe]   ;;  %vm9523_vm3 = vmmov %vm9522_vm4  ;;  %vm9525_vm4 = vcmask 261120  }
 0x392   : > { %v3280_v5 = vor.u32 %v3278_v18, %v3277_v20  ;;  %v3260_v55 = vrot.slane %v3258_v26, 7  ;;  %v3283_v12 = vshrl.u32 %v5464_v22, 16  ;;  %v5462_v53 = vpack.c.bf16 %v2789_v11, %v2789_v11  ;;  %3924 = vrot.lane.b32.xlu1 %v8527_v44, %s5828_s16  ;;  %4448 = vrot.lane.b32.xlu0 %v4413_v25, %s5836_s15  ;;  %v5743_v18 = vld [vmem:[#allocation3 + $0x48] sm:$0xff]   ;;  %vm9524_vm15 = vmmov %vm9523_vm3 }
 0x393   : > { %v3286_v6 = vshll.u32 %v5464_v22, 16  ;;  %5566 = vmatprep.mubr.msk.bf16.mxu1 %vm4773_vm12, %v4723_v2  ;;  %v3281_v43 = vrot.slane %v3277_v20, 4  ;;  %v4471_v26 = vsel %vm1733_vm6, %v5743_v18, %v8577_v34 }
 0x394   : > { %v3487_v32 = vsel %vm7707_vm14, %v3280_v5, %v3486_v47  ;;  %v3263_v19 = vor.u32 %v3261_v28, %v3260_v55  ;;  %v3285_v38 = vrot.slane %v3283_v12, 7  ;;  %v3266_v4 = vshrl.u32 %v5462_v53, 16  ;;  %5567 = vmatmul.mubr.msk.bf16.gmra.mxu1 %vm4773_vm12, %v4725_v3  ;;  %v3993_v44 = vpop.permute.xlu1 %3992  ;;  %v4077_v45 = vpop.permute.xlu0 %4076 }
 0x395   : > { %3488 = vst [vmem:[#allocation3 + $0xb4] sm:$0xf] %v3487_v32  ;;  %v3269_v61 = vshll.u32 %v5462_v53, 16  ;;  %v3264_v59 = vrot.slane %v3260_v55, 4  ;;  %v4503_v47 = vsel %vm1806_vm5, %v4471_v26, %v3993_v44 }
 0x396   : > { %v3480_v48 = vsel %vm7707_vm14, %v3263_v19, %v3479_v0  ;;  %v3288_v63 = vor.u32 %v3286_v6, %v3285_v38  ;;  %v3290_v30 = vrot.slane %v3285_v38, 4  ;;  %v3268_v56 = vrot.slane %v3266_v4, 7  ;;  %4446 = vrot.lane.b32.xlu1 %v4410_v17, %s5836_s15  ;;  %4041 = vrot.lane.b32.xlu0 %v8519_v13, %s5830_s28 }
 0x397   : > { %3481 = vst [vmem:[#allocation3 + $0xa8] sm:$0xf] %v3480_v48  ;;  %v4535_v34 = vsel %vm1879_vm7, %v4503_v47, %v8588_v29  ;;  %v5744_v29 = vld [vmem:[#allocation3 + $0x54] sm:$0xff]  }
 0x398   : > { %v3289_v24 = vsel %vm7719_vm13, %v3281_v43, %v3288_v63  ;;  %v3491_v57 = vsel %vm7314_vm0, %v3290_v30, %v3490_v15  ;;  %v3271_v1 = vor.u32 %v3269_v61, %v3268_v56  ;;  %v3273_v36 = vrot.slane %v3268_v56, 4  ;;  %v3995_v46 = vpop.permute.xlu1 %3994  ;;  %v4112_v37 = vpop.permute.xlu0 %4111  ;;  %v8672_v30 = vld [vmem:[#allocation2 + $0xa8] sm:$0xfe]  }
 0x399   : > { %3489 = vst.msk [vmem:[#allocation3 + $0xb8] sm:$0xf] %vm411_vm1, %v3289_v24  ;;  %3492 = vst [vmem:[#allocation3 + $0xbc] sm:$0x1] %v3491_v57  ;;  %v4567_v15 = vsel %vm1952_vm8, %v4535_v34, %v4077_v45  ;;  %v4473_v3 = vsel %vm1733_vm6, %v5744_v29, %v8559_v23  ;;  %v4417_v63 = vrot.slane %v8654_v16, 1  ;;  %v4418_v57 = vrot.slane %v5724_v31, 1 }
 0x39a   : > { %v3272_v25 = vsel %vm7719_vm13, %v3264_v59, %v3271_v1  ;;  %v3484_v40 = vsel %vm7314_vm0, %v3273_v36, %v3483_v62  ;;  %4004 = vrot.lane.b32.xlu1 %v8540_v39, %s5829_s27  ;;  %4088 = vrot.lane.b32.xlu0 %v3875_v52, %s5831_s30  ;;  %v4505_v44 = vsel %vm1806_vm5, %v4473_v3, %v3995_v46  ;;  %v3500_v31 = vld [vmem:[#allocation3 + $0xcc] sm:$0xf]  ;;  %v3493_v3 = vld [vmem:[#allocation3 + $0xc0] sm:$0xf] }
 0x39b   : > { %3482 = vst.msk [vmem:[#allocation3 + $0xac] sm:$0xf] %vm411_vm1, %v3272_v25  ;;  %3485 = vst [vmem:[#allocation3 + $0xb0] sm:$0x1] %v3484_v40  ;;  %v4599_v62 = vsel %vm2025_vm9, %v4567_v15, %v4112_v37 }
 0x39d   : > { %v4032_v49 = vpop.permute.xlu1 %4031  ;;  %v8624_v10 = vpop.permute.xlu0 %4148 }
 0x39e   : > { %4006 = vrot.lane.b32.xlu1 %v8564_v54, %s5829_s27  ;;  %4123 = vrot.lane.b32.xlu0 %v8564_v54, %s5832_s8  ;;  %v4537_v23 = vsel %vm1879_vm7, %v4505_v44, %v4032_v49  ;;  %v4631_v37 = vsel %vm2098_vm10, %v4599_v62, %v8624_v10 }
 0x3a0   : > { %v8636_v20 = vld [vmem:[#allocation3 + $0xb4] sm:$0xff]   ;;  %v5722_v28 = vld [vmem:[#allocation3 + $0xbc] ss:$0 sps:$4 sm:$0x11]  }
 0x3a1   : > { %v3891_v12 = vshll.u32 %v8636_v20, 16  ;;  %v3977_v19 = vrot.slane %v8636_v20, 1  ;;  %v3978_v38 = vrot.slane %v5722_v28, 1  ;;  %v3889_v43 = vshrl.u32 %v8636_v20, 16 }
 0x3a2   : > { %v8626_v8 = vld [vmem:[#allocation3 + $0xa8] sm:$0xff]   ;;  %v5720_v35 = vld [vmem:[#allocation3 + $0xb0] ss:$0 sps:$4 sm:$0x11]   ;;  %v3896_v48 = vshll.u32 %v5722_v28, 16 }
 0x3a3   : > { %4043 = vrot.lane.b32.xlu1 %v8626_v8, %s5830_s28  ;;  %4160 = vrot.lane.b32.xlu0 %v8626_v8, %s5833_s11  ;;  %v3879_v39 = vshll.u32 %v8626_v8, 16  ;;  %v3884_v41 = vshll.u32 %v5720_v35, 16  ;;  %v3877_v54 = vshrl.u32 %v8626_v8, 16  ;;  %v3974_v5 = vrot.slane %v8626_v8, 1 }
 0x3a4   : > { %v4079_v58 = vpop.permute.xlu1 %4078  ;;  %v8633_v42 = vpop.permute.xlu0 %4195  ;;  %v3975_v55 = vrot.slane %v5720_v35, 1  ;;  %v3893_v6 = vrot.slane %v3891_v12, 1  ;;  %v8681_v1 = vsel %vm9524_vm15, %v3977_v19, %v3978_v38  ;;  %vm9526_vm15 = vmmov %vm9525_vm4 }
 0x3a5   : > { %v3881_v52 = vrot.slane %v3879_v39, 1  ;;  %v3886_v14 = vrot.slane %v3884_v41, 1  ;;  %v4569_v25 = vsel %vm1952_vm8, %v4537_v23, %v4079_v58  ;;  %v3898_v41 = vrot.slane %v3896_v48, 1 }
 0x3a6   : > { %v8659_v32 = vsel %vm9523_vm3, %v3974_v5, %v3975_v55  ;;  %v3894_v36 = vor.u32 %v3893_v6, %v3889_v43  ;;  %v4414_v58 = vrot.slane %v8672_v30, 1  ;;  %v4663_v5 = vsel %vm9157_vm11, %v4631_v37, %v8633_v42  ;;  %v3497_v37 = vld [vmem:[#allocation3 + $0xc8] sm:$0x1] }
 0x3a7   : > { %v3882_v22 = vor.u32 %v3881_v52, %v3877_v54  ;;  %v5726_v54 = vld [vmem:[#allocation2 + $0xb0] ss:$0 sps:$4 sm:$0x11]   ;;  %v4419_v42 = vsel %vm9523_vm3, %v4417_v63, %v4418_v57 }
 0x3a8   : > { %v4114_v11 = vpop.permute.xlu1 %4113  ;;  %v8641_v7 = vpop.permute.xlu0 %4230  ;;  %v3899_v55 = vsel %vm799_vm2, %v3894_v36, %v3898_v41  ;;  %v4415_v19 = vrot.slane %v5726_v54, 1 }
 0x3a9   : > { %v8644_v9 = vsel %vm799_vm2, %v3882_v22, %v3886_v14  ;;  %v4601_v49 = vsel %vm2025_vm9, %v4569_v25, %v4114_v11 }
 0x3aa   : > { %4090 = vrot.lane.b32.xlu1 %v8644_v9, %s5831_s30  ;;  %4207 = vrot.lane.b32.xlu0 %v8644_v9, %s5834_s12 }
 0x3ac   : > { %v4151_v0 = vpop.permute.xlu1 %4150  ;;  %v8656_v53 = vpop.permute.xlu0 %4232 }
 0x3ad   : > { %v4633_v52 = vsel %vm2098_vm10, %v4601_v49, %v4151_v0  ;;  %v4695_v0 = vsel %vm9525_vm4, %v4663_v5, %v8641_v7 }
 0x3ae   : > { %4125 = vrot.lane.b32.xlu1 %v8659_v32, %s5832_s8  ;;  %4242 = vrot.lane.b32.xlu0 %v8659_v32, %s5835_s18 }
 0x3af   : > { %v5550_v2 = vpop.f32.mrf.mxu0 }
 0x3b0   : > { %v2754_v4 = vadd.f32 %v8547_v51, %v5550_v2  ;;  %v4198_v61 = vpop.permute.xlu1 %4197  ;;  %v8676_v24 = vpop.permute.xlu0 %3918 }
 0x3b1   : > { %v2745_v17 = vpop.f32.mrf.mxu0  ;;  %v4665_v10 = vsel %vm9157_vm11, %v4633_v52, %v4198_v61  ;;  %vm9527_vm11 = vcmask 293888  }
 0x3b2   : > { %v2794_v45 = vmax.f32 %v2754_v4, 0.0  ;;  %v2746_v56 = vadd.f32 %v8547_v51, %v2745_v17  ;;  %4162 = vrot.lane.b32.xlu1 %v8636_v20, %s5833_s11  ;;  %4244 = vrot.lane.b32.xlu0 %v8681_v1, %s5835_s18  ;;  %v4697_v43 = vsel %vm9526_vm15, %v4665_v10, %v8656_v53  ;;  %vm9528_vm4 = vmmov %vm9527_vm11  ;;  %v4416_v53 = vsel %vm9523_vm3, %v4414_v58, %v4415_v19 }
 0x3b3   : > { %v5551_v59 = vpop.f32.mrf.mxu0 }
 0x3b4   : > { %v5467_v40 = vpack.c.bf16 %v2794_v45, %v2794_v45  ;;  %v2792_v46 = vmax.f32 %v2746_v56, 0.0  ;;  %v2757_v35 = vadd.f32 %v8547_v51, %v5551_v59  ;;  %v8694_v14 = vpop.permute.xlu1 %3916  ;;  %v4441_v47 = vpop.permute.xlu0 %4440  ;;  %v3504_v45 = vld [vmem:[#allocation3 + $0xd4] sm:$0x1] }
 0x3b5   : > { %v2748_v39 = vpop.f32.mrf.mxu0  ;;  %v4729_v61 = vsel %vm9528_vm4, %v4697_v43, %v4441_v47 }
 0x3b6   : > { %v3309_v18 = vshrl.u32 %v5467_v40, 16  ;;  %v5465_v26 = vpack.c.bf16 %v2792_v46, %v2792_v46  ;;  %v2795_v22 = vmax.f32 %v2757_v35, 0.0  ;;  %v2749_v11 = vadd.f32 %v8547_v51, %v2748_v39  ;;  %4209 = vrot.lane.b32.xlu1 %v3899_v55, %s5834_s12  ;;  %3930 = vrot.lane.b32.xlu0 %v3899_v55, %s5828_s16 }
 0x3b7   : > { %v3312_v12 = vshll.u32 %v5467_v40, 16 }
 0x3b8   : > { %v3311_v28 = vrot.slane %v3309_v18, 7  ;;  %v3292_v34 = vshrl.u32 %v5465_v26, 16  ;;  %v5468_v16 = vpack.c.bf16 %v2795_v22, %v2795_v22  ;;  %v2793_v2 = vmax.f32 %v2749_v11, 0.0  ;;  %v4439_v4 = vpop.permute.xlu1 %4438  ;;  %v8706_v29 = vpop.permute.xlu0 %4033 }
 0x3b9   : > { %v3295_v6 = vshll.u32 %v5465_v26, 16  ;;  %v4727_v48 = vsel %vm9527_vm11, %v4695_v0, %v4439_v4 }
 0x3ba   : > { %v3314_v38 = vor.u32 %v3312_v12, %v3311_v28  ;;  %v3294_v51 = vrot.slane %v3292_v34, 7  ;;  %v3317_v15 = vshrl.u32 %v5468_v16, 16  ;;  %v5466_v17 = vpack.c.bf16 %v2793_v2, %v2793_v2  ;;  %3928 = vrot.lane.b32.xlu1 %v8644_v9, %s5828_s16  ;;  %4452 = vrot.lane.b32.xlu0 %v4419_v42, %s5836_s15  ;;  %s5755_s16 = scalar_lea.vmem %s5754_s20, 2048 }
 0x3bb   : > { %v3320_v44 = vshll.u32 %v5468_v16, 16  ;;  %5570 = vmatprep.mubr.msk.bf16.mxu1 %vm4773_vm12, %v4727_v48  ;;  %v3315_v57 = vrot.slane %v3311_v28, 4  ;;  %v5731_v16 = vld [vmem:[#allocation2 + $0xc8] ss:$0 sps:$4 sm:$0x11]  }
 0x3bc   : > { %v3501_v7 = vsel %vm7707_vm14, %v3314_v38, %v3500_v31  ;;  %v3297_v30 = vor.u32 %v3295_v6, %v3294_v51  ;;  %v3319_v63 = vrot.slane %v3317_v15, 7  ;;  %v3300_v56 = vshrl.u32 %v5466_v17, 16  ;;  %5571 = vmatmul.mubr.msk.bf16.gmra.mxu1 %vm4773_vm12, %v4729_v61  ;;  %v8722_v9 = vpop.permute.xlu1 %3996  ;;  %v8724_v36 = vpop.permute.xlu0 %4080  ;;  %v5730_v31 = vld [vmem:[#allocation2 + $0xc0] sm:$0xfe]   ;;  %v5745_v15 = vld [vmem:[#allocation3 + $0x60] sm:$0xff]  }
 0x3bd   : > { %3502 = vst [vmem:[#allocation3 + $0xcc] sm:$0xf] %v3501_v7  ;;  %v3303_v40 = vshll.u32 %v5466_v17, 16  ;;  %v3298_v49 = vrot.slane %v3294_v51, 4  ;;  %v4475_v4 = vsel %vm1733_vm6, %v5745_v15, %v8694_v14  ;;  %v4421_v17 = vrot.slane %v5731_v16, 1  ;;  %v5746_v61 = vld [vmem:[#allocation3 + $0x6c] sm:$0xff]  }
 0x3be   : > { %v3494_v62 = vsel %vm7707_vm14, %v3297_v30, %v3493_v3  ;;  %v3322_v23 = vor.u32 %v3320_v44, %v3319_v63  ;;  %v3324_v59 = vrot.slane %v3319_v63, 4  ;;  %v3302_v25 = vrot.slane %v3300_v56, 7  ;;  %4450 = vrot.lane.b32.xlu1 %v4416_v53, %s5836_s15  ;;  %4045 = vrot.lane.b32.xlu0 %v8636_v20, %s5830_s28 }
 0x3bf   : > { %3495 = vst [vmem:[#allocation3 + $0xc0] sm:$0xf] %v3494_v62  ;;  %v4420_v3 = vrot.slane %v5730_v31, 1  ;;  %v4507_v48 = vsel %vm1806_vm5, %v4475_v4, %v8722_v9  ;;  %v4477_v53 = vsel %vm1733_vm6, %v5746_v61, %v8676_v24  ;;  %v5734_v24 = vld [vmem:[#allocation2 + $0xd4] ss:$0 sps:$4 sm:$0x11]  }
 0x3c0   : > { %v3323_v46 = vsel %vm7719_vm13, %v3315_v57, %v3322_v23  ;;  %v3505_v35 = vsel %vm7314_vm0, %v3324_v59, %v3504_v45  ;;  %v3305_v39 = vor.u32 %v3303_v40, %v3302_v25  ;;  %v3307_v41 = vrot.slane %v3302_v25, 4  ;;  %v3999_v18 = vpop.permute.xlu1 %3998  ;;  %v8741_v26 = vpop.permute.xlu0 %4115 }
 0x3c1   : > { %3503 = vst.msk [vmem:[#allocation3 + $0xd0] sm:$0xf] %vm411_vm1, %v3323_v46  ;;  %3506 = vst [vmem:[#allocation3 + $0xd4] sm:$0x1] %v3505_v35  ;;  %v4539_v45 = vsel %vm1879_vm7, %v4507_v48, %v8706_v29  ;;  %v4509_v23 = vsel %vm1806_vm5, %v4477_v53, %v3999_v18  ;;  %v5733_v35 = vld [vmem:[#allocation2 + $0xcc] sm:$0xfe]  }
 0x3c2   : > { %3522 = vst.msk [vmem:[#allocation3 + $0xd0] sm:$0xf] %vm411_vm1, %v9422_v21  ;;  %v3306_v54 = vsel %vm7719_vm13, %v3298_v49, %v3305_v39  ;;  %v3498_v58 = vsel %vm7314_vm0, %v3307_v41, %v3497_v37  ;;  %4008 = vrot.lane.b32.xlu1 %v8659_v32, %s5829_s27  ;;  %4092 = vrot.lane.b32.xlu0 %v3899_v55, %s5831_s30  ;;  %vm9531_vm13 = vcmask 228352  }
 0x3c3   : > { %3496 = vst.msk [vmem:[#allocation3 + $0xc4] sm:$0xf] %vm411_vm1, %v3306_v54  ;;  %3499 = vst [vmem:[#allocation3 + $0xc8] sm:$0x1] %v3498_v58  ;;  %v4571_v25 = vsel %vm1952_vm8, %v4539_v45, %v8724_v36  ;;  %v8807_v45 = vld [vmem:[%s9016_s5] ss:$0 sm:$0xff] }
 0x3c4   : > { %v3519_v52 = vld [vmem:[#allocation3 + $0xcc] sm:$0xf]  ;;  %vm9529_vm1 = vmmov %vm9523_vm3  ;;  %v4603_v41 = vsel %vm2025_vm9, %v4571_v25, %v8741_v26 }
 0x3c5   : > { %v3520_v21 = vsel %vm7707_vm14, 0, %v3519_v52  ;;  %v4036_v47 = vpop.permute.xlu1 %4035  ;;  %v4153_v5 = vpop.permute.xlu0 %4152  ;;  %vm9530_vm11 = vmmov %vm9529_vm1 }
 0x3c6   : > { %3521 = vst [vmem:[#allocation3 + $0xcc] sm:$0xf] %v3520_v21  ;;  %4010 = vrot.lane.b32.xlu1 %v8681_v1, %s5829_s27  ;;  %4127 = vrot.lane.b32.xlu0 %v8681_v1, %s5832_s8  ;;  %v4422_v14 = vsel %vm9530_vm11, %v4420_v3, %v4421_v17  ;;  %v4541_v40 = vsel %vm1879_vm7, %v4509_v23, %v4036_v47  ;;  %v4424_v47 = vrot.slane %v5734_v24, 1  ;;  %vm9533_vm14 = vmmov %vm9526_vm15  ;;  %v5748_v17 = vld [vmem:[#allocation3 + $0x84] sm:$0xff]  }
 0x3c7   : > { %v4635_v52 = vsel %vm2098_vm10, %v4603_v41, %v4153_v5  ;;  %vm9534_vm15 = vmmov %vm9533_vm14 }
 0x3c8   : > { %v3523_v60 = vld [vmem:[#allocation3 + $0xd4] sm:$0x1]  ;;  %vm9536_vm3 = vmmov %vm9528_vm4 }
 0x3c9   : > { %v3524_v22 = vsel %vm7314_vm0, 0, %v3523_v60  ;;  %vm9532_vm0 = vmmov %vm9531_vm13 }
 0x3ca   : > { %3525 = vst [vmem:[#allocation3 + $0xd4] sm:$0x1] %v3524_v22  ;;  %v5727_v32 = vld [vmem:[#allocation3 + $0xc0] sm:$0xff]   ;;  %v5728_v10 = vld [vmem:[#allocation3 + $0xc8] ss:$0 sps:$4 sm:$0x11]   ;;  %vm9537_vm11 = vmmov %vm9532_vm0 }
 0x3cb   : > { %4047 = vrot.lane.b32.xlu1 %v5727_v32, %s5830_s28  ;;  %4164 = vrot.lane.b32.xlu0 %v5727_v32, %s5833_s11  ;;  %v4055_v33 = vshll.u32 %v5727_v32, 16  ;;  %v4060_v28 = vshll.u32 %v5728_v10, 16  ;;  %v4053_v12 = vshrl.u32 %v5727_v32, 16  ;;  %v4096_v38 = vrot.slane %v5727_v32, 1 }
 0x3cc   : > { %v4083_v11 = vpop.permute.xlu1 %4082  ;;  %v4200_v55 = vpop.permute.xlu0 %4199  ;;  %v4097_v51 = vrot.slane %v5728_v10, 1  ;;  %v4423_v22 = vrot.slane %v5733_v35, 1 }
 0x3cd   : > { %v4057_v34 = vrot.slane %v4055_v33, 1  ;;  %v4062_v0 = vrot.slane %v4060_v28, 1  ;;  %v5729_v27 = vld [vmem:[#allocation3 + $0xcc] sm:$0xff]   ;;  %v4573_v29 = vsel %vm1952_vm8, %v4541_v40, %v4083_v11  ;;  %v4667_v21 = vsel %vm9532_vm0, %v4635_v52, %v4200_v55 }
 0x3ce   : > { %v4174_v43 = vshll.u32 %v5729_v27, 16  ;;  %v4098_v63 = vsel %vm9529_vm1, %v4096_v38, %v4097_v51  ;;  %v4172_v59 = vshrl.u32 %v5729_v27, 16  ;;  %v4215_v60 = vrot.slane %v5729_v27, 1  ;;  %v5747_v38 = vld [vmem:[#allocation3 + $0x78] sm:$0xff]  }
 0x3cf   : > { %v4058_v1 = vor.u32 %v4057_v34, %v4053_v12  ;;  %v4425_v55 = vsel %vm9529_vm1, %v4423_v22, %v4424_v47 }
 0x3d0   : > { %v4118_v2 = vpop.permute.xlu1 %4117  ;;  %v4235_v42 = vpop.permute.xlu0 %4234  ;;  %v4176_v56 = vrot.slane %v4174_v43, 1 }
 0x3d1   : > { %v4063_v19 = vsel %vm799_vm2, %v4058_v1, %v4062_v0  ;;  %v5732_v6 = vld [vmem:[#allocation3 + $0xd4] ss:$0 sps:$4 sm:$0x11]   ;;  %v4605_v37 = vsel %vm2025_vm9, %v4573_v29, %v4118_v2  ;;  %v4699_v32 = vsel %vm9533_vm14, %v4667_v21, %v4235_v42 }
 0x3d2   : > { %4094 = vrot.lane.b32.xlu1 %v4063_v19, %s5831_s30  ;;  %4211 = vrot.lane.b32.xlu0 %v4063_v19, %s5834_s12  ;;  %v4179_v44 = vshll.u32 %v5732_v6, 16  ;;  %v4177_v46 = vor.u32 %v4176_v56, %v4172_v59  ;;  %v4216_v58 = vrot.slane %v5732_v6, 1  ;;  %s322_s30 = sand.u32 1, %s5809_s22  }
 0x3d3   : > { %s8965_s19 = scalar_lea.sflag [#allocation6], %s322_s30 }
 0x3d4   : > { %v4155_v7 = vpop.permute.xlu1 %4154  ;;  %v4237_v30 = vpop.permute.xlu0 %4236  ;;  %v4181_v9 = vrot.slane %v4179_v44, 1 }
 0x3d5   : > { %v4637_v36 = vsel %vm2098_vm10, %v4605_v37, %v4155_v7 }
 0x3d6   : > { %4129 = vrot.lane.b32.xlu1 %v4098_v63, %s5832_s8  ;;  %4246 = vrot.lane.b32.xlu0 %v4098_v63, %s5835_s18  ;;  %v4182_v54 = vsel %vm799_vm2, %v4177_v46, %v4181_v9  ;;  %vm9535_vm2 = vmmov %vm9529_vm1  ;;  %s5237_s8 = sshll.u32 %s322_s30, 6 }
 0x3d7   : > { %v4217_v28 = vsel %vm9535_vm2, %v4215_v60, %v4216_v58  ;;  %vm9543_vm2 = vmmov %vm9537_vm11 }
 0x3d8   : > { %v4202_v57 = vpop.permute.xlu1 %4201  ;;  %v3923_v62 = vpop.permute.xlu0 %3922 }
 0x3d9   : > { %v4669_v18 = vsel %vm9531_vm13, %v4637_v36, %v4202_v57  ;;  %v4481_v43 = vsel %vm1733_vm6, %v5748_v17, %v3923_v62  ;;  %vm9538_vm13 = vmmov %vm9532_vm0 }
 0x3da   : > { %4166 = vrot.lane.b32.xlu1 %v5729_v27, %s5833_s11  ;;  %4454 = vrot.lane.b32.xlu0 %v4422_v14, %s5836_s15  ;;  %v4701_v33 = vsel %vm9534_vm15, %v4669_v18, %v4237_v30  ;;  %vm9539_vm0 = vmmov %vm9533_vm14  ;;  %s8833_s11 = scalar_lea.vmem [#allocation5], %s5237_s8 }
 0x3db   : > { %vm9540_vm14 = vmmov %vm9539_vm0 }
 0x3dc   : > { %v3921_v49 = vpop.permute.xlu1 %3920  ;;  %v4445_v39 = vpop.permute.xlu0 %4444  ;;  %vm9541_vm15 = vmmov %vm9536_vm3 }
 0x3dd   : > { %v4733_v5 = vsel %vm9536_vm3, %v4701_v33, %v4445_v39  ;;  %v4479_v51 = vsel %vm1733_vm6, %v5747_v38, %v3921_v49  ;;  %vm9545_vm1 = vmmov %vm9539_vm0 }
 0x3de   : > { %4213 = vrot.lane.b32.xlu1 %v4182_v54, %s5834_s12  ;;  %s5469_s12 = sshll.u32 %s5817_s24, 10 }
 0x3df   : > { %s8957_s17 = scalar_lea.hbm %s9017_s6, %s5469_s12 }
 0x3e0   : > { %v4443_v10 = vpop.permute.xlu1 %4442  ;;  %v4038_v26 = vpop.permute.xlu0 %4037 }
 0x3e1   : > { %v4731_v11 = vsel %vm9528_vm4, %v4699_v32, %v4443_v10  ;;  %vm9542_vm4 = vmmov %vm9536_vm3 }
 0x3e2   : > { %4248 = vrot.lane.b32.xlu1 %v4217_v28, %s5835_s18  ;;  %5574 = vmatprep.mubr.msk.bf16.mxu1 %vm4773_vm12, %v4731_v11  ;;  %vm9544_vm3 = vmmov %vm9543_vm2  ;;  %s5114_s18 = sshll.u32 %s8833_s11, 4  ;;  %s8959_s18 = int_to_ptr.vmem [resolvable:$true] %s5114_s18 }
 0x3e3   : > { %5575 = vmatmul.mubr.msk.bf16.gmra.mxu1 %vm4773_vm12, %v4733_v5  ;;  %s5749_s24 = scalar_lea.vmem %s8959_s18, 1024  ;;  %p5756_p1 = scmp.lt.s32.totalorder %s8959_s18, %s5754_s20 }
 0x3e4   : > { %v4001_v12 = vpop.permute.xlu1 %4000  ;;  %v4085_v34 = vpop.permute.xlu0 %4084  ;;  %p5750_p12 = scmp.ne.s32.totalorder %s8959_s18, %s5749_s24  ;;  %p5757_p2 = scmp.lt.s32.totalorder %s5755_s16, %s5749_s24 }
 0x3e5   : > { %v4511_v6 = vsel %vm1806_vm5, %v4479_v51, %v4001_v12 }
 0x3e6   : > { %4456 = vrot.lane.b32.xlu1 %v4425_v55, %s5836_s15  ;;  %v4543_v3 = vsel %vm1879_vm7, %v4511_v6, %v4038_v26  ;;  %p5751_p13 = pnand %p5750_p12, %p5914_p4  ;;  %p5758_p3 = por %p5757_p2, %p5756_p1 }
 0x3e7   : > { %v4575_v63 = vsel %vm1952_vm8, %v4543_v3, %v4085_v34 }
 0x3e8   : > { %v4003_v16 = vpop.permute.xlu1 %4002  ;;  %v4120_v1 = vpop.permute.xlu0 %4119  ;;  %p5752_p0 = pneg %p5751_p13 }
 0x3e9   : > { %v4513_v30 = vsel %vm1806_vm5, %v4481_v43, %v4003_v16  ;;  %v4607_v57 = vsel %vm2025_vm9, %v4575_v63, %v4120_v1 }
 0x3ea   : > { %p5759_p5 = pnand %p5758_p3, %p5752_p0 }
 0x3ed   : > { %v4040_v0 = vpop.permute.xlu1 %4039  ;;  %v4157_v27 = vpop.permute.xlu0 %4156 }
 0x3ee   : > { %v4545_v44 = vsel %vm1879_vm7, %v4513_v30, %v4040_v0  ;;  %v4639_v9 = vsel %vm2098_vm10, %v4607_v57, %v4157_v27 }
 0x3f4   : > { %v4087_v31 = vpop.permute.xlu1 %4086  ;;  %v4204_v2 = vpop.permute.xlu0 %4203 }
 0x3f5   : > { %v4577_v14 = vsel %vm1952_vm8, %v4545_v44, %v4087_v31  ;;  %v4671_v29 = vsel %vm9538_vm13, %v4639_v9, %v4204_v2  ;;  %vm9547_vm13 = vmmov %vm9542_vm4 }
 0x3f8   : > { %v4122_v42 = vpop.permute.xlu1 %4121  ;;  %v4239_v19 = vpop.permute.xlu0 %4238 }
 0x3f9   : > { %v4609_v56 = vsel %vm2025_vm9, %v4577_v14, %v4122_v42  ;;  %v4703_v35 = vsel %vm9539_vm0, %v4671_v29, %v4239_v19 }
 0x3fc   : > { %v4159_v15 = vpop.permute.xlu1 %4158  ;;  %v4241_v4 = vpop.permute.xlu0 %4240 }
 0x3fd   : > { %v4641_v62 = vsel %vm2098_vm10, %v4609_v56, %v4159_v15 }
 0x400   : > { %v4206_v48 = vpop.permute.xlu1 %4205  ;;  %v3927_v7 = vpop.permute.xlu0 %3926 }
 0x401   : > { %v4673_v25 = vsel %vm9537_vm11, %v4641_v62, %v4206_v48  ;;  %v4485_v19 = vsel %vm1733_vm6, %v8519_v13, %v3927_v7  ;;  %vm9546_vm11 = vmmov %vm9539_vm0 }
 0x402   : > { %v4705_v49 = vsel %vm9540_vm14, %v4673_v25, %v4241_v4  ;;  %vm9548_vm0 = vmmov %vm9542_vm4 }
 0x403   : > { %vm9549_vm14 = vmmov %vm9543_vm2 }
 0x404   : > { %v5560_v61 = vpop.f32.mrf.mxu1  ;;  %v3925_v53 = vpop.permute.xlu1 %3924 }
 0x405   : > { %v4853_v23 = vadd.f32 %v5560_v61, %v8807_v45  ;;  %v4449_v59 = vpop.permute.xlu0 %4448  ;;  %v4483_v0 = vsel %vm1733_vm6, %v8509_v50, %v3925_v53 }
 0x406   : > { %v4844_v40 = vpop.f32.mrf.mxu1  ;;  %v4737_v54 = vsel %vm9542_vm4, %v4705_v49, %v4449_v59  ;;  %vm9551_vm4 = vmmov %vm9548_vm0 }
 0x407   : > { %4973 = vst.msk [vmem:[#allocation4 + $0x10] sm:$0xff] %vm1806_vm5, %v4853_v23  ;;  %v4845_v46 = vadd.f32 %v8807_v45, %v4844_v40 }
 0x408   : > { %v5561_v24 = vpop.f32.mrf.mxu1  ;;  %v4447_v37 = vpop.permute.xlu1 %4446 }
 0x409   : > { %4971 = vst.msk [vmem:[#allocation4] sm:$0xff] %vm1806_vm5, %v4845_v46  ;;  %v4856_v39 = vadd.f32 %v5561_v24, %v8807_v45  ;;  %v4735_v41 = vsel %vm9541_vm15, %v4703_v35, %v4447_v37  ;;  %v4042_v36 = vpop.permute.xlu0 %4041  ;;  %vm9550_vm15 = vmmov %vm9545_vm1 }
 0x40a   : > { %v4847_v58 = vpop.f32.mrf.mxu1  ;;  %5578 = vmatprep.mubr.msk.bf16.mxu1 %vm4773_vm12, %v4735_v41 }
 0x40b   : > { %4974 = vst.msk [vmem:[#allocation4 + $0x18] sm:$0xff] %vm1806_vm5, %v4856_v39  ;;  %v4848_v52 = vadd.f32 %v8807_v45, %v4847_v58  ;;  %5579 = vmatmul.mubr.msk.bf16.gmra.mxu1 %vm4773_vm12, %v4737_v54 }
 0x40c   : > { %v4005_v18 = vpop.permute.xlu1 %4004 }
 0x40d   : > { %4972 = vst.msk [vmem:[#allocation4 + $0x8] sm:$0xff] %vm1806_vm5, %v4848_v52  ;;  %v4089_v21 = vpop.permute.xlu0 %4088  ;;  %v4515_v27 = vsel %vm1806_vm5, %v4483_v0, %v4005_v18 }
 0x40e   : > { %v4547_v42 = vsel %vm1879_vm7, %v4515_v27, %v4042_v36 }
 0x40f   : > { %v4579_v15 = vsel %vm1952_vm8, %v4547_v42, %v4089_v21 }
 0x410   : > { %v4007_v60 = vpop.permute.xlu1 %4006 }
 0x411   : > { %v4124_v22 = vpop.permute.xlu0 %4123  ;;  %v4517_v6 = vsel %vm1806_vm5, %v4485_v19, %v4007_v60 }
 0x412   : > { %v5035_v26 = vld [vmem:[#allocation4 + $0x10] ss:$2 sm:$0xff]  ;;  %v5051_v11 = vld [vmem:[#allocation4 + $0x11] ss:$2 sm:$0xff]  ;;  %v4611_v48 = vsel %vm2025_vm9, %v4579_v15, %v4124_v22 }
 0x414   : > { %v5003_v47 = vld [vmem:[#allocation4] ss:$2 sm:$0xff]  ;;  %v5019_v32 = vld [vmem:[#allocation4 + $0x1] ss:$2 sm:$0xff] }
 0x415   : > { %v5066_v10 = vadd.f32 %v5019_v32, %v5003_v47  ;;  %v4044_v28 = vpop.permute.xlu1 %4043  ;;  %v4161_v5 = vpop.permute.xlu0 %4160 }
 0x416   : > { %v4549_v4 = vsel %vm1879_vm7, %v4517_v6, %v4044_v28  ;;  %v4643_v63 = vsel %vm2098_vm10, %v4611_v48, %v4161_v5 }
 0x417   : > { %v5074_v33 = vadd.f32 %v5066_v10, %v5035_v26 }
 0x419   : > { %v5082_v55 = vadd.f32 %v5074_v33, %v5051_v11 }
 0x41b   : > { %5090 = vst.msk [vmem:[%s8833_s11] sm:$0xff] %vm1806_vm5, %v5082_v55 }
 0x41c   : > { %v4091_v12 = vpop.permute.xlu1 %4090  ;;  %v4208_v34 = vpop.permute.xlu0 %4207 }
 0x41d   : > { %v4581_v50 = vsel %vm1952_vm8, %v4549_v4, %v4091_v12  ;;  %v4675_v56 = vsel %vm9544_vm3, %v4643_v63, %v4208_v34 }
 0x420   : > { %v4126_v16 = vpop.permute.xlu1 %4125  ;;  %v4243_v1 = vpop.permute.xlu0 %4242 }
 0x421   : > { %v4613_v3 = vsel %vm2025_vm9, %v4581_v50, %v4126_v16  ;;  %v4707_v53 = vsel %vm9545_vm1, %v4675_v56, %v4243_v1 }
 0x424   : > { %v4163_v31 = vpop.permute.xlu1 %4162  ;;  %v4245_v2 = vpop.permute.xlu0 %4244 }
 0x425   : > { %v4645_v30 = vsel %vm2098_vm10, %v4613_v3, %v4163_v31 }
 0x428   : > { %v4210_v38 = vpop.permute.xlu1 %4209  ;;  %v8843_v51 = vpop.permute.xlu0 %3930 }
 0x429   : > { %v4677_v44 = vsel %vm9543_vm2, %v4645_v30, %v4210_v38  ;;  %v4489_v27 = vsel %vm1733_vm6, %v8636_v20, %v8843_v51 }
 0x42a   : > { %v4709_v23 = vsel %vm9546_vm11, %v4677_v44, %v4245_v2 }
 0x42c   : > { %v5564_v17 = vpop.f32.mrf.mxu1  ;;  %v3929_v43 = vpop.permute.xlu1 %3928 }
 0x42d   : > { %v4869_v13 = vadd.f32 %v5564_v17, %v8807_v45  ;;  %v4453_v7 = vpop.permute.xlu0 %4452  ;;  %v4487_v58 = vsel %vm1733_vm6, %v8626_v8, %v3929_v43  ;;  %vm9552_vm6 = vmmov %vm9545_vm1 }
 0x42e   : > { %v4860_v14 = vpop.f32.mrf.mxu1  ;;  %v4741_v40 = vsel %vm9548_vm0, %v4709_v23, %v4453_v7 }
 0x42f   : > { %4977 = vst.msk [vmem:[#allocation4 + $0x30] sm:$0xff] %vm1806_vm5, %v4869_v13  ;;  %v4861_v61 = vadd.f32 %v8807_v45, %v4860_v14 }
 0x430   : > { %v5565_v57 = vpop.f32.mrf.mxu1  ;;  %v4451_v62 = vpop.permute.xlu1 %4450 }
 0x431   : > { %4975 = vst.msk [vmem:[#allocation4 + $0x20] sm:$0xff] %vm1806_vm5, %v4861_v61  ;;  %v4872_v59 = vadd.f32 %v5565_v57, %v8807_v45  ;;  %v4739_v9 = vsel %vm9547_vm13, %v4707_v53, %v4451_v62  ;;  %v4046_v25 = vpop.permute.xlu0 %4045 }
 0x432   : > { %v4863_v29 = vpop.f32.mrf.mxu1  ;;  %5582 = vmatprep.mubr.msk.bf16.mxu1 %vm4773_vm12, %v4739_v9 }
 0x433   : > { %4978 = vst.msk [vmem:[#allocation4 + $0x38] sm:$0xff] %vm1806_vm5, %v4872_v59  ;;  %v4864_v46 = vadd.f32 %v8807_v45, %v4863_v29  ;;  %5583 = vmatmul.mubr.msk.bf16.gmra.mxu1 %vm4773_vm12, %v4741_v40 }
 0x434   : > { %v4009_v35 = vpop.permute.xlu1 %4008 }
 0x435   : > { %4976 = vst.msk [vmem:[#allocation4 + $0x28] sm:$0xff] %vm1806_vm5, %v4864_v46  ;;  %v4093_v24 = vpop.permute.xlu0 %4092  ;;  %v4519_v21 = vsel %vm1806_vm5, %v4487_v58, %v4009_v35 }
 0x436   : > { %v4551_v32 = vsel %vm1879_vm7, %v4519_v21, %v4046_v25 }
 0x437   : > { %v4583_v33 = vsel %vm1952_vm8, %v4551_v32, %v4093_v24 }
 0x438   : > { %v4011_v37 = vpop.permute.xlu1 %4010 }
 0x439   : > { %v4128_v49 = vpop.permute.xlu0 %4127  ;;  %v4521_v31 = vsel %vm1806_vm5, %v4489_v27, %v4011_v37 }
 0x43a   : > { %v5037_v54 = vld [vmem:[#allocation4 + $0x30] ss:$2 sm:$0xff]  ;;  %v5053_v18 = vld [vmem:[#allocation4 + $0x31] ss:$2 sm:$0xff]  ;;  %v4615_v5 = vsel %vm2025_vm9, %v4583_v33, %v4128_v49 }
 0x43c   : > { %v5005_v39 = vld [vmem:[#allocation4 + $0x20] ss:$2 sm:$0xff]  ;;  %v5021_v41 = vld [vmem:[#allocation4 + $0x21] ss:$2 sm:$0xff] }
 0x43d   : > { %v5067_v36 = vadd.f32 %v5021_v41, %v5005_v39  ;;  %v4048_v60 = vpop.permute.xlu1 %4047  ;;  %v4165_v22 = vpop.permute.xlu0 %4164 }
 0x43e   : > { %v4647_v8 = vsel %vm2098_vm10, %v4615_v5, %v4165_v22  ;;  %v4553_v2 = vsel %vm1879_vm7, %v4521_v31, %v4048_v60  ;;  %vm9553_vm7 = vmmov %vm9548_vm0 }
 0x43f   : > { %v5075_v52 = vadd.f32 %v5067_v36, %v5037_v54 }
 0x441   : > { %v5083_v47 = vadd.f32 %v5075_v52, %v5053_v18 }
 0x443   : > { %5091 = vst.msk [vmem:[%s8833_s11 + $0x8] sm:$0xff] %vm1806_vm5, %v5083_v47 }
 0x444   : > { %v4095_v10 = vpop.permute.xlu1 %4094  ;;  %v4212_v26 = vpop.permute.xlu0 %4211 }
 0x445   : > { %v4679_v55 = vsel %vm9549_vm14, %v4647_v8, %v4212_v26  ;;  %v4585_v42 = vsel %vm1952_vm8, %v4553_v2, %v4095_v10 }
 0x448   : > { %v4130_v11 = vpop.permute.xlu1 %4129  ;;  %v4247_v28 = vpop.permute.xlu0 %4246 }
 0x449   : > { %v4711_v12 = vsel %vm9550_vm15, %v4679_v55, %v4247_v28  ;;  %v4617_v6 = vsel %vm2025_vm9, %v4585_v42, %v4130_v11 }
 0x44c   : > { %v4167_v34 = vpop.permute.xlu1 %4166  ;;  %v4455_v16 = vpop.permute.xlu0 %4454 }
 0x44d   : > { %v4743_v1 = vsel %vm9551_vm4, %v4711_v12, %v4455_v16  ;;  %v4649_v4 = vsel %vm2098_vm10, %v4617_v6, %v4167_v34 }
 0x44e   : > { %5586 = vmatprep.mubr.msk.bf16.mxu1 %vm4773_vm12, %v4743_v1 }
 0x450   : > { %v4214_v0 = vpop.permute.xlu1 %4213 }
 0x451   : > { %v4681_v3 = vsel %vm9543_vm2, %v4649_v4, %v4214_v0 }
 0x454   : > { %v5568_v19 = vpop.f32.mrf.mxu1  ;;  %v4249_v38 = vpop.permute.xlu1 %4248 }
 0x455   : > { %v4885_v15 = vadd.f32 %v5568_v19, %v8807_v45  ;;  %v4713_v51 = vsel %vm9552_vm6, %v4681_v3, %v4249_v38 }
 0x456   : > { %v4876_v50 = vpop.f32.mrf.mxu1 }
 0x457   : > { %4981 = vst.msk [vmem:[#allocation4 + $0x50] sm:$0xff] %vm1806_vm5, %v4885_v15  ;;  %v4877_v20 = vadd.f32 %v8807_v45, %v4876_v50 }
 0x458   : > { %v5569_v17 = vpop.f32.mrf.mxu1  ;;  %v4457_v43 = vpop.permute.xlu1 %4456 }
 0x459   : > { %4979 = vst.msk [vmem:[#allocation4 + $0x40] sm:$0xff] %vm1806_vm5, %v4877_v20  ;;  %v4888_v48 = vadd.f32 %v5569_v17, %v8807_v45  ;;  %v4745_v30 = vsel %vm9553_vm7, %v4713_v51, %v4457_v43 }
 0x45a   : > { %v4879_v13 = vpop.f32.mrf.mxu1  ;;  %5587 = vmatmul.mubr.msk.bf16.gmra.mxu1 %vm4773_vm12, %v4745_v30 }
 0x45b   : > { %4982 = vst.msk [vmem:[#allocation4 + $0x58] sm:$0xff] %vm1806_vm5, %v4888_v48  ;;  %v4880_v7 = vadd.f32 %v8807_v45, %v4879_v13 }
 0x45d   : > { %4980 = vst.msk [vmem:[#allocation4 + $0x48] sm:$0xff] %vm1806_vm5, %v4880_v7 }
 0x462   : > { %v5039_v56 = vld [vmem:[#allocation4 + $0x50] ss:$2 sm:$0xff]  ;;  %v5055_v53 = vld [vmem:[#allocation4 + $0x51] ss:$2 sm:$0xff] }
 0x464   : > { %v5007_v63 = vld [vmem:[#allocation4 + $0x40] ss:$2 sm:$0xff]  ;;  %v5023_v44 = vld [vmem:[#allocation4 + $0x41] ss:$2 sm:$0xff] }
 0x465   : > { %v5068_v14 = vadd.f32 %v5023_v44, %v5007_v63 }
 0x467   : > { %v5076_v61 = vadd.f32 %v5068_v14, %v5039_v56 }
 0x469   : > { %v5084_v57 = vadd.f32 %v5076_v61, %v5055_v53 }
 0x46b   : > { %5092 = vst.msk [vmem:[%s8833_s11 + $0x10] sm:$0xff] %vm1806_vm5, %v5084_v57 }
 0x47c   : > { %v5572_v62 = vpop.f32.mrf.mxu1 }
 0x47d   : > { %v4901_v23 = vadd.f32 %v5572_v62, %v8807_v45 }
 0x47e   : > { %v4892_v59 = vpop.f32.mrf.mxu1 }
 0x47f   : > { %4985 = vst.msk [vmem:[#allocation4 + $0x70] sm:$0xff] %vm1806_vm5, %v4901_v23  ;;  %v4893_v9 = vadd.f32 %v8807_v45, %v4892_v59 }
 0x480   : > { %v5573_v25 = vpop.f32.mrf.mxu1 }
 0x481   : > { %4983 = vst.msk [vmem:[#allocation4 + $0x60] sm:$0xff] %vm1806_vm5, %v4893_v9  ;;  %v4904_v40 = vadd.f32 %v5573_v25, %v8807_v45 }
 0x482   : > { %v4895_v29 = vpop.f32.mrf.mxu1 }
 0x483   : > { %4986 = vst.msk [vmem:[#allocation4 + $0x78] sm:$0xff] %vm1806_vm5, %v4904_v40  ;;  %v4896_v46 = vadd.f32 %v8807_v45, %v4895_v29 }
 0x485   : > { %4984 = vst.msk [vmem:[#allocation4 + $0x68] sm:$0xff] %vm1806_vm5, %v4896_v46 }
 0x48a   : > { %v5041_v49 = vld [vmem:[#allocation4 + $0x70] ss:$2 sm:$0xff]  ;;  %v5057_v41 = vld [vmem:[#allocation4 + $0x71] ss:$2 sm:$0xff] }
 0x48c   : > { %v5009_v35 = vld [vmem:[#allocation4 + $0x60] ss:$2 sm:$0xff]  ;;  %v5025_v24 = vld [vmem:[#allocation4 + $0x61] ss:$2 sm:$0xff] }
 0x48d   : > { %v5069_v37 = vadd.f32 %v5025_v24, %v5009_v35 }
 0x48f   : > { %v5077_v39 = vadd.f32 %v5069_v37, %v5041_v49 }
 0x491   : > { %v5085_v36 = vadd.f32 %v5077_v39, %v5057_v41 }
 0x493   : > { %5093 = vst.msk [vmem:[%s8833_s11 + $0x18] sm:$0xff] %vm1806_vm5, %v5085_v36 }
 0x4a3   : > { %v5576_v54 = vpop.f32.mrf.mxu1 }
 0x4a4   : > { %v4917_v58 = vadd.f32 %v5576_v54, %v8807_v45 }
 0x4a5   : > { %v4908_v52 = vpop.f32.mrf.mxu1 }
 0x4a6   : > { %4989 = vst.msk [vmem:[#allocation4 + $0x90] sm:$0xff] %vm1806_vm5, %v4917_v58  ;;  %v4909_v18 = vadd.f32 %v8807_v45, %v4908_v52 }
 0x4a7   : > { %v5577_v21 = vpop.f32.mrf.mxu1 }
 0x4a8   : > { %4987 = vst.msk [vmem:[#allocation4 + $0x80] sm:$0xff] %vm1806_vm5, %v4909_v18  ;;  %v4920_v60 = vadd.f32 %v5577_v21, %v8807_v45 }
 0x4a9   : > { %v4911_v22 = vpop.f32.mrf.mxu1 }
 0x4aa   : > { %4990 = vst.msk [vmem:[#allocation4 + $0x98] sm:$0xff] %vm1806_vm5, %v4920_v60  ;;  %v4912_v47 = vadd.f32 %v8807_v45, %v4911_v22 }
 0x4ac   : > { %4988 = vst.msk [vmem:[#allocation4 + $0x88] sm:$0xff] %vm1806_vm5, %v4912_v47 }
 0x4b1   : > { %v5043_v33 = vld [vmem:[#allocation4 + $0x90] ss:$2 sm:$0xff]  ;;  %v5059_v28 = vld [vmem:[#allocation4 + $0x91] ss:$2 sm:$0xff] }
 0x4b3   : > { %v5011_v32 = vld [vmem:[#allocation4 + $0x80] ss:$2 sm:$0xff]  ;;  %v5027_v10 = vld [vmem:[#allocation4 + $0x81] ss:$2 sm:$0xff] }
 0x4b4   : > { %v5070_v26 = vadd.f32 %v5027_v10, %v5011_v32 }
 0x4b6   : > { %v5078_v11 = vadd.f32 %v5070_v26, %v5043_v33 }
 0x4b8   : > { %v5086_v5 = vadd.f32 %v5078_v11, %v5059_v28 }
 0x4ba   : > { %5094 = vst.msk [vmem:[%s8833_s11 + $0x20] sm:$0xff] %vm1806_vm5, %v5086_v5 }
 0x4cb   : > { %v5580_v8 = vpop.f32.mrf.mxu1 }
 0x4cc   : > { %v4933_v55 = vadd.f32 %v5580_v8, %v8807_v45 }
 0x4cd   : > { %v4924_v12 = vpop.f32.mrf.mxu1 }
 0x4ce   : > { %4993 = vst.msk [vmem:[#allocation4 + $0xb0] sm:$0xff] %vm1806_vm5, %v4933_v55  ;;  %v4925_v34 = vadd.f32 %v8807_v45, %v4924_v12 }
 0x4cf   : > { %v5581_v16 = vpop.f32.mrf.mxu1 }
 0x4d0   : > { %4991 = vst.msk [vmem:[#allocation4 + $0xa0] sm:$0xff] %vm1806_vm5, %v4925_v34  ;;  %v4936_v1 = vadd.f32 %v5581_v16, %v8807_v45 }
 0x4d1   : > { %v4927_v0 = vpop.f32.mrf.mxu1 }
 0x4d2   : > { %4994 = vst.msk [vmem:[#allocation4 + $0xb8] sm:$0xff] %vm1806_vm5, %v4936_v1  ;;  %v4928_v27 = vadd.f32 %v8807_v45, %v4927_v0 }
 0x4d4   : > { %4992 = vst.msk [vmem:[#allocation4 + $0xa8] sm:$0xff] %vm1806_vm5, %v4928_v27 }
 0x4d9   : > { %v5045_v19 = vld [vmem:[#allocation4 + $0xb0] ss:$2 sm:$0xff]  ;;  %v5061_v6 = vld [vmem:[#allocation4 + $0xb1] ss:$2 sm:$0xff] }
 0x4db   : > { %v5013_v31 = vld [vmem:[#allocation4 + $0xa0] ss:$2 sm:$0xff]  ;;  %v5029_v2 = vld [vmem:[#allocation4 + $0xa1] ss:$2 sm:$0xff] }
 0x4dc   : > { %v5071_v42 = vadd.f32 %v5029_v2, %v5013_v31 }
 0x4de   : > { %v5079_v38 = vadd.f32 %v5071_v42, %v5045_v19 }
 0x4e0   : > { %v5087_v15 = vadd.f32 %v5079_v38, %v5061_v6 }
 0x4e2   : > { %5095 = vst.msk [vmem:[%s8833_s11 + $0x28] sm:$0xff] %vm1806_vm5, %v5087_v15 }
 0x4f3   : > { %v5584_v4 = vpop.f32.mrf.mxu1 }
 0x4f4   : > { %v4949_v50 = vadd.f32 %v5584_v4, %v8807_v45 }
 0x4f5   : > { %v4940_v3 = vpop.f32.mrf.mxu1 }
 0x4f6   : > { %4997 = vst.msk [vmem:[#allocation4 + $0xd0] sm:$0xff] %vm1806_vm5, %v4949_v50  ;;  %v4941_v20 = vadd.f32 %v8807_v45, %v4940_v3 }
 0x4f7   : > { %v5585_v51 = vpop.f32.mrf.mxu1 }
 0x4f8   : > { %4995 = vst.msk [vmem:[#allocation4 + $0xc0] sm:$0xff] %vm1806_vm5, %v4941_v20  ;;  %v4952_v17 = vadd.f32 %v5585_v51, %v8807_v45 }
 0x4f9   : > { %v4943_v43 = vpop.f32.mrf.mxu1 }
 0x4fa   : > { %4998 = vst.msk [vmem:[#allocation4 + $0xd8] sm:$0xff] %vm1806_vm5, %v4952_v17  ;;  %v4944_v48 = vadd.f32 %v8807_v45, %v4943_v43 }
 0x4fc   : > { %4996 = vst.msk [vmem:[#allocation4 + $0xc8] sm:$0xff] %vm1806_vm5, %v4944_v48 }
 0x501   : > { %v5047_v63 = vld [vmem:[#allocation4 + $0xd0] ss:$2 sm:$0xff]  ;;  %v5063_v14 = vld [vmem:[#allocation4 + $0xd1] ss:$2 sm:$0xff] }
 0x503   : > { %v5015_v30 = vld [vmem:[#allocation4 + $0xc0] ss:$2 sm:$0xff]  ;;  %v5031_v13 = vld [vmem:[#allocation4 + $0xc1] ss:$2 sm:$0xff] }
 0x504   : > { %v5072_v7 = vadd.f32 %v5031_v13, %v5015_v30 }
 0x506   : > { %v5080_v44 = vadd.f32 %v5072_v7, %v5047_v63 }
 0x508   : > { %v5088_v56 = vadd.f32 %v5080_v44, %v5063_v14 }
 0x50a   : > { %5096 = vst.msk [vmem:[%s8833_s11 + $0x30] sm:$0xff] %vm1806_vm5, %v5088_v56 }
 0x51a   : > { %v5588_v61 = vpop.f32.mrf.mxu1 }
 0x51b   : > { %v4965_v53 = vadd.f32 %v5588_v61, %v8807_v45 }
 0x51c   : > { %v4956_v57 = vpop.f32.mrf.mxu1 }
 0x51d   : > { %5001 = vst.msk [vmem:[#allocation4 + $0xf0] sm:$0xff] %vm1806_vm5, %v4965_v53  ;;  %v4957_v62 = vadd.f32 %v8807_v45, %v4956_v57 }
 0x51e   : > { %v5589_v23 = vpop.f32.mrf.mxu1 }
 0x51f   : > { %4999 = vst.msk [vmem:[#allocation4 + $0xe0] sm:$0xff] %vm1806_vm5, %v4957_v62  ;;  %v4968_v59 = vadd.f32 %v5589_v23, %v8807_v45 }
 0x520   : > { %v4959_v9 = vpop.f32.mrf.mxu1 }
 0x521   : > { %5002 = vst.msk [vmem:[#allocation4 + $0xf8] sm:$0xff] %vm1806_vm5, %v4968_v59  ;;  %v4960_v25 = vadd.f32 %v8807_v45, %v4959_v9 }
 0x523   : > { %5000 = vst.msk [vmem:[#allocation4 + $0xe8] sm:$0xff] %vm1806_vm5, %v4960_v25 }
 0x528   : > { %v5049_v35 = vld [vmem:[#allocation4 + $0xf0] ss:$2 sm:$0xff]  ;;  %v5065_v37 = vld [vmem:[#allocation4 + $0xf1] ss:$2 sm:$0xff] }
 0x52a   : > { %v5017_v40 = vld [vmem:[#allocation4 + $0xe0] ss:$2 sm:$0xff]  ;;  %v5033_v29 = vld [vmem:[#allocation4 + $0xe1] ss:$2 sm:$0xff] }
 0x52b   : > { %v5073_v46 = vadd.f32 %v5033_v29, %v5017_v40 }
 0x52d   : > { %v5081_v24 = vadd.f32 %v5073_v46, %v5049_v35 }
 0x52f   : > { %v5089_v49 = vadd.f32 %v5081_v24, %v5065_v37 }
 0x531   : > { %5097 = vst.msk [vmem:[%s8833_s11 + $0x38] sm:$0xff] %vm1806_vm5, %v5089_v49 }
 0x532   : > { %5762 = shalt.err (!%p5759_p5)
}
 0x533   : > { %s5763_s28 = scalar_lea.hbm %s8957_s17, 1024  ;;  %s5767_s11 = scalar_lea.hbm %s9017_s6, 2048 }
 0x534   : > { %p5764_p6 = scmp.ne.s32.totalorder %s8957_s17, %s5763_s28  ;;  %p5768_p10 = scmp.lt.s32.totalorder %s8957_s17, %s9017_s6 }
 0x535   : > { %p5769_p11 = scmp.lt.s32.totalorder %s5767_s11, %s5763_s28 }
 0x536   : > { %p5765_p7 = pnand %p5764_p6, %p5914_p4 }
 0x537   : > { %p5770_p12 = por %p5769_p11, %p5768_p10 }
 0x538   : > { %p5766_p9 = pneg %p5765_p7 }
 0x53a   : > { %p5771_p13 = pnand %p5770_p12, %p5766_p9 }
 0x53c   : > { %5774 = shalt.err (!%p5771_p13)
}
 0x53d   : > { %s5838_s15 = smov 128  }
 0x53e   : > { %5594 = dma.vmem_to_hbm [thread:$0]  (%p5914_p4), %s8959_s18, 1024, %s8957_s17, %s8965_s19, %s5838_s15, %s5838_s15, %s5829_s27  }
 0x53f PF: > { %p5601_p0 = scmp.ge.s32.totalorder %s5825_s26, 2  ;;  %s5129_s24 = sand.u32 1, %s5805_s21  }
 0x540   : > { %s5130_s13 = scalar_lea.sflag [#allocation6], %s5129_s24 }
 0x541   : > { %p5597_p1 = pnand %p5601_p0, %p5921_p8 }
 0x543   : > { %p5598_p2 = pneg %p5597_p1 }
 0x545   : > { %5800 = dma.done.wait (%p5598_p2), %s5130_s13, 1024  }
 0x546   : > { %5802 = vsyncadd (%p5598_p2), %s5130_s13, 4294966272  ;;  %s19_s26 = sadd.s32 1, %s5825_s26   ;;  %s9554_s21 = smov %s5809_s22 }
 0x547   : > { %p16_p3 = scmp.ge.s32.totalorder %s19_s26, 4   ;;  %s9555_s22 = smov %s5813_s23 }
 0x548   : > { %s9556_s23 = smov %s5927_s10  ;;  %s9557_s24 = smov %s5821_s25 }
 0x549   : > { %s9558_s25 = smov %s9560_s29  ;;  %18 = sbr.rel (!%p16_p3) target bundleno = 4 (0x4), region = 120 }
 0x54e   :  { %5135 = vsyncpa [#allocation6], 1 }
 0x54f   :  { %5137 = vsyncpa [#allocation6 + $0x1], 1 }

</bundles_post_ra>
